<compile_context>
chip_gen: v7x
topology: tpu7x:2x2x1
jax: 0.10.0
libtpu: 0.0.40
codegen_flags: <defaults>
</compile_context>

<pallas_src>
import math
import functools

import jax
import jax.numpy as jnp
from jax.experimental import pallas as pl
from jax.experimental.pallas import tpu as pltpu

NEG_INF = -1e9
LANE = 128   # lane width (last dim alignment)
SUB = 8      # sublane alignment


# ---------------------------------------------------------------------------
# chip-generation dispatch of tile sizes / VMEM budget
# ---------------------------------------------------------------------------

def _chip_config():
    vmem_cap = 64 << 20
    try:
        info = pltpu.get_tpu_info()
        vmem_cap = int(info.vmem_capacity_bytes)
    except Exception:
        pass
    if vmem_cap >= (96 << 20):
        # v5e / v6e: 128 MiB VMEM -> big tiles, generous scoped budget.
        return dict(vmem_limit=96 << 20, lin_tm=512, lin_tn=512, lin_tk=512,
                    ln_tm=1024, attn_tq=512, attn_tk=1024)
    # v7x: 64 MiB VMEM per TensorCore -> conservative tiles.
    return dict(vmem_limit=48 << 20, lin_tm=256, lin_tn=256, lin_tk=512,
                ln_tm=512, attn_tq=256, attn_tk=512)


_CFG = _chip_config()


def _round_up(x, m):
    return ((x + m - 1) // m) * m


def _tile(dim, max_tile, align):
    """Return (tile, padded_dim).

    Uses a full-dim block (no padding, exempt from the (8,128) rule) when the dim
    fits in one tile, otherwise the largest aligned tile that divides the dim,
    otherwise pads up to a tile multiple."""
    if dim <= max_tile:
        return dim, dim
    t = (max_tile // align) * align
    while t >= align:
        if dim % t == 0:
            return t, dim
        t -= align
    t = (max_tile // align) * align
    return t, _round_up(dim, t)


# ---------------------------------------------------------------------------
# generic tiled linear:  Y = act(X @ W + b [+ residual])
#   W stored pre-transposed (K, N), bf16, pre-padded to 128-lane multiples.
# ---------------------------------------------------------------------------

def _linear_kernel(x_ref, w_ref, b_ref, *rest, activation, has_residual):
    if has_residual:
        r_ref, o_ref, acc_ref = rest
    else:
        r_ref = None
        o_ref, acc_ref = rest

    @pl.when(pl.program_id(2) == 0)
    def _():
        acc_ref[...] = jnp.zeros_like(acc_ref)

    acc_ref[...] += jnp.dot(x_ref[...].astype(jnp.bfloat16), w_ref[...],
                            preferred_element_type=jnp.float32)

    @pl.when(pl.program_id(2) == pl.num_programs(2) - 1)
    def _():
        y = acc_ref[...] + b_ref[...]
        if activation == "relu":
            y = jnp.maximum(y, 0.0)
        if has_residual:
            y = y + r_ref[...].astype(jnp.float32)
        o_ref[...] = y.astype(o_ref.dtype)


def linear(x2d, w, b, *, activation=None, residual=None, out_dtype=jnp.float32):
    """x2d: (M, K) K%128==0, w: (K, N) bf16 N%128==0, b: (1, N) f32."""
    M, K = x2d.shape
    K2, N = w.shape
    assert K2 == K and K % LANE == 0 and N % LANE == 0

    tm, Mp = _tile(M, _CFG["lin_tm"], SUB)
    tn, _ = _tile(N, _CFG["lin_tn"], LANE)
    tk, _ = _tile(K, _CFG["lin_tk"], LANE)
    if Mp != M:
        x2d = jnp.pad(x2d, ((0, Mp - M), (0, 0)))
        if residual is not None:
            residual = jnp.pad(residual, ((0, Mp - M), (0, 0)))

    in_specs = [pl.BlockSpec((tm, tk), lambda i, j, k: (i, k)),
                pl.BlockSpec((tk, tn), lambda i, j, k: (k, j)),
                pl.BlockSpec((1, tn), lambda i, j, k: (0, j))]
    args = [x2d, w, b]
    if residual is not None:
        in_specs.append(pl.BlockSpec((tm, tn), lambda i, j, k: (i, j)))
        args.append(residual)

    out = pl.pallas_call(
        functools.partial(_linear_kernel, activation=activation,
                          has_residual=residual is not None),
        out_shape=jax.ShapeDtypeStruct((Mp, N), out_dtype),
        grid_spec=pltpu.PrefetchScalarGridSpec(
            num_scalar_prefetch=0,
            grid=(Mp // tm, N // tn, K // tk),
            in_specs=in_specs,
            out_specs=pl.BlockSpec((tm, tn), lambda i, j, k: (i, j)),
            scratch_shapes=[pltpu.VMEM((tm, tn), jnp.float32)]),
        compiler_params=pltpu.CompilerParams(
            dimension_semantics=("parallel", "parallel", "arbitrary"),
            vmem_limit_bytes=_CFG["vmem_limit"]),
        cost_estimate=pl.CostEstimate(
            flops=2 * Mp * K * N,
            transcendentals=0,
            bytes_accessed=4 * Mp * K + 2 * K * N + 4 * Mp * N),
    )(*args)
    return out[:M] if Mp != M else out


# ---------------------------------------------------------------------------
# LayerNorm over padded Ep lanes, normalizing only over the true E columns.
# gamma/beta padded lanes are zero, so padded output lanes stay exactly zero.
# ---------------------------------------------------------------------------

def _ln_kernel(x_ref, g_ref, b_ref, o_ref, *, n_valid):
    x = x_ref[...].astype(jnp.float32)
    inv_n = 1.0 / n_valid
    mean = jnp.sum(x, axis=-1, keepdims=True) * inv_n
    var = jnp.sum(x * x, axis=-1, keepdims=True) * inv_n - mean * mean
    inv = jax.lax.rsqrt(var + 1e-5)
    o_ref[...] = ((x - mean) * inv * g_ref[...] + b_ref[...]).astype(o_ref.dtype)


def layer_norm(x2d, gamma, beta, *, n_valid):
    M, Ep = x2d.shape
    tm, Mp = _tile(M, _CFG["ln_tm"], SUB)
    if Mp != M:
        x2d = jnp.pad(x2d, ((0, Mp - M), (0, 0)))
    row = pl.BlockSpec((tm, Ep), lambda i: (i, 0))
    vec = pl.BlockSpec((1, Ep), lambda i: (0, 0))
    out = pl.pallas_call(
        functools.partial(_ln_kernel, n_valid=float(n_valid)),
        out_shape=jax.ShapeDtypeStruct((Mp, Ep), jnp.float32),
        grid_spec=pltpu.PrefetchScalarGridSpec(
            num_scalar_prefetch=0,
            grid=(Mp // tm,),
            in_specs=[row, vec, vec],
            out_specs=row),
        compiler_params=pltpu.CompilerParams(
            dimension_semantics=("parallel",),
            vmem_limit_bytes=_CFG["vmem_limit"]),
    )(x2d, gamma, beta)
    return out[:M] if Mp != M else out


# ---------------------------------------------------------------------------
# per-head QKV projection:  (N, S, Ep) x (CH, Ep, Dh) -> (N, CH, S, Dh) bf16
# writes Q/K/V directly in head-major layout -> no HBM transposes.
# ---------------------------------------------------------------------------

def _head_proj_kernel(x_ref, w_ref, b_ref, o_ref, acc_ref):
    @pl.when(pl.program_id(3) == 0)
    def _():
        acc_ref[...] = jnp.zeros_like(acc_ref)

    acc_ref[...] += jnp.dot(x_ref[0].astype(jnp.bfloat16), w_ref[0],
                            preferred_element_type=jnp.float32)

    @pl.when(pl.program_id(3) == pl.num_programs(3) - 1)
    def _():
        o_ref[0, 0] = (acc_ref[...] + b_ref[0]).astype(o_ref.dtype)


def head_projection(x3d, w, b):
    """x3d: (N, S, Ep) f32, w: (CH, Ep, Dh) bf16, b: (CH, 1, Dh) f32."""
    Nb, S, Ep = x3d.shape
    CH, _, Dh = w.shape
    ts, Sp = _tile(S, _CFG["lin_tm"], SUB)
    tk, _ = _tile(Ep, _CFG["lin_tk"], LANE)
    if Sp != S:
        x3d = jnp.pad(x3d, ((0, 0), (0, Sp - S), (0, 0)))

    out = pl.pallas_call(
        _head_proj_kernel,
        out_shape=jax.ShapeDtypeStruct((Nb, CH, Sp, Dh), jnp.bfloat16),
        grid_spec=pltpu.PrefetchScalarGridSpec(
            num_scalar_prefetch=0,
            grid=(Nb, CH, Sp // ts, Ep // tk),
            in_specs=[
                pl.BlockSpec((1, ts, tk), lambda n, c, i, k: (n, i, k)),
                pl.BlockSpec((1, tk, Dh), lambda n, c, i, k: (c, k, 0)),
                pl.BlockSpec((1, 1, Dh), lambda n, c, i, k: (c, 0, 0)),
            ],
            out_specs=pl.BlockSpec((1, 1, ts, Dh), lambda n, c, i, k: (n, c, i, 0)),
            scratch_shapes=[pltpu.VMEM((ts, Dh), jnp.float32)]),
        compiler_params=pltpu.CompilerParams(
            dimension_semantics=("parallel", "parallel", "parallel", "arbitrary"),
            vmem_limit_bytes=_CFG["vmem_limit"]),
    )(x3d, w, b)
    return out[:, :, :S, :] if Sp != S else out


# ---------------------------------------------------------------------------
# head output projection: (N, H, S, Dh) x (H, Dh, Ep) -> (N, S, Ep)
# reduction over heads, residual add fused in the epilogue.
# ---------------------------------------------------------------------------

def _out_proj_kernel(y_ref, w_ref, b_ref, r_ref, o_ref, acc_ref):
    h = pl.program_id(3)

    @pl.when(h == 0)
    def _():
        acc_ref[...] = jnp.zeros_like(acc_ref)

    acc_ref[...] += jnp.dot(y_ref[0, 0], w_ref[0],
                            preferred_element_type=jnp.float32)

    @pl.when(h == pl.num_programs(3) - 1)
    def _():
        o_ref[0] = (acc_ref[...] + b_ref[...] +
                    r_ref[0].astype(jnp.float32)).astype(o_ref.dtype)


def head_output_projection(y4d, w, b, residual):
    """y4d: (N, H, S, Dh) bf16, w: (H, Dh, Ep) bf16, b: (1, Ep) f32,
    residual: (N, S, Ep) f32.  Returns residual + concat_heads(y) @ W_out + b."""
    Nb, H, S, Dh = y4d.shape
    Ep = w.shape[2]
    ts, Sp = _tile(S, _CFG["lin_tm"], SUB)
    tn, _ = _tile(Ep, _CFG["lin_tn"], LANE)
    if Sp != S:
        y4d = jnp.pad(y4d, ((0, 0), (0, 0), (0, Sp - S), (0, 0)))
        residual = jnp.pad(residual, ((0, 0), (0, Sp - S), (0, 0)))

    out = pl.pallas_call(
        _out_proj_kernel,
        out_shape=jax.ShapeDtypeStruct((Nb, Sp, Ep), jnp.float32),
        grid_spec=pltpu.PrefetchScalarGridSpec(
            num_scalar_prefetch=0,
            grid=(Nb, Sp // ts, Ep // tn, H),
            in_specs=[
                pl.BlockSpec((1, 1, ts, Dh), lambda n, i, j, h: (n, h, i, 0)),
                pl.BlockSpec((1, Dh, tn), lambda n, i, j, h: (h, 0, j)),
                pl.BlockSpec((1, tn), lambda n, i, j, h: (0, j)),
                pl.BlockSpec((1, ts, tn), lambda n, i, j, h: (n, i, j)),
            ],
            out_specs=pl.BlockSpec((1, ts, tn), lambda n, i, j, h: (n, i, j)),
            scratch_shapes=[pltpu.VMEM((ts, tn), jnp.float32)]),
        compiler_params=pltpu.CompilerParams(
            dimension_semantics=("parallel", "parallel", "parallel", "arbitrary"),
            vmem_limit_bytes=_CFG["vmem_limit"]),
    )(y4d, w, b, residual)
    return out[:, :S, :] if Sp != S else out


# ---------------------------------------------------------------------------
# flash-style attention: grid (N, H, q_blocks, kv_blocks), online softmax
# ---------------------------------------------------------------------------

def _flash_kernel(q_ref, k_ref, v_ref, *rest, scale, has_bias):
    if has_bias:
        bias_ref, kpad_ref, o_ref, m_sc, l_sc, acc_sc = rest
    else:
        bias_ref = None
        kpad_ref, o_ref, m_sc, l_sc, acc_sc = rest

    ki = pl.program_id(3)

    @pl.when(ki == 0)
    def _():
        m_sc[...] = jnp.full_like(m_sc, -1e30)
        l_sc[...] = jnp.zeros_like(l_sc)
        acc_sc[...] = jnp.zeros_like(acc_sc)

    q = q_ref[0, 0]                      # (tq, Dh) bf16
    k = k_ref[0, 0]                      # (tk, Dh) bf16
    v = v_ref[0, 0]                      # (tk, Dh) bf16

    s = jnp.einsum("qd,kd->qk", q, k,
                   preferred_element_type=jnp.float32) * scale
    if has_bias:
        s = s + bias_ref[...]            # (tq, tk) additive mask
    s = s + kpad_ref[0]                  # (1, tk) key-padding bias, broadcast

    m_prev = m_sc[...]
    m_new = jnp.maximum(m_prev, jnp.max(s, axis=-1, keepdims=True))
    alpha = jnp.exp(m_prev - m_new)
    p = jnp.exp(s - m_new)
    l_sc[...] = alpha * l_sc[...] + jnp.sum(p, axis=-1, keepdims=True)
    acc_sc[...] = alpha * acc_sc[...] + jnp.dot(
        p.astype(jnp.bfloat16), v, preferred_element_type=jnp.float32)
    m_sc[...] = m_new

    @pl.when(ki == pl.num_programs(3) - 1)
    def _():
        o_ref[0, 0] = (acc_sc[...] * pl.reciprocal(l_sc[...], approx=True)
                       ).astype(o_ref.dtype)


def attention(q_heads, kv_heads, *, nhead, q_off, k_off, v_off, head_dim,
              attn_bias, key_pad_bias):
    """q_heads: (N, CHq, Sq, Dh) bf16, kv_heads: (N, CHk, Sk, Dh) bf16 (packed heads).
    q/k/v head offsets select components inside the packed-head arrays.
    attn_bias: (Sq, Sk) f32 additive or None.  key_pad_bias: (N, 1, Sk) f32 additive.
    Returns (N, nhead, Sq, Dh) bf16."""
    Nb = q_heads.shape[0]
    Sq = q_heads.shape[2]
    Sk = kv_heads.shape[2]
    Dh = head_dim
    scale = 1.0 / math.sqrt(Dh)

    tq, Sqp = _tile(Sq, _CFG["attn_tq"], SUB)
    tk, Skp = _tile(Sk, _CFG["attn_tk"], LANE)
    if Sqp != Sq:
        q_heads = jnp.pad(q_heads, ((0, 0), (0, 0), (0, Sqp - Sq), (0, 0)))
        if attn_bias is not None:
            attn_bias = jnp.pad(attn_bias, ((0, Sqp - Sq), (0, 0)))
    if Skp != Sk:
        kv_heads = jnp.pad(kv_heads, ((0, 0), (0, 0), (0, Skp - Sk), (0, 0)))
        if attn_bias is not None:
            attn_bias = jnp.pad(attn_bias, ((0, 0), (0, Skp - Sk)))
        key_pad_bias = jnp.pad(key_pad_bias, ((0, 0), (0, 0), (0, Skp - Sk)),
                               constant_values=NEG_INF)

    has_bias = attn_bias is not None
    in_specs = [
        pl.BlockSpec((1, 1, tq, Dh), lambda n, h, qi, ki: (n, h + q_off, qi, 0)),
        pl.BlockSpec((1, 1, tk, Dh), lambda n, h, qi, ki: (n, h + k_off, ki, 0)),
        pl.BlockSpec((1, 1, tk, Dh), lambda n, h, qi, ki: (n, h + v_off, ki, 0)),
    ]
    args = [q_heads, kv_heads, kv_heads]
    if has_bias:
        in_specs.append(pl.BlockSpec((tq, tk), lambda n, h, qi, ki: (qi, ki)))
        args.append(attn_bias.astype(jnp.float32))
    in_specs.append(pl.BlockSpec((1, 1, tk), lambda n, h, qi, ki: (n, 0, ki)))
    args.append(key_pad_bias)

    out = pl.pallas_call(
        functools.partial(_flash_kernel, scale=scale, has_bias=has_bias),
        out_shape=jax.ShapeDtypeStruct((Nb, nhead, Sqp, Dh), jnp.bfloat16),
        grid_spec=pltpu.PrefetchScalarGridSpec(
            num_scalar_prefetch=0,
            grid=(Nb, nhead, Sqp // tq, Skp // tk),
            in_specs=in_specs,
            out_specs=pl.BlockSpec((1, 1, tq, Dh),
                                   lambda n, h, qi, ki: (n, h, qi, 0)),
            scratch_shapes=[pltpu.VMEM((tq, 1), jnp.float32),
                            pltpu.VMEM((tq, 1), jnp.float32),
                            pltpu.VMEM((tq, Dh), jnp.float32)]),
        compiler_params=pltpu.CompilerParams(
            dimension_semantics=("parallel", "parallel", "parallel", "arbitrary"),
            vmem_limit_bytes=_CFG["vmem_limit"]),
        cost_estimate=pl.CostEstimate(
            flops=4 * Nb * nhead * Sqp * Skp * Dh,
            transcendentals=Nb * nhead * Sqp * Skp,
            bytes_accessed=2 * Nb * nhead * Dh * (Sqp + 2 * Skp * (Sqp // tq) + Sqp)),
    )(*args)
    return out[:, :, :Sq, :] if Sqp != Sq else out


# ---------------------------------------------------------------------------
# transformer building blocks (glue in JAX, compute in Pallas)
# ---------------------------------------------------------------------------

def self_attention_block(x3d, p, *, nhead, head_dim, attn_bias, key_pad_bias):
    """x3d: (N, S, Ep).  Returns x + MHA(x) (residual fused into the out projection)."""
    qkv = head_projection(x3d, p["qkv_w"], p["qkv_b"])      # (N, 3H, S, Dh) bf16
    o = attention(qkv, qkv, nhead=nhead, q_off=0, k_off=nhead, v_off=2 * nhead,
                  head_dim=head_dim, attn_bias=attn_bias, key_pad_bias=key_pad_bias)
    return head_output_projection(o, p["out_w"], p["out_b"], residual=x3d)


def cross_attention_block(x3d, mem3d, p, *, nhead, head_dim, key_pad_bias):
    qh = head_projection(x3d, p["q_w"], p["q_b"])            # (N, H,  T, Dh)
    kv = head_projection(mem3d, p["kv_w"], p["kv_b"])        # (N, 2H, S, Dh)
    o = attention(qh, kv, nhead=nhead, q_off=0, k_off=0, v_off=nhead,
                  head_dim=head_dim, attn_bias=None, key_pad_bias=key_pad_bias)
    return head_output_projection(o, p["out_w"], p["out_b"], residual=x3d)


def encoder_layer(x3d, p, *, nhead, head_dim, e_true, src_bias, src_kpad):
    Nb, S, Ep = x3d.shape
    y = self_attention_block(x3d, p["self_attn"], nhead=nhead, head_dim=head_dim,
                             attn_bias=src_bias, key_pad_bias=src_kpad)
    x2 = layer_norm(y.reshape(Nb * S, Ep), p["norm1_g"], p["norm1_b"], n_valid=e_true)
    h = linear(x2, p["lin1_w"], p["lin1_b"], activation="relu",
               out_dtype=jnp.bfloat16)
    y2 = linear(h, p["lin2_w"], p["lin2_b"], residual=x2)
    x2 = layer_norm(y2, p["norm2_g"], p["norm2_b"], n_valid=e_true)
    return x2.reshape(Nb, S, Ep)


def decoder_layer(x3d, mem3d, p, *, nhead, head_dim, e_true,
                  tgt_bias, tgt_kpad, mem_kpad):
    Nb, T, Ep = x3d.shape
    y = self_attention_block(x3d, p["self_attn"], nhead=nhead, head_dim=head_dim,
                             attn_bias=tgt_bias, key_pad_bias=tgt_kpad)
    x2 = layer_norm(y.reshape(Nb * T, Ep), p["norm1_g"], p["norm1_b"],
                    n_valid=e_true).reshape(Nb, T, Ep)
    y = cross_attention_block(x2, mem3d, p["cross_attn"], nhead=nhead,
                              head_dim=head_dim, key_pad_bias=mem_kpad)
    x2 = layer_norm(y.reshape(Nb * T, Ep), p["norm2_g"], p["norm2_b"], n_valid=e_true)
    h = linear(x2, p["lin1_w"], p["lin1_b"], activation="relu",
               out_dtype=jnp.bfloat16)
    y2 = linear(h, p["lin2_w"], p["lin2_b"], residual=x2)
    x2 = layer_norm(y2, p["norm3_g"], p["norm3_b"], n_valid=e_true)
    return x2.reshape(Nb, T, Ep)


def _kpad_bias(mask, Nb, S):
    """(N, S) bool (True = pad) -> (N, 1, S) additive float bias."""
    if mask is None:
        return jnp.zeros((Nb, 1, S), jnp.float32)
    return jnp.where(mask, NEG_INF, 0.0).astype(jnp.float32)[:, None, :]


def seq2seq_forward(params, src, trg, src_mask, tgt_mask,
                    src_padding_mask, tgt_padding_mask, memory_key_padding_mask,
                    *, nhead, emb_size, tgt_vocab):
    Ep = params["src_emb"].shape[1]
    head_dim = emb_size // nhead
    S, Nb = src.shape
    T = trg.shape[0]
    sqrt_e = math.sqrt(emb_size)

    # TokenEmbedding * sqrt(E) + PositionalEncoding (batch-major, pre-padded to Ep).
    # TODO(synk): embedding gather stays in XLA (jnp.take); no in-kernel DMA gather.
    src_e = jnp.take(params["src_emb"], src.T, axis=0) * sqrt_e + params["pos_emb"][:, :S]
    tgt_e = jnp.take(params["tgt_emb"], trg.T, axis=0) * sqrt_e + params["pos_emb"][:, :T]

    src_bias = src_mask.astype(jnp.float32)        # (S, S) additive
    tgt_bias = tgt_mask.astype(jnp.float32)        # (T, T) additive (causal)
    src_kpad = _kpad_bias(src_padding_mask, Nb, S)
    tgt_kpad = _kpad_bias(tgt_padding_mask, Nb, T)
    mem_kpad = _kpad_bias(memory_key_padding_mask, Nb, S)

    # Encoder stack + final norm
    memory = src_e
    for lp in params["enc_layers"]:
        memory = encoder_layer(memory, lp, nhead=nhead, head_dim=head_dim,
                               e_true=emb_size, src_bias=src_bias, src_kpad=src_kpad)
    memory = layer_norm(memory.reshape(Nb * S, Ep), params["enc_norm_g"],
                        params["enc_norm_b"], n_valid=emb_size).reshape(Nb, S, Ep)

    # Decoder stack + final norm
    out = tgt_e
    for lp in params["dec_layers"]:
        out = decoder_layer(out, memory, lp, nhead=nhead, head_dim=head_dim,
                            e_true=emb_size, tgt_bias=tgt_bias,
                            tgt_kpad=tgt_kpad, mem_kpad=mem_kpad)
    out = layer_norm(out.reshape(Nb * T, Ep), params["dec_norm_g"],
                     params["dec_norm_b"], n_valid=emb_size)

    # Generator
    logits = linear(out, params["gen_w"], params["gen_b"])          # (N*T, Vp)
    logits = logits.reshape(Nb, T, -1)[:, :, :tgt_vocab]
    return logits.transpose(1, 0, 2)                                # (T, N, V)


# ---------------------------------------------------------------------------
# parameter init: weights stored pre-transposed, 128-lane padded, bf16
# ---------------------------------------------------------------------------

def make_positional_encoding(emb_size, maxlen):
    den = jnp.exp(-jnp.arange(0, emb_size, 2, dtype=jnp.float32)
                  * math.log(10000.0) / emb_size)
    pos = jnp.arange(0, maxlen, dtype=jnp.float32).reshape(maxlen, 1)
    pe = jnp.zeros((maxlen, emb_size), jnp.float32)
    pe = pe.at[:, 0::2].set(jnp.sin(pos * den))
    pe = pe.at[:, 1::2].set(jnp.cos(pos * den))
    return pe[None, :, :]                                           # (1, maxlen, E)


def init_params(key, *, num_enc, num_dec, emb_size, nhead,
                src_vocab, tgt_vocab, dim_feedforward, maxlen=64):
    E, H = emb_size, nhead
    Dh = E // H
    Ep = _round_up(E, LANE)
    Fp = _round_up(dim_feedforward, LANE)
    Vp = _round_up(tgt_vocab, LANE)
    keys = iter(jax.random.split(key, 1024))

    def nrm(shape, scale=0.02):
        return (scale * jax.random.normal(next(keys), shape)).astype(jnp.float32)

    def pad_to(x, shape):
        return jnp.pad(x, [(0, t - s) for s, t in zip(x.shape, shape)])

    def head_weight(n_comp):
        w = pad_to(nrm((n_comp * H, E, Dh)), (n_comp * H, Ep, Dh)).astype(jnp.bfloat16)
        b = jnp.zeros((n_comp * H, 1, Dh), jnp.float32)
        return w, b

    def self_attn_p():
        qkv_w, qkv_b = head_weight(3)
        return dict(qkv_w=qkv_w, qkv_b=qkv_b,
                    out_w=pad_to(nrm((H, Dh, E)), (H, Dh, Ep)).astype(jnp.bfloat16),
                    out_b=jnp.zeros((1, Ep), jnp.float32))

    def cross_attn_p():
        q_w, q_b = head_weight(1)
        kv_w, kv_b = head_weight(2)
        return dict(q_w=q_w, q_b=q_b, kv_w=kv_w, kv_b=kv_b,
                    out_w=pad_to(nrm((H, Dh, E)), (H, Dh, Ep)).astype(jnp.bfloat16),
                    out_b=jnp.zeros((1, Ep), jnp.float32))

    def ffn_norms(n_norms):
        d = dict(
            lin1_w=pad_to(nrm((E, dim_feedforward)), (Ep, Fp)).astype(jnp.bfloat16),
            lin1_b=jnp.zeros((1, Fp), jnp.float32),
            lin2_w=pad_to(nrm((dim_feedforward, E)), (Fp, Ep)).astype(jnp.bfloat16),
            lin2_b=jnp.zeros((1, Ep), jnp.float32))
        for i in range(1, n_norms + 1):
            d[f"norm{i}_g"] = pad_to(jnp.ones((1, E), jnp.float32), (1, Ep))
            d[f"norm{i}_b"] = jnp.zeros((1, Ep), jnp.float32)
        return d

    def enc_p():
        return dict(self_attn=self_attn_p(), **ffn_norms(2))

    def dec_p():
        return dict(self_attn=self_attn_p(), cross_attn=cross_attn_p(),
                    **ffn_norms(3))

    return dict(
        src_emb=pad_to(nrm((src_vocab, E), scale=1.0), (src_vocab, Ep)),
        tgt_emb=pad_to(nrm((tgt_vocab, E), scale=1.0), (tgt_vocab, Ep)),
        pos_emb=pad_to(make_positional_encoding(E, maxlen), (1, maxlen, Ep)),
        enc_layers=[enc_p() for _ in range(num_enc)],
        dec_layers=[dec_p() for _ in range(num_dec)],
        enc_norm_g=pad_to(jnp.ones((1, E), jnp.float32), (1, Ep)),
        enc_norm_b=jnp.zeros((1, Ep), jnp.float32),
        dec_norm_g=pad_to(jnp.ones((1, E), jnp.float32), (1, Ep)),
        dec_norm_b=jnp.zeros((1, Ep), jnp.float32),
        gen_w=pad_to(nrm((E, tgt_vocab)), (Ep, Vp)).astype(jnp.bfloat16),
        gen_b=jnp.zeros((1, Vp), jnp.float32),
    )


# ---------------------------------------------------------------------------
# Demo
# ---------------------------------------------------------------------------

if __name__ == "__main__":
    NUM_ENC, NUM_DEC = 2, 2
    EMB, NHEAD = 32, 4
    SRC_VOCAB, TGT_VOCAB = 50, 60
    DFF = 64
    S, T, N = 8, 10, 2           # src len, tgt len, batch

    key = jax.random.PRNGKey(0)
    kp, ks, kt = jax.random.split(key, 3)

    params = init_params(kp, num_enc=NUM_ENC, num_dec=NUM_DEC, emb_size=EMB,
                         nhead=NHEAD, src_vocab=SRC_VOCAB, tgt_vocab=TGT_VOCAB,
                         dim_feedforward=DFF)

    src = jax.random.randint(ks, (S, N), 0, SRC_VOCAB, dtype=jnp.int32)
    trg = jax.random.randint(kt, (T, N), 0, TGT_VOCAB, dtype=jnp.int32)

    # Masks (same conventions as the PyTorch tutorial's create_mask)
    src_mask = jnp.zeros((S, S), jnp.float32)
    tgt_mask = jnp.where(jnp.triu(jnp.ones((T, T), bool), k=1),
                         NEG_INF, 0.0).astype(jnp.float32)
    src_padding_mask = jnp.zeros((N, S), bool).at[1, S - 2:].set(True)   # True = pad
    tgt_padding_mask = jnp.zeros((N, T), bool).at[1, T - 3:].set(True)
    memory_key_padding_mask = src_padding_mask

    fwd = jax.jit(functools.partial(seq2seq_forward, nhead=NHEAD,
                                    emb_size=EMB, tgt_vocab=TGT_VOCAB))
    logits = fwd(params, src, trg, src_mask, tgt_mask,
                 src_padding_mask, tgt_padding_mask, memory_key_padding_mask)
    jax.block_until_ready(logits)

    assert logits.shape == (T, N, TGT_VOCAB), logits.shape
    assert bool(jnp.all(jnp.isfinite(logits)))
    print("KERNEL_OK")
</pallas_src>

<mosaic_0001>
module attributes {stable_mosaic.version = 11 : i64} {
  func.func @_head_proj_kernel(%arg0: i32, %arg1: i32, %arg2: i32, %arg3: i32, %arg4: memref<1x10x128xf32, #tpu.memory_space<vmem>>, %arg5: memref<1x128x8xbf16, #tpu.memory_space<vmem>>, %arg6: memref<1x1x8xf32, #tpu.memory_space<vmem>>, %arg7: memref<1x1x10x8xbf16, #tpu.memory_space<vmem>>, %arg8: memref<10x8xf32, #tpu.memory_space<vmem>>) attributes {dimension_semantics = [#tpu.dimension_semantics<parallel>, #tpu.dimension_semantics<parallel>, #tpu.dimension_semantics<parallel>, #tpu.dimension_semantics<arbitrary>], iteration_bounds = array<i64: 2, 12, 1, 1>, scalar_prefetch = 0 : i64, scratch_operands = 1 : i64, tpu.core_type = #tpu.core_type<tc>, window_params = [{transform_indices = @transform_0, window_bounds = array<i64: 1, 10, 128>}, {transform_indices = @transform_1, window_bounds = array<i64: 1, 128, 8>}, {transform_indices = @transform_2, window_bounds = array<i64: 1, 1, 8>}, {transform_indices = @transform_3, window_bounds = array<i64: 1, 1, 10, 8>}]} {
    %c0_i32 = arith.constant 0 : i32
    %0 = arith.cmpi eq, %arg3, %c0_i32 : i32
    %1 = arith.extui %0 : i1 to i32
    %c0_i32_0 = arith.constant 0 : i32
    %2 = arith.cmpi ne, %1, %c0_i32_0 : i32
    scf.if %2 {
      %cst_12 = arith.constant 0.000000e+00 : f32
      %15 = vector.broadcast %cst_12 : f32 to vector<10x8xf32>
      %c0_13 = arith.constant 0 : index
      %c0_14 = arith.constant 0 : index
      %16 = vector.load %arg8[%c0_13, %c0_14] : memref<10x8xf32, #tpu.memory_space<vmem>>, vector<10x8xf32>
      tpu.vector_store %arg8[%c0_13, %c0_14], %15 {strides = array<i32>} : memref<10x8xf32, #tpu.memory_space<vmem>>, vector<10x8xf32>,
    } else {
    }
    %c0 = arith.constant 0 : index
    %c0_1 = arith.constant 0 : index
    %3 = vector.load %arg8[%c0, %c0_1] : memref<10x8xf32, #tpu.memory_space<vmem>>, vector<10x8xf32>
    %c0_2 = arith.constant 0 : index
    %c0_3 = arith.constant 0 : index
    %c0_4 = arith.constant 0 : index
    %4 = vector.load %arg4[%c0_2, %c0_3, %c0_4] : memref<1x10x128xf32, #tpu.memory_space<vmem>>, vector<1x10x128xf32>
    %5 = vector.shape_cast %4 : vector<1x10x128xf32> to vector<10x128xf32>
    %6 = arith.truncf %5 : vector<10x128xf32> to vector<10x128xbf16>
    %c0_5 = arith.constant 0 : index
    %c0_6 = arith.constant 0 : index
    %c0_7 = arith.constant 0 : index
    %7 = vector.load %arg5[%c0_5, %c0_6, %c0_7] : memref<1x128x8xbf16, #tpu.memory_space<vmem>>, vector<1x128x8xbf16>
    %8 = vector.shape_cast %7 : vector<1x128x8xbf16> to vector<128x8xbf16>
    %cst = arith.constant dense<0.000000e+00> : vector<10x8xf32>
    %9 = tpu.matmul %6, %8, %cst {dimension_numbers = #tpu.dot_dimension_numbers<[1], [0], [0], [1], [0, 0, 1, 1], [], []>} : vector<10x128xbf16>, vector<128x8xbf16>, vector<10x8xf32> -> vector<10x8xf32>
    %10 = arith.addf %3, %9 : vector<10x8xf32>
    %c0_8 = arith.constant 0 : index
    %c0_9 = arith.constant 0 : index
    %11 = vector.load %arg8[%c0_8, %c0_9] : memref<10x8xf32, #tpu.memory_space<vmem>>, vector<10x8xf32>
    tpu.vector_store %arg8[%c0_8, %c0_9], %10 {strides = array<i32>} : memref<10x8xf32, #tpu.memory_space<vmem>>, vector<10x8xf32>,
    %c0_i32_10 = arith.constant 0 : i32
    %12 = arith.cmpi eq, %arg3, %c0_i32_10 : i32
    %13 = arith.extui %12 : i1 to i32
    %c0_i32_11 = arith.constant 0 : i32
    %14 = arith.cmpi ne, %13, %c0_i32_11 : i32
    scf.if %14 {
      %c0_12 = arith.constant 0 : index
      %c0_13 = arith.constant 0 : index
      %15 = vector.load %arg8[%c0_12, %c0_13] : memref<10x8xf32, #tpu.memory_space<vmem>>, vector<10x8xf32>
      %c0_14 = arith.constant 0 : index
      %c0_15 = arith.constant 0 : index
      %c0_16 = arith.constant 0 : index
      %16 = vector.load %arg6[%c0_14, %c0_15, %c0_16] : memref<1x1x8xf32, #tpu.memory_space<vmem>>, vector<1x1x8xf32>
      %17 = vector.shape_cast %16 : vector<1x1x8xf32> to vector<1x8xf32>
      %18 = vector.broadcast %17 : vector<1x8xf32> to vector<10x8xf32>
      %19 = arith.addf %15, %18 : vector<10x8xf32>
      %20 = arith.truncf %19 : vector<10x8xf32> to vector<10x8xbf16>
      %c0_17 = arith.constant 0 : index
      %c0_18 = arith.constant 0 : index
      %c0_19 = arith.constant 0 : index
      %c0_20 = arith.constant 0 : index
      %21 = vector.load %arg7[%c0_17, %c0_18, %c0_19, %c0_20] : memref<1x1x10x8xbf16, #tpu.memory_space<vmem>>, vector<1x1x10x8xbf16>
      %22 = vector.shape_cast %21 : vector<1x1x10x8xbf16> to vector<10x8xbf16>
      %23 = vector.shape_cast %20 : vector<10x8xbf16> to vector<1x1x10x8xbf16>
      tpu.vector_store %arg7[%c0_17, %c0_18, %c0_19, %c0_20], %23 {strides = array<i32>} : memref<1x1x10x8xbf16, #tpu.memory_space<vmem>>, vector<1x1x10x8xbf16>,
    } else {
    }
    return
  }
  func.func @transform_0(%arg0: i32, %arg1: i32, %arg2: i32, %arg3: i32) -> (i32, i32, i32) {
    %c0_i32 = arith.constant 0 : i32
    return %arg0, %arg2, %arg3 : i32, i32, i32
  }
  func.func @transform_1(%arg0: i32, %arg1: i32, %arg2: i32, %arg3: i32) -> (i32, i32, i32) {
    %c0_i32 = arith.constant 0 : i32
    %c0_i32_0 = arith.constant 0 : i32
    return %arg1, %arg3, %c0_i32 : i32, i32, i32
  }
  func.func @transform_2(%arg0: i32, %arg1: i32, %arg2: i32, %arg3: i32) -> (i32, i32, i32) {
    %c0_i32 = arith.constant 0 : i32
    %c0_i32_0 = arith.constant 0 : i32
    %c0_i32_1 = arith.constant 0 : i32
    return %arg1, %c0_i32, %c0_i32_0 : i32, i32, i32
  }
  func.func @transform_3(%arg0: i32, %arg1: i32, %arg2: i32, %arg3: i32) -> (i32, i32, i32, i32) {
    %c0_i32 = arith.constant 0 : i32
    %c0_i32_0 = arith.constant 0 : i32
    return %arg0, %arg1, %arg2, %c0_i32 : i32, i32, i32, i32
  }
}

module attributes {stable_mosaic.version = 11 : i64} {
  func.func @_flash_kernel(%arg0: i32, %arg1: i32, %arg2: i32, %arg3: i32, %arg4: memref<1x1x10x8xbf16, #tpu.memory_space<vmem>>, %arg5: memref<1x1x10x8xbf16, #tpu.memory_space<vmem>>, %arg6: memref<1x1x10x8xbf16, #tpu.memory_space<vmem>>, %arg7: memref<10x10xf32, #tpu.memory_space<vmem>>, %arg8: memref<1x1x10xf32, #tpu.memory_space<vmem>>, %arg9: memref<1x1x10x8xbf16, #tpu.memory_space<vmem>>, %arg10: memref<10x1xf32, #tpu.memory_space<vmem>>, %arg11: memref<10x1xf32, #tpu.memory_space<vmem>>, %arg12: memref<10x8xf32, #tpu.memory_space<vmem>>) attributes {dimension_semantics = [#tpu.dimension_semantics<parallel>, #tpu.dimension_semantics<parallel>, #tpu.dimension_semantics<parallel>, #tpu.dimension_semantics<arbitrary>], iteration_bounds = array<i64: 2, 4, 1, 1>, scalar_prefetch = 0 : i64, scratch_operands = 3 : i64, tpu.core_type = #tpu.core_type<tc>, window_params = [{transform_indices = @transform_0, window_bounds = array<i64: 1, 1, 10, 8>}, {transform_indices = @transform_1, window_bounds = array<i64: 1, 1, 10, 8>}, {transform_indices = @transform_2, window_bounds = array<i64: 1, 1, 10, 8>}, {transform_indices = @transform_3, window_bounds = array<i64: 10, 10>}, {transform_indices = @transform_4, window_bounds = array<i64: 1, 1, 10>}, {transform_indices = @transform_5, window_bounds = array<i64: 1, 1, 10, 8>}]} {
    %c0_i32 = arith.constant 0 : i32
    %0 = arith.cmpi eq, %arg3, %c0_i32 : i32
    %1 = arith.extui %0 : i1 to i32
    %c0_i32_0 = arith.constant 0 : i32
    %2 = arith.cmpi ne, %1, %c0_i32_0 : i32
    scf.if %2 {
      %cst_35 = arith.constant -1.000000e+30 : f32
      %44 = vector.broadcast %cst_35 : f32 to vector<10x1xf32>
      %c0_36 = arith.constant 0 : index
      %c0_37 = arith.constant 0 : index
      %45 = vector.load %arg10[%c0_36, %c0_37] : memref<10x1xf32, #tpu.memory_space<vmem>>, vector<10x1xf32>
      tpu.vector_store %arg10[%c0_36, %c0_37], %44 {strides = array<i32>} : memref<10x1xf32, #tpu.memory_space<vmem>>, vector<10x1xf32>,
      %cst_38 = arith.constant 0.000000e+00 : f32
      %46 = vector.broadcast %cst_38 : f32 to vector<10x1xf32>
      %c0_39 = arith.constant 0 : index
      %c0_40 = arith.constant 0 : index
      %47 = vector.load %arg11[%c0_39, %c0_40] : memref<10x1xf32, #tpu.memory_space<vmem>>, vector<10x1xf32>
      tpu.vector_store %arg11[%c0_39, %c0_40], %46 {strides = array<i32>} : memref<10x1xf32, #tpu.memory_space<vmem>>, vector<10x1xf32>,
      %cst_41 = arith.constant 0.000000e+00 : f32
      %48 = vector.broadcast %cst_41 : f32 to vector<10x8xf32>
      %c0_42 = arith.constant 0 : index
      %c0_43 = arith.constant 0 : index
      %49 = vector.load %arg12[%c0_42, %c0_43] : memref<10x8xf32, #tpu.memory_space<vmem>>, vector<10x8xf32>
      tpu.vector_store %arg12[%c0_42, %c0_43], %48 {strides = array<i32>} : memref<10x8xf32, #tpu.memory_space<vmem>>, vector<10x8xf32>,
    } else {
    }
    %c0 = arith.constant 0 : index
    %c0_1 = arith.constant 0 : index
    %c0_2 = arith.constant 0 : index
    %c0_3 = arith.constant 0 : index
    %3 = vector.load %arg4[%c0, %c0_1, %c0_2, %c0_3] : memref<1x1x10x8xbf16, #tpu.memory_space<vmem>>, vector<1x1x10x8xbf16>
    %4 = vector.shape_cast %3 : vector<1x1x10x8xbf16> to vector<10x8xbf16>
    %c0_4 = arith.constant 0 : index
    %c0_5 = arith.constant 0 : index
    %c0_6 = arith.constant 0 : index
    %c0_7 = arith.constant 0 : index
    %5 = vector.load %arg5[%c0_4, %c0_5, %c0_6, %c0_7] : memref<1x1x10x8xbf16, #tpu.memory_space<vmem>>, vector<1x1x10x8xbf16>
    %6 = vector.shape_cast %5 : vector<1x1x10x8xbf16> to vector<10x8xbf16>
    %c0_8 = arith.constant 0 : index
    %c0_9 = arith.constant 0 : index
    %c0_10 = arith.constant 0 : index
    %c0_11 = arith.constant 0 : index
    %7 = vector.load %arg6[%c0_8, %c0_9, %c0_10, %c0_11] : memref<1x1x10x8xbf16, #tpu.memory_space<vmem>>, vector<1x1x10x8xbf16>
    %8 = vector.shape_cast %7 : vector<1x1x10x8xbf16> to vector<10x8xbf16>
    "tpu.trace_start"() <{level = 10 : i32, message = "qd,kd->qk"}> : () -> ()
    %cst = arith.constant dense<0.000000e+00> : vector<10x10xf32>
    %9 = tpu.matmul %4, %6, %cst {dimension_numbers = #tpu.dot_dimension_numbers<[1], [1], [0], [0], [0, 0, 1, 0], [], []>} : vector<10x8xbf16>, vector<10x8xbf16>, vector<10x10xf32> -> vector<10x10xf32>
    "tpu.trace_stop"() : () -> ()
    %cst_12 = arith.constant 0.353553385 : f32
    %10 = vector.broadcast %cst_12 : f32 to vector<10x10xf32>
    %11 = arith.mulf %9, %10 : vector<10x10xf32>
    %c0_13 = arith.constant 0 : index
    %c0_14 = arith.constant 0 : index
    %12 = vector.load %arg7[%c0_13, %c0_14] : memref<10x10xf32, #tpu.memory_space<vmem>>, vector<10x10xf32>
    %13 = arith.addf %11, %12 : vector<10x10xf32>
    %c0_15 = arith.constant 0 : index
    %c0_16 = arith.constant 0 : index
    %c0_17 = arith.constant 0 : index
    %14 = vector.load %arg8[%c0_15, %c0_16, %c0_17] : memref<1x1x10xf32, #tpu.memory_space<vmem>>, vector<1x1x10xf32>
    %15 = vector.shape_cast %14 : vector<1x1x10xf32> to vector<1x10xf32>
    %16 = vector.broadcast %15 : vector<1x10xf32> to vector<10x10xf32>
    %17 = arith.addf %13, %16 : vector<10x10xf32>
    %c0_18 = arith.constant 0 : index
    %c0_19 = arith.constant 0 : index
    %18 = vector.load %arg10[%c0_18, %c0_19] : memref<10x1xf32, #tpu.memory_space<vmem>>, vector<10x1xf32>
    %cst_20 = arith.constant dense<0xFF800000> : vector<10xf32>
    %19 = vector.multi_reduction <maximumf>, %17, %cst_20 [1] : vector<10x10xf32> to vector<10xf32>
    %20 = vector.shape_cast %19 : vector<10xf32> to vector<10x1xf32>
    %21 = arith.maximumf %18, %20 : vector<10x1xf32>
    %22 = arith.subf %18, %21 : vector<10x1xf32>
    %23 = math.exp %22 : vector<10x1xf32>
    %24 = vector.broadcast %21 : vector<10x1xf32> to vector<10x10xf32>
    %25 = arith.subf %17, %24 : vector<10x10xf32>
    %26 = math.exp %25 : vector<10x10xf32>
    %c0_21 = arith.constant 0 : index
    %c0_22 = arith.constant 0 : index
    %27 = vector.load %arg11[%c0_21, %c0_22] : memref<10x1xf32, #tpu.memory_space<vmem>>, vector<10x1xf32>
    %28 = arith.mulf %23, %27 : vector<10x1xf32>
    %cst_23 = arith.constant dense<0.000000e+00> : vector<10xf32>
    %29 = vector.multi_reduction <add>, %26, %cst_23 [1] : vector<10x10xf32> to vector<10xf32>
    %30 = vector.shape_cast %29 : vector<10xf32> to vector<10x1xf32>
    %31 = arith.addf %28, %30 : vector<10x1xf32>
    %c0_24 = arith.constant 0 : index
    %c0_25 = arith.constant 0 : index
    %32 = vector.load %arg11[%c0_24, %c0_25] : memref<10x1xf32, #tpu.memory_space<vmem>>, vector<10x1xf32>
    tpu.vector_store %arg11[%c0_24, %c0_25], %31 {strides = array<i32>} : memref<10x1xf32, #tpu.memory_space<vmem>>, vector<10x1xf32>,
    %c0_26 = arith.constant 0 : index
    %c0_27 = arith.constant 0 : index
    %33 = vector.load %arg12[%c0_26, %c0_27] : memref<10x8xf32, #tpu.memory_space<vmem>>, vector<10x8xf32>
    %34 = vector.broadcast %23 : vector<10x1xf32> to vector<10x8xf32>
    %35 = arith.mulf %34, %33 : vector<10x8xf32>
    %36 = arith.truncf %26 : vector<10x10xf32> to vector<10x10xbf16>
    %cst_28 = arith.constant dense<0.000000e+00> : vector<10x8xf32>
    %37 = tpu.matmul %36, %8, %cst_28 {dimension_numbers = #tpu.dot_dimension_numbers<[1], [0], [0], [1], [0, 0, 1, 1], [], []>} : vector<10x10xbf16>, vector<10x8xbf16>, vector<10x8xf32> -> vector<10x8xf32>
    %38 = arith.addf %35, %37 : vector<10x8xf32>
    %c0_29 = arith.constant 0 : index
    %c0_30 = arith.constant 0 : index
    %39 = vector.load %arg12[%c0_29, %c0_30] : memref<10x8xf32, #tpu.memory_space<vmem>>, vector<10x8xf32>
    tpu.vector_store %arg12[%c0_29, %c0_30], %38 {strides = array<i32>} : memref<10x8xf32, #tpu.memory_space<vmem>>, vector<10x8xf32>,
    %c0_31 = arith.constant 0 : index
    %c0_32 = arith.constant 0 : index
    %40 = vector.load %arg10[%c0_31, %c0_32] : memref<10x1xf32, #tpu.memory_space<vmem>>, vector<10x1xf32>
    tpu.vector_store %arg10[%c0_31, %c0_32], %21 {strides = array<i32>} : memref<10x1xf32, #tpu.memory_space<vmem>>, vector<10x1xf32>,
    %c0_i32_33 = arith.constant 0 : i32
    %41 = arith.cmpi eq, %arg3, %c0_i32_33 : i32
    %42 = arith.extui %41 : i1 to i32
    %c0_i32_34 = arith.constant 0 : i32
    %43 = arith.cmpi ne, %42, %c0_i32_34 : i32
    scf.if %43 {
      %c0_35 = arith.constant 0 : index
      %c0_36 = arith.constant 0 : index
      %44 = vector.load %arg12[%c0_35, %c0_36] : memref<10x8xf32, #tpu.memory_space<vmem>>, vector<10x8xf32>
      %c0_37 = arith.constant 0 : index
      %c0_38 = arith.constant 0 : index
      %45 = vector.load %arg11[%c0_37, %c0_38] : memref<10x1xf32, #tpu.memory_space<vmem>>, vector<10x1xf32>
      %46 = tpu.reciprocal %45 {approx = true} : vector<10x1xf32> -> vector<10x1xf32>
      %47 = vector.broadcast %46 : vector<10x1xf32> to vector<10x8xf32>
      %48 = arith.mulf %44, %47 : vector<10x8xf32>
      %49 = arith.truncf %48 : vector<10x8xf32> to vector<10x8xbf16>
      %c0_39 = arith.constant 0 : index
      %c0_40 = arith.constant 0 : index
      %c0_41 = arith.constant 0 : index
      %c0_42 = arith.constant 0 : index
      %50 = vector.load %arg9[%c0_39, %c0_40, %c0_41, %c0_42] : memref<1x1x10x8xbf16, #tpu.memory_space<vmem>>, vector<1x1x10x8xbf16>
      %51 = vector.shape_cast %50 : vector<1x1x10x8xbf16> to vector<10x8xbf16>
      %52 = vector.shape_cast %49 : vector<10x8xbf16> to vector<1x1x10x8xbf16>
      tpu.vector_store %arg9[%c0_39, %c0_40, %c0_41, %c0_42], %52 {strides = array<i32>} : memref<1x1x10x8xbf16, #tpu.memory_space<vmem>>, vector<1x1x10x8xbf16>,
    } else {
    }
    return
  }
  func.func @transform_0(%arg0: i32, %arg1: i32, %arg2: i32, %arg3: i32) -> (i32, i32, i32, i32) {
    %c0_i32 = arith.constant 0 : i32
    %0 = arith.addi %arg1, %c0_i32 : i32
    %c0_i32_0 = arith.constant 0 : i32
    %c0_i32_1 = arith.constant 0 : i32
    return %arg0, %0, %arg2, %c0_i32_0 : i32, i32, i32, i32
  }
  func.func @transform_1(%arg0: i32, %arg1: i32, %arg2: i32, %arg3: i32) -> (i32, i32, i32, i32) {
    %c4_i32 = arith.constant 4 : i32
    %0 = arith.addi %arg1, %c4_i32 : i32
    %c0_i32 = arith.constant 0 : i32
    %c0_i32_0 = arith.constant 0 : i32
    return %arg0, %0, %arg3, %c0_i32 : i32, i32, i32, i32
  }
  func.func @transform_2(%arg0: i32, %arg1: i32, %arg2: i32, %arg3: i32) -> (i32, i32, i32, i32) {
    %c8_i32 = arith.constant 8 : i32
    %0 = arith.addi %arg1, %c8_i32 : i32
    %c0_i32 = arith.constant 0 : i32
    %c0_i32_0 = arith.constant 0 : i32
    return %arg0, %0, %arg3, %c0_i32 : i32, i32, i32, i32
  }
  func.func @transform_3(%arg0: i32, %arg1: i32, %arg2: i32, %arg3: i32) -> (i32, i32) {
    %c0_i32 = arith.constant 0 : i32
    return %arg2, %arg3 : i32, i32
  }
  func.func @transform_4(%arg0: i32, %arg1: i32, %arg2: i32, %arg3: i32) -> (i32, i32, i32) {
    %c0_i32 = arith.constant 0 : i32
    %c0_i32_0 = arith.constant 0 : i32
    return %arg0, %c0_i32, %arg3 : i32, i32, i32
  }
  func.func @transform_5(%arg0: i32, %arg1: i32, %arg2: i32, %arg3: i32) -> (i32, i32, i32, i32) {
    %c0_i32 = arith.constant 0 : i32
    %c0_i32_0 = arith.constant 0 : i32
    return %arg0, %arg1, %arg2, %c0_i32 : i32, i32, i32, i32
  }
}

module attributes {stable_mosaic.version = 11 : i64} {
  func.func @_out_proj_kernel(%arg0: i32, %arg1: i32, %arg2: i32, %arg3: i32, %arg4: memref<1x1x10x8xbf16, #tpu.memory_space<vmem>>, %arg5: memref<1x8x128xbf16, #tpu.memory_space<vmem>>, %arg6: memref<1x128xf32, #tpu.memory_space<vmem>>, %arg7: memref<1x10x128xf32, #tpu.memory_space<vmem>>, %arg8: memref<1x10x128xf32, #tpu.memory_space<vmem>>, %arg9: memref<10x128xf32, #tpu.memory_space<vmem>>) attributes {dimension_semantics = [#tpu.dimension_semantics<parallel>, #tpu.dimension_semantics<parallel>, #tpu.dimension_semantics<parallel>, #tpu.dimension_semantics<arbitrary>], iteration_bounds = array<i64: 2, 1, 1, 4>, scalar_prefetch = 0 : i64, scratch_operands = 1 : i64, tpu.core_type = #tpu.core_type<tc>, window_params = [{transform_indices = @transform_0, window_bounds = array<i64: 1, 1, 10, 8>}, {transform_indices = @transform_1, window_bounds = array<i64: 1, 8, 128>}, {transform_indices = @transform_2, window_bounds = array<i64: 1, 128>}, {transform_indices = @transform_3, window_bounds = array<i64: 1, 10, 128>}, {transform_indices = @transform_4, window_bounds = array<i64: 1, 10, 128>}]} {
    %c0_i32 = arith.constant 0 : i32
    %0 = arith.cmpi eq, %arg3, %c0_i32 : i32
    %1 = arith.extui %0 : i1 to i32
    %c0_i32_0 = arith.constant 0 : i32
    %2 = arith.cmpi ne, %1, %c0_i32_0 : i32
    scf.if %2 {
      %cst_12 = arith.constant 0.000000e+00 : f32
      %14 = vector.broadcast %cst_12 : f32 to vector<10x128xf32>
      %c0_13 = arith.constant 0 : index
      %c0_14 = arith.constant 0 : index
      %15 = vector.load %arg9[%c0_13, %c0_14] : memref<10x128xf32, #tpu.memory_space<vmem>>, vector<10x128xf32>
      tpu.vector_store %arg9[%c0_13, %c0_14], %14 {strides = array<i32>} : memref<10x128xf32, #tpu.memory_space<vmem>>, vector<10x128xf32>,
    } else {
    }
    %c0 = arith.constant 0 : index
    %c0_1 = arith.constant 0 : index
    %3 = vector.load %arg9[%c0, %c0_1] : memref<10x128xf32, #tpu.memory_space<vmem>>, vector<10x128xf32>
    %c0_2 = arith.constant 0 : index
    %c0_3 = arith.constant 0 : index
    %c0_4 = arith.constant 0 : index
    %c0_5 = arith.constant 0 : index
    %4 = vector.load %arg4[%c0_2, %c0_3, %c0_4, %c0_5] : memref<1x1x10x8xbf16, #tpu.memory_space<vmem>>, vector<1x1x10x8xbf16>
    %5 = vector.shape_cast %4 : vector<1x1x10x8xbf16> to vector<10x8xbf16>
    %c0_6 = arith.constant 0 : index
    %c0_7 = arith.constant 0 : index
    %c0_8 = arith.constant 0 : index
    %6 = vector.load %arg5[%c0_6, %c0_7, %c0_8] : memref<1x8x128xbf16, #tpu.memory_space<vmem>>, vector<1x8x128xbf16>
    %7 = vector.shape_cast %6 : vector<1x8x128xbf16> to vector<8x128xbf16>
    %cst = arith.constant dense<0.000000e+00> : vector<10x128xf32>
    %8 = tpu.matmul %5, %7, %cst {dimension_numbers = #tpu.dot_dimension_numbers<[1], [0], [0], [1], [0, 0, 1, 1], [], []>} : vector<10x8xbf16>, vector<8x128xbf16>, vector<10x128xf32> -> vector<10x128xf32>
    %9 = arith.addf %3, %8 : vector<10x128xf32>
    %c0_9 = arith.constant 0 : index
    %c0_10 = arith.constant 0 : index
    %10 = vector.load %arg9[%c0_9, %c0_10] : memref<10x128xf32, #tpu.memory_space<vmem>>, vector<10x128xf32>
    tpu.vector_store %arg9[%c0_9, %c0_10], %9 {strides = array<i32>} : memref<10x128xf32, #tpu.memory_space<vmem>>, vector<10x128xf32>,
    %c3_i32 = arith.constant 3 : i32
    %11 = arith.cmpi eq, %arg3, %c3_i32 : i32
    %12 = arith.extui %11 : i1 to i32
    %c0_i32_11 = arith.constant 0 : i32
    %13 = arith.cmpi ne, %12, %c0_i32_11 : i32
    scf.if %13 {
      %c0_12 = arith.constant 0 : index
      %c0_13 = arith.constant 0 : index
      %14 = vector.load %arg9[%c0_12, %c0_13] : memref<10x128xf32, #tpu.memory_space<vmem>>, vector<10x128xf32>
      %c0_14 = arith.constant 0 : index
      %c0_15 = arith.constant 0 : index
      %15 = vector.load %arg6[%c0_14, %c0_15] : memref<1x128xf32, #tpu.memory_space<vmem>>, vector<1x128xf32>
      %16 = vector.broadcast %15 : vector<1x128xf32> to vector<10x128xf32>
      %17 = arith.addf %14, %16 : vector<10x128xf32>
      %c0_16 = arith.constant 0 : index
      %c0_17 = arith.constant 0 : index
      %c0_18 = arith.constant 0 : index
      %18 = vector.load %arg7[%c0_16, %c0_17, %c0_18] : memref<1x10x128xf32, #tpu.memory_space<vmem>>, vector<1x10x128xf32>
      %19 = vector.shape_cast %18 : vector<1x10x128xf32> to vector<10x128xf32>
      %20 = arith.addf %17, %19 : vector<10x128xf32>
      %c0_19 = arith.constant 0 : index
      %c0_20 = arith.constant 0 : index
      %c0_21 = arith.constant 0 : index
      %21 = vector.load %arg8[%c0_19, %c0_20, %c0_21] : memref<1x10x128xf32, #tpu.memory_space<vmem>>, vector<1x10x128xf32>
      %22 = vector.shape_cast %21 : vector<1x10x128xf32> to vector<10x128xf32>
      %23 = vector.shape_cast %20 : vector<10x128xf32> to vector<1x10x128xf32>
      tpu.vector_store %arg8[%c0_19, %c0_20, %c0_21], %23 {strides = array<i32>} : memref<1x10x128xf32, #tpu.memory_space<vmem>>, vector<1x10x128xf32>,
    } else {
    }
    return
  }
  func.func @transform_0(%arg0: i32, %arg1: i32, %arg2: i32, %arg3: i32) -> (i32, i32, i32, i32) {
    %c0_i32 = arith.constant 0 : i32
    %c0_i32_0 = arith.constant 0 : i32
    return %arg0, %arg3, %arg1, %c0_i32 : i32, i32, i32, i32
  }
  func.func @transform_1(%arg0: i32, %arg1: i32, %arg2: i32, %arg3: i32) -> (i32, i32, i32) {
    %c0_i32 = arith.constant 0 : i32
    %c0_i32_0 = arith.constant 0 : i32
    return %arg3, %c0_i32, %arg2 : i32, i32, i32
  }
  func.func @transform_2(%arg0: i32, %arg1: i32, %arg2: i32, %arg3: i32) -> (i32, i32) {
    %c0_i32 = arith.constant 0 : i32
    %c0_i32_0 = arith.constant 0 : i32
    return %c0_i32, %arg2 : i32, i32
  }
  func.func @transform_3(%arg0: i32, %arg1: i32, %arg2: i32, %arg3: i32) -> (i32, i32, i32) {
    %c0_i32 = arith.constant 0 : i32
    return %arg0, %arg1, %arg2 : i32, i32, i32
  }
  func.func @transform_4(%arg0: i32, %arg1: i32, %arg2: i32, %arg3: i32) -> (i32, i32, i32) {
    %c0_i32 = arith.constant 0 : i32
    return %arg0, %arg1, %arg2 : i32, i32, i32
  }
}

module attributes {stable_mosaic.version = 11 : i64} {
  func.func @_ln_kernel(%arg0: i32, %arg1: memref<20x128xf32, #tpu.memory_space<vmem>>, %arg2: memref<1x128xf32, #tpu.memory_space<vmem>>, %arg3: memref<1x128xf32, #tpu.memory_space<vmem>>, %arg4: memref<20x128xf32, #tpu.memory_space<vmem>>) attributes {dimension_semantics = [#tpu.dimension_semantics<parallel>], iteration_bounds = array<i64: 1>, scalar_prefetch = 0 : i64, scratch_operands = 0 : i64, tpu.core_type = #tpu.core_type<tc>, window_params = [{transform_indices = @transform_0, window_bounds = array<i64: 20, 128>}, {pipeline_mode = #tpu.pipeline_mode<synchronous>, transform_indices = @transform_1, window_bounds = array<i64: 1, 128>}, {pipeline_mode = #tpu.pipeline_mode<synchronous>, transform_indices = @transform_2, window_bounds = array<i64: 1, 128>}, {transform_indices = @transform_3, window_bounds = array<i64: 20, 128>}]} {
    %c0 = arith.constant 0 : index
    %c0_0 = arith.constant 0 : index
    %0 = vector.load %arg1[%c0, %c0_0] : memref<20x128xf32, #tpu.memory_space<vmem>>, vector<20x128xf32>
    %cst = arith.constant dense<0.000000e+00> : vector<20xf32>
    %1 = vector.multi_reduction <add>, %0, %cst [1] : vector<20x128xf32> to vector<20xf32>
    %2 = vector.shape_cast %1 : vector<20xf32> to vector<20x1xf32>
    %cst_1 = arith.constant 3.125000e-02 : f32
    %3 = vector.broadcast %cst_1 : f32 to vector<20x1xf32>
    %4 = arith.mulf %2, %3 : vector<20x1xf32>
    %5 = arith.mulf %0, %0 : vector<20x128xf32>
    %cst_2 = arith.constant dense<0.000000e+00> : vector<20xf32>
    %6 = vector.multi_reduction <add>, %5, %cst_2 [1] : vector<20x128xf32> to vector<20xf32>
    %7 = vector.shape_cast %6 : vector<20xf32> to vector<20x1xf32>
    %cst_3 = arith.constant 3.125000e-02 : f32
    %8 = vector.broadcast %cst_3 : f32 to vector<20x1xf32>
    %9 = arith.mulf %7, %8 : vector<20x1xf32>
    %10 = arith.mulf %4, %4 : vector<20x1xf32>
    %11 = arith.subf %9, %10 : vector<20x1xf32>
    %cst_4 = arith.constant 9.99999974E-6 : f32
    %12 = vector.broadcast %cst_4 : f32 to vector<20x1xf32>
    %13 = arith.addf %11, %12 : vector<20x1xf32>
    %14 = math.rsqrt %13 : vector<20x1xf32>
    %15 = vector.broadcast %4 : vector<20x1xf32> to vector<20x128xf32>
    %16 = arith.subf %0, %15 : vector<20x128xf32>
    %17 = vector.broadcast %14 : vector<20x1xf32> to vector<20x128xf32>
    %18 = arith.mulf %16, %17 : vector<20x128xf32>
    %c0_5 = arith.constant 0 : index
    %c0_6 = arith.constant 0 : index
    %19 = vector.load %arg2[%c0_5, %c0_6] : memref<1x128xf32, #tpu.memory_space<vmem>>, vector<1x128xf32>
    %20 = vector.broadcast %19 : vector<1x128xf32> to vector<20x128xf32>
    %21 = arith.mulf %18, %20 : vector<20x128xf32>
    %c0_7 = arith.constant 0 : index
    %c0_8 = arith.constant 0 : index
    %22 = vector.load %arg3[%c0_7, %c0_8] : memref<1x128xf32, #tpu.memory_space<vmem>>, vector<1x128xf32>
    %23 = vector.broadcast %22 : vector<1x128xf32> to vector<20x128xf32>
    %24 = arith.addf %21, %23 : vector<20x128xf32>
    %c0_9 = arith.constant 0 : index
    %c0_10 = arith.constant 0 : index
    %25 = vector.load %arg4[%c0_9, %c0_10] : memref<20x128xf32, #tpu.memory_space<vmem>>, vector<20x128xf32>
    tpu.vector_store %arg4[%c0_9, %c0_10], %24 {strides = array<i32>} : memref<20x128xf32, #tpu.memory_space<vmem>>, vector<20x128xf32>,
    return
  }
  func.func @transform_0(%arg0: i32) -> (i32, i32) {
    %c0_i32 = arith.constant 0 : i32
    %c0_i32_0 = arith.constant 0 : i32
    return %arg0, %c0_i32 : i32, i32
  }
  func.func @transform_1(%arg0: i32) -> (i32, i32) {
    %c0_i32 = arith.constant 0 : i32
    %c0_i32_0 = arith.constant 0 : i32
    %c0_i32_1 = arith.constant 0 : i32
    return %c0_i32, %c0_i32_0 : i32, i32
  }
  func.func @transform_2(%arg0: i32) -> (i32, i32) {
    %c0_i32 = arith.constant 0 : i32
    %c0_i32_0 = arith.constant 0 : i32
    %c0_i32_1 = arith.constant 0 : i32
    return %c0_i32, %c0_i32_0 : i32, i32
  }
  func.func @transform_3(%arg0: i32) -> (i32, i32) {
    %c0_i32 = arith.constant 0 : i32
    %c0_i32_0 = arith.constant 0 : i32
    return %arg0, %c0_i32 : i32, i32
  }
}

module attributes {stable_mosaic.version = 11 : i64} {
  func.func @_head_proj_kernel(%arg0: i32, %arg1: i32, %arg2: i32, %arg3: i32, %arg4: memref<1x10x128xf32, #tpu.memory_space<vmem>>, %arg5: memref<1x128x8xbf16, #tpu.memory_space<vmem>>, %arg6: memref<1x1x8xf32, #tpu.memory_space<vmem>>, %arg7: memref<1x1x10x8xbf16, #tpu.memory_space<vmem>>, %arg8: memref<10x8xf32, #tpu.memory_space<vmem>>) attributes {dimension_semantics = [#tpu.dimension_semantics<parallel>, #tpu.dimension_semantics<parallel>, #tpu.dimension_semantics<parallel>, #tpu.dimension_semantics<arbitrary>], iteration_bounds = array<i64: 2, 4, 1, 1>, scalar_prefetch = 0 : i64, scratch_operands = 1 : i64, tpu.core_type = #tpu.core_type<tc>, window_params = [{transform_indices = @transform_0, window_bounds = array<i64: 1, 10, 128>}, {transform_indices = @transform_1, window_bounds = array<i64: 1, 128, 8>}, {transform_indices = @transform_2, window_bounds = array<i64: 1, 1, 8>}, {transform_indices = @transform_3, window_bounds = array<i64: 1, 1, 10, 8>}]} {
    %c0_i32 = arith.constant 0 : i32
    %0 = arith.cmpi eq, %arg3, %c0_i32 : i32
    %1 = arith.extui %0 : i1 to i32
    %c0_i32_0 = arith.constant 0 : i32
    %2 = arith.cmpi ne, %1, %c0_i32_0 : i32
    scf.if %2 {
      %cst_12 = arith.constant 0.000000e+00 : f32
      %15 = vector.broadcast %cst_12 : f32 to vector<10x8xf32>
      %c0_13 = arith.constant 0 : index
      %c0_14 = arith.constant 0 : index
      %16 = vector.load %arg8[%c0_13, %c0_14] : memref<10x8xf32, #tpu.memory_space<vmem>>, vector<10x8xf32>
      tpu.vector_store %arg8[%c0_13, %c0_14], %15 {strides = array<i32>} : memref<10x8xf32, #tpu.memory_space<vmem>>, vector<10x8xf32>,
    } else {
    }
    %c0 = arith.constant 0 : index
    %c0_1 = arith.constant 0 : index
    %3 = vector.load %arg8[%c0, %c0_1] : memref<10x8xf32, #tpu.memory_space<vmem>>, vector<10x8xf32>
    %c0_2 = arith.constant 0 : index
    %c0_3 = arith.constant 0 : index
    %c0_4 = arith.constant 0 : index
    %4 = vector.load %arg4[%c0_2, %c0_3, %c0_4] : memref<1x10x128xf32, #tpu.memory_space<vmem>>, vector<1x10x128xf32>
    %5 = vector.shape_cast %4 : vector<1x10x128xf32> to vector<10x128xf32>
    %6 = arith.truncf %5 : vector<10x128xf32> to vector<10x128xbf16>
    %c0_5 = arith.constant 0 : index
    %c0_6 = arith.constant 0 : index
    %c0_7 = arith.constant 0 : index
    %7 = vector.load %arg5[%c0_5, %c0_6, %c0_7] : memref<1x128x8xbf16, #tpu.memory_space<vmem>>, vector<1x128x8xbf16>
    %8 = vector.shape_cast %7 : vector<1x128x8xbf16> to vector<128x8xbf16>
    %cst = arith.constant dense<0.000000e+00> : vector<10x8xf32>
    %9 = tpu.matmul %6, %8, %cst {dimension_numbers = #tpu.dot_dimension_numbers<[1], [0], [0], [1], [0, 0, 1, 1], [], []>} : vector<10x128xbf16>, vector<128x8xbf16>, vector<10x8xf32> -> vector<10x8xf32>
    %10 = arith.addf %3, %9 : vector<10x8xf32>
    %c0_8 = arith.constant 0 : index
    %c0_9 = arith.constant 0 : index
    %11 = vector.load %arg8[%c0_8, %c0_9] : memref<10x8xf32, #tpu.memory_space<vmem>>, vector<10x8xf32>
    tpu.vector_store %arg8[%c0_8, %c0_9], %10 {strides = array<i32>} : memref<10x8xf32, #tpu.memory_space<vmem>>, vector<10x8xf32>,
    %c0_i32_10 = arith.constant 0 : i32
    %12 = arith.cmpi eq, %arg3, %c0_i32_10 : i32
    %13 = arith.extui %12 : i1 to i32
    %c0_i32_11 = arith.constant 0 : i32
    %14 = arith.cmpi ne, %13, %c0_i32_11 : i32
    scf.if %14 {
      %c0_12 = arith.constant 0 : index
      %c0_13 = arith.constant 0 : index
      %15 = vector.load %arg8[%c0_12, %c0_13] : memref<10x8xf32, #tpu.memory_space<vmem>>, vector<10x8xf32>
      %c0_14 = arith.constant 0 : index
      %c0_15 = arith.constant 0 : index
      %c0_16 = arith.constant 0 : index
      %16 = vector.load %arg6[%c0_14, %c0_15, %c0_16] : memref<1x1x8xf32, #tpu.memory_space<vmem>>, vector<1x1x8xf32>
      %17 = vector.shape_cast %16 : vector<1x1x8xf32> to vector<1x8xf32>
      %18 = vector.broadcast %17 : vector<1x8xf32> to vector<10x8xf32>
      %19 = arith.addf %15, %18 : vector<10x8xf32>
      %20 = arith.truncf %19 : vector<10x8xf32> to vector<10x8xbf16>
      %c0_17 = arith.constant 0 : index
      %c0_18 = arith.constant 0 : index
      %c0_19 = arith.constant 0 : index
      %c0_20 = arith.constant 0 : index
      %21 = vector.load %arg7[%c0_17, %c0_18, %c0_19, %c0_20] : memref<1x1x10x8xbf16, #tpu.memory_space<vmem>>, vector<1x1x10x8xbf16>
      %22 = vector.shape_cast %21 : vector<1x1x10x8xbf16> to vector<10x8xbf16>
      %23 = vector.shape_cast %20 : vector<10x8xbf16> to vector<1x1x10x8xbf16>
      tpu.vector_store %arg7[%c0_17, %c0_18, %c0_19, %c0_20], %23 {strides = array<i32>} : memref<1x1x10x8xbf16, #tpu.memory_space<vmem>>, vector<1x1x10x8xbf16>,
    } else {
    }
    return
  }
  func.func @transform_0(%arg0: i32, %arg1: i32, %arg2: i32, %arg3: i32) -> (i32, i32, i32) {
    %c0_i32 = arith.constant 0 : i32
    return %arg0, %arg2, %arg3 : i32, i32, i32
  }
  func.func @transform_1(%arg0: i32, %arg1: i32, %arg2: i32, %arg3: i32) -> (i32, i32, i32) {
    %c0_i32 = arith.constant 0 : i32
    %c0_i32_0 = arith.constant 0 : i32
    return %arg1, %arg3, %c0_i32 : i32, i32, i32
  }
  func.func @transform_2(%arg0: i32, %arg1: i32, %arg2: i32, %arg3: i32) -> (i32, i32, i32) {
    %c0_i32 = arith.constant 0 : i32
    %c0_i32_0 = arith.constant 0 : i32
    %c0_i32_1 = arith.constant 0 : i32
    return %arg1, %c0_i32, %c0_i32_0 : i32, i32, i32
  }
  func.func @transform_3(%arg0: i32, %arg1: i32, %arg2: i32, %arg3: i32) -> (i32, i32, i32, i32) {
    %c0_i32 = arith.constant 0 : i32
    %c0_i32_0 = arith.constant 0 : i32
    return %arg0, %arg1, %arg2, %c0_i32 : i32, i32, i32, i32
  }
}

module attributes {stable_mosaic.version = 11 : i64} {
  func.func @_head_proj_kernel(%arg0: i32, %arg1: i32, %arg2: i32, %arg3: i32, %arg4: memref<1x8x128xf32, #tpu.memory_space<vmem>>, %arg5: memref<1x128x8xbf16, #tpu.memory_space<vmem>>, %arg6: memref<1x1x8xf32, #tpu.memory_space<vmem>>, %arg7: memref<1x1x8x8xbf16, #tpu.memory_space<vmem>>, %arg8: memref<8x8xf32, #tpu.memory_space<vmem>>) attributes {dimension_semantics = [#tpu.dimension_semantics<parallel>, #tpu.dimension_semantics<parallel>, #tpu.dimension_semantics<parallel>, #tpu.dimension_semantics<arbitrary>], iteration_bounds = array<i64: 2, 12, 1, 1>, scalar_prefetch = 0 : i64, scratch_operands = 1 : i64, tpu.core_type = #tpu.core_type<tc>, window_params = [{transform_indices = @transform_0, window_bounds = array<i64: 1, 8, 128>}, {transform_indices = @transform_1, window_bounds = array<i64: 1, 128, 8>}, {transform_indices = @transform_2, window_bounds = array<i64: 1, 1, 8>}, {transform_indices = @transform_3, window_bounds = array<i64: 1, 1, 8, 8>}]} {
    %c0_i32 = arith.constant 0 : i32
    %0 = arith.cmpi eq, %arg3, %c0_i32 : i32
    %1 = arith.extui %0 : i1 to i32
    %c0_i32_0 = arith.constant 0 : i32
    %2 = arith.cmpi ne, %1, %c0_i32_0 : i32
    scf.if %2 {
      %cst_12 = arith.constant 0.000000e+00 : f32
      %15 = vector.broadcast %cst_12 : f32 to vector<8x8xf32>
      %c0_13 = arith.constant 0 : index
      %c0_14 = arith.constant 0 : index
      %16 = vector.load %arg8[%c0_13, %c0_14] : memref<8x8xf32, #tpu.memory_space<vmem>>, vector<8x8xf32>
      tpu.vector_store %arg8[%c0_13, %c0_14], %15 {strides = array<i32>} : memref<8x8xf32, #tpu.memory_space<vmem>>, vector<8x8xf32>,
    } else {
    }
    %c0 = arith.constant 0 : index
    %c0_1 = arith.constant 0 : index
    %3 = vector.load %arg8[%c0, %c0_1] : memref<8x8xf32, #tpu.memory_space<vmem>>, vector<8x8xf32>
    %c0_2 = arith.constant 0 : index
    %c0_3 = arith.constant 0 : index
    %c0_4 = arith.constant 0 : index
    %4 = vector.load %arg4[%c0_2, %c0_3, %c0_4] : memref<1x8x128xf32, #tpu.memory_space<vmem>>, vector<1x8x128xf32>
    %5 = vector.shape_cast %4 : vector<1x8x128xf32> to vector<8x128xf32>
    %6 = arith.truncf %5 : vector<8x128xf32> to vector<8x128xbf16>
    %c0_5 = arith.constant 0 : index
    %c0_6 = arith.constant 0 : index
    %c0_7 = arith.constant 0 : index
    %7 = vector.load %arg5[%c0_5, %c0_6, %c0_7] : memref<1x128x8xbf16, #tpu.memory_space<vmem>>, vector<1x128x8xbf16>
    %8 = vector.shape_cast %7 : vector<1x128x8xbf16> to vector<128x8xbf16>
    %cst = arith.constant dense<0.000000e+00> : vector<8x8xf32>
    %9 = tpu.matmul %6, %8, %cst {dimension_numbers = #tpu.dot_dimension_numbers<[1], [0], [0], [1], [0, 0, 1, 1], [], []>} : vector<8x128xbf16>, vector<128x8xbf16>, vector<8x8xf32> -> vector<8x8xf32>
    %10 = arith.addf %3, %9 : vector<8x8xf32>
    %c0_8 = arith.constant 0 : index
    %c0_9 = arith.constant 0 : index
    %11 = vector.load %arg8[%c0_8, %c0_9] : memref<8x8xf32, #tpu.memory_space<vmem>>, vector<8x8xf32>
    tpu.vector_store %arg8[%c0_8, %c0_9], %10 {strides = array<i32>} : memref<8x8xf32, #tpu.memory_space<vmem>>, vector<8x8xf32>,
    %c0_i32_10 = arith.constant 0 : i32
    %12 = arith.cmpi eq, %arg3, %c0_i32_10 : i32
    %13 = arith.extui %12 : i1 to i32
    %c0_i32_11 = arith.constant 0 : i32
    %14 = arith.cmpi ne, %13, %c0_i32_11 : i32
    scf.if %14 {
      %c0_12 = arith.constant 0 : index
      %c0_13 = arith.constant 0 : index
      %15 = vector.load %arg8[%c0_12, %c0_13] : memref<8x8xf32, #tpu.memory_space<vmem>>, vector<8x8xf32>
      %c0_14 = arith.constant 0 : index
      %c0_15 = arith.constant 0 : index
      %c0_16 = arith.constant 0 : index
      %16 = vector.load %arg6[%c0_14, %c0_15, %c0_16] : memref<1x1x8xf32, #tpu.memory_space<vmem>>, vector<1x1x8xf32>
      %17 = vector.shape_cast %16 : vector<1x1x8xf32> to vector<1x8xf32>
      %18 = vector.broadcast %17 : vector<1x8xf32> to vector<8x8xf32>
      %19 = arith.addf %15, %18 : vector<8x8xf32>
      %20 = arith.truncf %19 : vector<8x8xf32> to vector<8x8xbf16>
      %c0_17 = arith.constant 0 : index
      %c0_18 = arith.constant 0 : index
      %c0_19 = arith.constant 0 : index
      %c0_20 = arith.constant 0 : index
      %21 = vector.load %arg7[%c0_17, %c0_18, %c0_19, %c0_20] : memref<1x1x8x8xbf16, #tpu.memory_space<vmem>>, vector<1x1x8x8xbf16>
      %22 = vector.shape_cast %21 : vector<1x1x8x8xbf16> to vector<8x8xbf16>
      %23 = vector.shape_cast %20 : vector<8x8xbf16> to vector<1x1x8x8xbf16>
      tpu.vector_store %arg7[%c0_17, %c0_18, %c0_19, %c0_20], %23 {strides = array<i32>} : memref<1x1x8x8xbf16, #tpu.memory_space<vmem>>, vector<1x1x8x8xbf16>,
    } else {
    }
    return
  }
  func.func @transform_0(%arg0: i32, %arg1: i32, %arg2: i32, %arg3: i32) -> (i32, i32, i32) {
    %c0_i32 = arith.constant 0 : i32
    return %arg0, %arg2, %arg3 : i32, i32, i32
  }
  func.func @transform_1(%arg0: i32, %arg1: i32, %arg2: i32, %arg3: i32) -> (i32, i32, i32) {
    %c0_i32 = arith.constant 0 : i32
    %c0_i32_0 = arith.constant 0 : i32
    return %arg1, %arg3, %c0_i32 : i32, i32, i32
  }
  func.func @transform_2(%arg0: i32, %arg1: i32, %arg2: i32, %arg3: i32) -> (i32, i32, i32) {
    %c0_i32 = arith.constant 0 : i32
    %c0_i32_0 = arith.constant 0 : i32
    %c0_i32_1 = arith.constant 0 : i32
    return %arg1, %c0_i32, %c0_i32_0 : i32, i32, i32
  }
  func.func @transform_3(%arg0: i32, %arg1: i32, %arg2: i32, %arg3: i32) -> (i32, i32, i32, i32) {
    %c0_i32 = arith.constant 0 : i32
    %c0_i32_0 = arith.constant 0 : i32
    return %arg0, %arg1, %arg2, %c0_i32 : i32, i32, i32, i32
  }
}

module attributes {stable_mosaic.version = 11 : i64} {
  func.func @_out_proj_kernel(%arg0: i32, %arg1: i32, %arg2: i32, %arg3: i32, %arg4: memref<1x1x8x8xbf16, #tpu.memory_space<vmem>>, %arg5: memref<1x8x128xbf16, #tpu.memory_space<vmem>>, %arg6: memref<1x128xf32, #tpu.memory_space<vmem>>, %arg7: memref<1x8x128xf32, #tpu.memory_space<vmem>>, %arg8: memref<1x8x128xf32, #tpu.memory_space<vmem>>, %arg9: memref<8x128xf32, #tpu.memory_space<vmem>>) attributes {dimension_semantics = [#tpu.dimension_semantics<parallel>, #tpu.dimension_semantics<parallel>, #tpu.dimension_semantics<parallel>, #tpu.dimension_semantics<arbitrary>], iteration_bounds = array<i64: 2, 1, 1, 4>, scalar_prefetch = 0 : i64, scratch_operands = 1 : i64, tpu.core_type = #tpu.core_type<tc>, window_params = [{transform_indices = @transform_0, window_bounds = array<i64: 1, 1, 8, 8>}, {transform_indices = @transform_1, window_bounds = array<i64: 1, 8, 128>}, {transform_indices = @transform_2, window_bounds = array<i64: 1, 128>}, {transform_indices = @transform_3, window_bounds = array<i64: 1, 8, 128>}, {transform_indices = @transform_4, window_bounds = array<i64: 1, 8, 128>}]} {
    %c0_i32 = arith.constant 0 : i32
    %0 = arith.cmpi eq, %arg3, %c0_i32 : i32
    %1 = arith.extui %0 : i1 to i32
    %c0_i32_0 = arith.constant 0 : i32
    %2 = arith.cmpi ne, %1, %c0_i32_0 : i32
    scf.if %2 {
      %cst_12 = arith.constant 0.000000e+00 : f32
      %14 = vector.broadcast %cst_12 : f32 to vector<8x128xf32>
      %c0_13 = arith.constant 0 : index
      %c0_14 = arith.constant 0 : index
      %15 = vector.load %arg9[%c0_13, %c0_14] : memref<8x128xf32, #tpu.memory_space<vmem>>, vector<8x128xf32>
      tpu.vector_store %arg9[%c0_13, %c0_14], %14 {strides = array<i32>} : memref<8x128xf32, #tpu.memory_space<vmem>>, vector<8x128xf32>,
    } else {
    }
    %c0 = arith.constant 0 : index
    %c0_1 = arith.constant 0 : index
    %3 = vector.load %arg9[%c0, %c0_1] : memref<8x128xf32, #tpu.memory_space<vmem>>, vector<8x128xf32>
    %c0_2 = arith.constant 0 : index
    %c0_3 = arith.constant 0 : index
    %c0_4 = arith.constant 0 : index
    %c0_5 = arith.constant 0 : index
    %4 = vector.load %arg4[%c0_2, %c0_3, %c0_4, %c0_5] : memref<1x1x8x8xbf16, #tpu.memory_space<vmem>>, vector<1x1x8x8xbf16>
    %5 = vector.shape_cast %4 : vector<1x1x8x8xbf16> to vector<8x8xbf16>
    %c0_6 = arith.constant 0 : index
    %c0_7 = arith.constant 0 : index
    %c0_8 = arith.constant 0 : index
    %6 = vector.load %arg5[%c0_6, %c0_7, %c0_8] : memref<1x8x128xbf16, #tpu.memory_space<vmem>>, vector<1x8x128xbf16>
    %7 = vector.shape_cast %6 : vector<1x8x128xbf16> to vector<8x128xbf16>
    %cst = arith.constant dense<0.000000e+00> : vector<8x128xf32>
    %8 = tpu.matmul %5, %7, %cst {dimension_numbers = #tpu.dot_dimension_numbers<[1], [0], [0], [1], [0, 0, 1, 1], [], []>} : vector<8x8xbf16>, vector<8x128xbf16>, vector<8x128xf32> -> vector<8x128xf32>
    %9 = arith.addf %3, %8 : vector<8x128xf32>
    %c0_9 = arith.constant 0 : index
    %c0_10 = arith.constant 0 : index
    %10 = vector.load %arg9[%c0_9, %c0_10] : memref<8x128xf32, #tpu.memory_space<vmem>>, vector<8x128xf32>
    tpu.vector_store %arg9[%c0_9, %c0_10], %9 {strides = array<i32>} : memref<8x128xf32, #tpu.memory_space<vmem>>, vector<8x128xf32>,
    %c3_i32 = arith.constant 3 : i32
    %11 = arith.cmpi eq, %arg3, %c3_i32 : i32
    %12 = arith.extui %11 : i1 to i32
    %c0_i32_11 = arith.constant 0 : i32
    %13 = arith.cmpi ne, %12, %c0_i32_11 : i32
    scf.if %13 {
      %c0_12 = arith.constant 0 : index
      %c0_13 = arith.constant 0 : index
      %14 = vector.load %arg9[%c0_12, %c0_13] : memref<8x128xf32, #tpu.memory_space<vmem>>, vector<8x128xf32>
      %c0_14 = arith.constant 0 : index
      %c0_15 = arith.constant 0 : index
      %15 = vector.load %arg6[%c0_14, %c0_15] : memref<1x128xf32, #tpu.memory_space<vmem>>, vector<1x128xf32>
      %16 = vector.broadcast %15 : vector<1x128xf32> to vector<8x128xf32>
      %17 = arith.addf %14, %16 : vector<8x128xf32>
      %c0_16 = arith.constant 0 : index
      %c0_17 = arith.constant 0 : index
      %c0_18 = arith.constant 0 : index
      %18 = vector.load %arg7[%c0_16, %c0_17, %c0_18] : memref<1x8x128xf32, #tpu.memory_space<vmem>>, vector<1x8x128xf32>
      %19 = vector.shape_cast %18 : vector<1x8x128xf32> to vector<8x128xf32>
      %20 = arith.addf %17, %19 : vector<8x128xf32>
      %c0_19 = arith.constant 0 : index
      %c0_20 = arith.constant 0 : index
      %c0_21 = arith.constant 0 : index
      %21 = vector.load %arg8[%c0_19, %c0_20, %c0_21] : memref<1x8x128xf32, #tpu.memory_space<vmem>>, vector<1x8x128xf32>
      %22 = vector.shape_cast %21 : vector<1x8x128xf32> to vector<8x128xf32>
      %23 = vector.shape_cast %20 : vector<8x128xf32> to vector<1x8x128xf32>
      tpu.vector_store %arg8[%c0_19, %c0_20, %c0_21], %23 {strides = array<i32>} : memref<1x8x128xf32, #tpu.memory_space<vmem>>, vector<1x8x128xf32>,
    } else {
    }
    return
  }
  func.func @transform_0(%arg0: i32, %arg1: i32, %arg2: i32, %arg3: i32) -> (i32, i32, i32, i32) {
    %c0_i32 = arith.constant 0 : i32
    %c0_i32_0 = arith.constant 0 : i32
    return %arg0, %arg3, %arg1, %c0_i32 : i32, i32, i32, i32
  }
  func.func @transform_1(%arg0: i32, %arg1: i32, %arg2: i32, %arg3: i32) -> (i32, i32, i32) {
    %c0_i32 = arith.constant 0 : i32
    %c0_i32_0 = arith.constant 0 : i32
    return %arg3, %c0_i32, %arg2 : i32, i32, i32
  }
  func.func @transform_2(%arg0: i32, %arg1: i32, %arg2: i32, %arg3: i32) -> (i32, i32) {
    %c0_i32 = arith.constant 0 : i32
    %c0_i32_0 = arith.constant 0 : i32
    return %c0_i32, %arg2 : i32, i32
  }
  func.func @transform_3(%arg0: i32, %arg1: i32, %arg2: i32, %arg3: i32) -> (i32, i32, i32) {
    %c0_i32 = arith.constant 0 : i32
    return %arg0, %arg1, %arg2 : i32, i32, i32
  }
  func.func @transform_4(%arg0: i32, %arg1: i32, %arg2: i32, %arg3: i32) -> (i32, i32, i32) {
    %c0_i32 = arith.constant 0 : i32
    return %arg0, %arg1, %arg2 : i32, i32, i32
  }
}

module attributes {stable_mosaic.version = 11 : i64} {
  func.func @_flash_kernel(%arg0: i32, %arg1: i32, %arg2: i32, %arg3: i32, %arg4: memref<1x1x8x8xbf16, #tpu.memory_space<vmem>>, %arg5: memref<1x1x8x8xbf16, #tpu.memory_space<vmem>>, %arg6: memref<1x1x8x8xbf16, #tpu.memory_space<vmem>>, %arg7: memref<8x8xf32, #tpu.memory_space<vmem>>, %arg8: memref<1x1x8xf32, #tpu.memory_space<vmem>>, %arg9: memref<1x1x8x8xbf16, #tpu.memory_space<vmem>>, %arg10: memref<8x1xf32, #tpu.memory_space<vmem>>, %arg11: memref<8x1xf32, #tpu.memory_space<vmem>>, %arg12: memref<8x8xf32, #tpu.memory_space<vmem>>) attributes {dimension_semantics = [#tpu.dimension_semantics<parallel>, #tpu.dimension_semantics<parallel>, #tpu.dimension_semantics<parallel>, #tpu.dimension_semantics<arbitrary>], iteration_bounds = array<i64: 2, 4, 1, 1>, scalar_prefetch = 0 : i64, scratch_operands = 3 : i64, tpu.core_type = #tpu.core_type<tc>, window_params = [{transform_indices = @transform_0, window_bounds = array<i64: 1, 1, 8, 8>}, {transform_indices = @transform_1, window_bounds = array<i64: 1, 1, 8, 8>}, {transform_indices = @transform_2, window_bounds = array<i64: 1, 1, 8, 8>}, {transform_indices = @transform_3, window_bounds = array<i64: 8, 8>}, {transform_indices = @transform_4, window_bounds = array<i64: 1, 1, 8>}, {transform_indices = @transform_5, window_bounds = array<i64: 1, 1, 8, 8>}]} {
    %c0_i32 = arith.constant 0 : i32
    %0 = arith.cmpi eq, %arg3, %c0_i32 : i32
    %1 = arith.extui %0 : i1 to i32
    %c0_i32_0 = arith.constant 0 : i32
    %2 = arith.cmpi ne, %1, %c0_i32_0 : i32
    scf.if %2 {
      %cst_35 = arith.constant -1.000000e+30 : f32
      %44 = vector.broadcast %cst_35 : f32 to vector<8x1xf32>
      %c0_36 = arith.constant 0 : index
      %c0_37 = arith.constant 0 : index
      %45 = vector.load %arg10[%c0_36, %c0_37] : memref<8x1xf32, #tpu.memory_space<vmem>>, vector<8x1xf32>
      tpu.vector_store %arg10[%c0_36, %c0_37], %44 {strides = array<i32>} : memref<8x1xf32, #tpu.memory_space<vmem>>, vector<8x1xf32>,
      %cst_38 = arith.constant 0.000000e+00 : f32
      %46 = vector.broadcast %cst_38 : f32 to vector<8x1xf32>
      %c0_39 = arith.constant 0 : index
      %c0_40 = arith.constant 0 : index
      %47 = vector.load %arg11[%c0_39, %c0_40] : memref<8x1xf32, #tpu.memory_space<vmem>>, vector<8x1xf32>
      tpu.vector_store %arg11[%c0_39, %c0_40], %46 {strides = array<i32>} : memref<8x1xf32, #tpu.memory_space<vmem>>, vector<8x1xf32>,
      %cst_41 = arith.constant 0.000000e+00 : f32
      %48 = vector.broadcast %cst_41 : f32 to vector<8x8xf32>
      %c0_42 = arith.constant 0 : index
      %c0_43 = arith.constant 0 : index
      %49 = vector.load %arg12[%c0_42, %c0_43] : memref<8x8xf32, #tpu.memory_space<vmem>>, vector<8x8xf32>
      tpu.vector_store %arg12[%c0_42, %c0_43], %48 {strides = array<i32>} : memref<8x8xf32, #tpu.memory_space<vmem>>, vector<8x8xf32>,
    } else {
    }
    %c0 = arith.constant 0 : index
    %c0_1 = arith.constant 0 : index
    %c0_2 = arith.constant 0 : index
    %c0_3 = arith.constant 0 : index
    %3 = vector.load %arg4[%c0, %c0_1, %c0_2, %c0_3] : memref<1x1x8x8xbf16, #tpu.memory_space<vmem>>, vector<1x1x8x8xbf16>
    %4 = vector.shape_cast %3 : vector<1x1x8x8xbf16> to vector<8x8xbf16>
    %c0_4 = arith.constant 0 : index
    %c0_5 = arith.constant 0 : index
    %c0_6 = arith.constant 0 : index
    %c0_7 = arith.constant 0 : index
    %5 = vector.load %arg5[%c0_4, %c0_5, %c0_6, %c0_7] : memref<1x1x8x8xbf16, #tpu.memory_space<vmem>>, vector<1x1x8x8xbf16>
    %6 = vector.shape_cast %5 : vector<1x1x8x8xbf16> to vector<8x8xbf16>
    %c0_8 = arith.constant 0 : index
    %c0_9 = arith.constant 0 : index
    %c0_10 = arith.constant 0 : index
    %c0_11 = arith.constant 0 : index
    %7 = vector.load %arg6[%c0_8, %c0_9, %c0_10, %c0_11] : memref<1x1x8x8xbf16, #tpu.memory_space<vmem>>, vector<1x1x8x8xbf16>
    %8 = vector.shape_cast %7 : vector<1x1x8x8xbf16> to vector<8x8xbf16>
    "tpu.trace_start"() <{level = 10 : i32, message = "qd,kd->qk"}> : () -> ()
    %cst = arith.constant dense<0.000000e+00> : vector<8x8xf32>
    %9 = tpu.matmul %4, %6, %cst {dimension_numbers = #tpu.dot_dimension_numbers<[1], [1], [0], [0], [0, 0, 1, 0], [], []>} : vector<8x8xbf16>, vector<8x8xbf16>, vector<8x8xf32> -> vector<8x8xf32>
    "tpu.trace_stop"() : () -> ()
    %cst_12 = arith.constant 0.353553385 : f32
    %10 = vector.broadcast %cst_12 : f32 to vector<8x8xf32>
    %11 = arith.mulf %9, %10 : vector<8x8xf32>
    %c0_13 = arith.constant 0 : index
    %c0_14 = arith.constant 0 : index
    %12 = vector.load %arg7[%c0_13, %c0_14] : memref<8x8xf32, #tpu.memory_space<vmem>>, vector<8x8xf32>
    %13 = arith.addf %11, %12 : vector<8x8xf32>
    %c0_15 = arith.constant 0 : index
    %c0_16 = arith.constant 0 : index
    %c0_17 = arith.constant 0 : index
    %14 = vector.load %arg8[%c0_15, %c0_16, %c0_17] : memref<1x1x8xf32, #tpu.memory_space<vmem>>, vector<1x1x8xf32>
    %15 = vector.shape_cast %14 : vector<1x1x8xf32> to vector<1x8xf32>
    %16 = vector.broadcast %15 : vector<1x8xf32> to vector<8x8xf32>
    %17 = arith.addf %13, %16 : vector<8x8xf32>
    %c0_18 = arith.constant 0 : index
    %c0_19 = arith.constant 0 : index
    %18 = vector.load %arg10[%c0_18, %c0_19] : memref<8x1xf32, #tpu.memory_space<vmem>>, vector<8x1xf32>
    %cst_20 = arith.constant dense<0xFF800000> : vector<8xf32>
    %19 = vector.multi_reduction <maximumf>, %17, %cst_20 [1] : vector<8x8xf32> to vector<8xf32>
    %20 = vector.shape_cast %19 : vector<8xf32> to vector<8x1xf32>
    %21 = arith.maximumf %18, %20 : vector<8x1xf32>
    %22 = arith.subf %18, %21 : vector<8x1xf32>
    %23 = math.exp %22 : vector<8x1xf32>
    %24 = vector.broadcast %21 : vector<8x1xf32> to vector<8x8xf32>
    %25 = arith.subf %17, %24 : vector<8x8xf32>
    %26 = math.exp %25 : vector<8x8xf32>
    %c0_21 = arith.constant 0 : index
    %c0_22 = arith.constant 0 : index
    %27 = vector.load %arg11[%c0_21, %c0_22] : memref<8x1xf32, #tpu.memory_space<vmem>>, vector<8x1xf32>
    %28 = arith.mulf %23, %27 : vector<8x1xf32>
    %cst_23 = arith.constant dense<0.000000e+00> : vector<8xf32>
    %29 = vector.multi_reduction <add>, %26, %cst_23 [1] : vector<8x8xf32> to vector<8xf32>
    %30 = vector.shape_cast %29 : vector<8xf32> to vector<8x1xf32>
    %31 = arith.addf %28, %30 : vector<8x1xf32>
    %c0_24 = arith.constant 0 : index
    %c0_25 = arith.constant 0 : index
    %32 = vector.load %arg11[%c0_24, %c0_25] : memref<8x1xf32, #tpu.memory_space<vmem>>, vector<8x1xf32>
    tpu.vector_store %arg11[%c0_24, %c0_25], %31 {strides = array<i32>} : memref<8x1xf32, #tpu.memory_space<vmem>>, vector<8x1xf32>,
    %c0_26 = arith.constant 0 : index
    %c0_27 = arith.constant 0 : index
    %33 = vector.load %arg12[%c0_26, %c0_27] : memref<8x8xf32, #tpu.memory_space<vmem>>, vector<8x8xf32>
    %34 = vector.broadcast %23 : vector<8x1xf32> to vector<8x8xf32>
    %35 = arith.mulf %34, %33 : vector<8x8xf32>
    %36 = arith.truncf %26 : vector<8x8xf32> to vector<8x8xbf16>
    %cst_28 = arith.constant dense<0.000000e+00> : vector<8x8xf32>
    %37 = tpu.matmul %36, %8, %cst_28 {dimension_numbers = #tpu.dot_dimension_numbers<[1], [0], [0], [1], [0, 0, 1, 1], [], []>} : vector<8x8xbf16>, vector<8x8xbf16>, vector<8x8xf32> -> vector<8x8xf32>
    %38 = arith.addf %35, %37 : vector<8x8xf32>
    %c0_29 = arith.constant 0 : index
    %c0_30 = arith.constant 0 : index
    %39 = vector.load %arg12[%c0_29, %c0_30] : memref<8x8xf32, #tpu.memory_space<vmem>>, vector<8x8xf32>
    tpu.vector_store %arg12[%c0_29, %c0_30], %38 {strides = array<i32>} : memref<8x8xf32, #tpu.memory_space<vmem>>, vector<8x8xf32>,
    %c0_31 = arith.constant 0 : index
    %c0_32 = arith.constant 0 : index
    %40 = vector.load %arg10[%c0_31, %c0_32] : memref<8x1xf32, #tpu.memory_space<vmem>>, vector<8x1xf32>
    tpu.vector_store %arg10[%c0_31, %c0_32], %21 {strides = array<i32>} : memref<8x1xf32, #tpu.memory_space<vmem>>, vector<8x1xf32>,
    %c0_i32_33 = arith.constant 0 : i32
    %41 = arith.cmpi eq, %arg3, %c0_i32_33 : i32
    %42 = arith.extui %41 : i1 to i32
    %c0_i32_34 = arith.constant 0 : i32
    %43 = arith.cmpi ne, %42, %c0_i32_34 : i32
    scf.if %43 {
      %c0_35 = arith.constant 0 : index
      %c0_36 = arith.constant 0 : index
      %44 = vector.load %arg12[%c0_35, %c0_36] : memref<8x8xf32, #tpu.memory_space<vmem>>, vector<8x8xf32>
      %c0_37 = arith.constant 0 : index
      %c0_38 = arith.constant 0 : index
      %45 = vector.load %arg11[%c0_37, %c0_38] : memref<8x1xf32, #tpu.memory_space<vmem>>, vector<8x1xf32>
      %46 = tpu.reciprocal %45 {approx = true} : vector<8x1xf32> -> vector<8x1xf32>
      %47 = vector.broadcast %46 : vector<8x1xf32> to vector<8x8xf32>
      %48 = arith.mulf %44, %47 : vector<8x8xf32>
      %49 = arith.truncf %48 : vector<8x8xf32> to vector<8x8xbf16>
      %c0_39 = arith.constant 0 : index
      %c0_40 = arith.constant 0 : index
      %c0_41 = arith.constant 0 : index
      %c0_42 = arith.constant 0 : index
      %50 = vector.load %arg9[%c0_39, %c0_40, %c0_41, %c0_42] : memref<1x1x8x8xbf16, #tpu.memory_space<vmem>>, vector<1x1x8x8xbf16>
      %51 = vector.shape_cast %50 : vector<1x1x8x8xbf16> to vector<8x8xbf16>
      %52 = vector.shape_cast %49 : vector<8x8xbf16> to vector<1x1x8x8xbf16>
      tpu.vector_store %arg9[%c0_39, %c0_40, %c0_41, %c0_42], %52 {strides = array<i32>} : memref<1x1x8x8xbf16, #tpu.memory_space<vmem>>, vector<1x1x8x8xbf16>,
    } else {
    }
    return
  }
  func.func @transform_0(%arg0: i32, %arg1: i32, %arg2: i32, %arg3: i32) -> (i32, i32, i32, i32) {
    %c0_i32 = arith.constant 0 : i32
    %0 = arith.addi %arg1, %c0_i32 : i32
    %c0_i32_0 = arith.constant 0 : i32
    %c0_i32_1 = arith.constant 0 : i32
    return %arg0, %0, %arg2, %c0_i32_0 : i32, i32, i32, i32
  }
  func.func @transform_1(%arg0: i32, %arg1: i32, %arg2: i32, %arg3: i32) -> (i32, i32, i32, i32) {
    %c4_i32 = arith.constant 4 : i32
    %0 = arith.addi %arg1, %c4_i32 : i32
    %c0_i32 = arith.constant 0 : i32
    %c0_i32_0 = arith.constant 0 : i32
    return %arg0, %0, %arg3, %c0_i32 : i32, i32, i32, i32
  }
  func.func @transform_2(%arg0: i32, %arg1: i32, %arg2: i32, %arg3: i32) -> (i32, i32, i32, i32) {
    %c8_i32 = arith.constant 8 : i32
    %0 = arith.addi %arg1, %c8_i32 : i32
    %c0_i32 = arith.constant 0 : i32
    %c0_i32_0 = arith.constant 0 : i32
    return %arg0, %0, %arg3, %c0_i32 : i32, i32, i32, i32
  }
  func.func @transform_3(%arg0: i32, %arg1: i32, %arg2: i32, %arg3: i32) -> (i32, i32) {
    %c0_i32 = arith.constant 0 : i32
    return %arg2, %arg3 : i32, i32
  }
  func.func @transform_4(%arg0: i32, %arg1: i32, %arg2: i32, %arg3: i32) -> (i32, i32, i32) {
    %c0_i32 = arith.constant 0 : i32
    %c0_i32_0 = arith.constant 0 : i32
    return %arg0, %c0_i32, %arg3 : i32, i32, i32
  }
  func.func @transform_5(%arg0: i32, %arg1: i32, %arg2: i32, %arg3: i32) -> (i32, i32, i32, i32) {
    %c0_i32 = arith.constant 0 : i32
    %c0_i32_0 = arith.constant 0 : i32
    return %arg0, %arg1, %arg2, %c0_i32 : i32, i32, i32, i32
  }
}

module attributes {stable_mosaic.version = 11 : i64} {
  func.func @_ln_kernel(%arg0: i32, %arg1: memref<16x128xf32, #tpu.memory_space<vmem>>, %arg2: memref<1x128xf32, #tpu.memory_space<vmem>>, %arg3: memref<1x128xf32, #tpu.memory_space<vmem>>, %arg4: memref<16x128xf32, #tpu.memory_space<vmem>>) attributes {dimension_semantics = [#tpu.dimension_semantics<parallel>], iteration_bounds = array<i64: 1>, scalar_prefetch = 0 : i64, scratch_operands = 0 : i64, tpu.core_type = #tpu.core_type<tc>, window_params = [{transform_indices = @transform_0, window_bounds = array<i64: 16, 128>}, {pipeline_mode = #tpu.pipeline_mode<synchronous>, transform_indices = @transform_1, window_bounds = array<i64: 1, 128>}, {pipeline_mode = #tpu.pipeline_mode<synchronous>, transform_indices = @transform_2, window_bounds = array<i64: 1, 128>}, {transform_indices = @transform_3, window_bounds = array<i64: 16, 128>}]} {
    %c0 = arith.constant 0 : index
    %c0_0 = arith.constant 0 : index
    %0 = vector.load %arg1[%c0, %c0_0] : memref<16x128xf32, #tpu.memory_space<vmem>>, vector<16x128xf32>
    %cst = arith.constant dense<0.000000e+00> : vector<16xf32>
    %1 = vector.multi_reduction <add>, %0, %cst [1] : vector<16x128xf32> to vector<16xf32>
    %2 = vector.shape_cast %1 : vector<16xf32> to vector<16x1xf32>
    %cst_1 = arith.constant 3.125000e-02 : f32
    %3 = vector.broadcast %cst_1 : f32 to vector<16x1xf32>
    %4 = arith.mulf %2, %3 : vector<16x1xf32>
    %5 = arith.mulf %0, %0 : vector<16x128xf32>
    %cst_2 = arith.constant dense<0.000000e+00> : vector<16xf32>
    %6 = vector.multi_reduction <add>, %5, %cst_2 [1] : vector<16x128xf32> to vector<16xf32>
    %7 = vector.shape_cast %6 : vector<16xf32> to vector<16x1xf32>
    %cst_3 = arith.constant 3.125000e-02 : f32
    %8 = vector.broadcast %cst_3 : f32 to vector<16x1xf32>
    %9 = arith.mulf %7, %8 : vector<16x1xf32>
    %10 = arith.mulf %4, %4 : vector<16x1xf32>
    %11 = arith.subf %9, %10 : vector<16x1xf32>
    %cst_4 = arith.constant 9.99999974E-6 : f32
    %12 = vector.broadcast %cst_4 : f32 to vector<16x1xf32>
    %13 = arith.addf %11, %12 : vector<16x1xf32>
    %14 = math.rsqrt %13 : vector<16x1xf32>
    %15 = vector.broadcast %4 : vector<16x1xf32> to vector<16x128xf32>
    %16 = arith.subf %0, %15 : vector<16x128xf32>
    %17 = vector.broadcast %14 : vector<16x1xf32> to vector<16x128xf32>
    %18 = arith.mulf %16, %17 : vector<16x128xf32>
    %c0_5 = arith.constant 0 : index
    %c0_6 = arith.constant 0 : index
    %19 = vector.load %arg2[%c0_5, %c0_6] : memref<1x128xf32, #tpu.memory_space<vmem>>, vector<1x128xf32>
    %20 = vector.broadcast %19 : vector<1x128xf32> to vector<16x128xf32>
    %21 = arith.mulf %18, %20 : vector<16x128xf32>
    %c0_7 = arith.constant 0 : index
    %c0_8 = arith.constant 0 : index
    %22 = vector.load %arg3[%c0_7, %c0_8] : memref<1x128xf32, #tpu.memory_space<vmem>>, vector<1x128xf32>
    %23 = vector.broadcast %22 : vector<1x128xf32> to vector<16x128xf32>
    %24 = arith.addf %21, %23 : vector<16x128xf32>
    %c0_9 = arith.constant 0 : index
    %c0_10 = arith.constant 0 : index
    %25 = vector.load %arg4[%c0_9, %c0_10] : memref<16x128xf32, #tpu.memory_space<vmem>>, vector<16x128xf32>
    tpu.vector_store %arg4[%c0_9, %c0_10], %24 {strides = array<i32>} : memref<16x128xf32, #tpu.memory_space<vmem>>, vector<16x128xf32>,
    return
  }
  func.func @transform_0(%arg0: i32) -> (i32, i32) {
    %c0_i32 = arith.constant 0 : i32
    %c0_i32_0 = arith.constant 0 : i32
    return %arg0, %c0_i32 : i32, i32
  }
  func.func @transform_1(%arg0: i32) -> (i32, i32) {
    %c0_i32 = arith.constant 0 : i32
    %c0_i32_0 = arith.constant 0 : i32
    %c0_i32_1 = arith.constant 0 : i32
    return %c0_i32, %c0_i32_0 : i32, i32
  }
  func.func @transform_2(%arg0: i32) -> (i32, i32) {
    %c0_i32 = arith.constant 0 : i32
    %c0_i32_0 = arith.constant 0 : i32
    %c0_i32_1 = arith.constant 0 : i32
    return %c0_i32, %c0_i32_0 : i32, i32
  }
  func.func @transform_3(%arg0: i32) -> (i32, i32) {
    %c0_i32 = arith.constant 0 : i32
    %c0_i32_0 = arith.constant 0 : i32
    return %arg0, %c0_i32 : i32, i32
  }
}

module attributes {stable_mosaic.version = 11 : i64} {
  func.func @_linear_kernel(%arg0: i32, %arg1: i32, %arg2: i32, %arg3: memref<16x128xbf16, #tpu.memory_space<vmem>>, %arg4: memref<128x128xbf16, #tpu.memory_space<vmem>>, %arg5: memref<1x128xf32, #tpu.memory_space<vmem>>, %arg6: memref<16x128xf32, #tpu.memory_space<vmem>>, %arg7: memref<16x128xf32, #tpu.memory_space<vmem>>, %arg8: memref<16x128xf32, #tpu.memory_space<vmem>>) attributes {dimension_semantics = [#tpu.dimension_semantics<parallel>, #tpu.dimension_semantics<parallel>, #tpu.dimension_semantics<arbitrary>], iteration_bounds = array<i64: 1, 1, 1>, scalar_prefetch = 0 : i64, scratch_operands = 1 : i64, tpu.core_type = #tpu.core_type<tc>, window_params = [{transform_indices = @transform_0, window_bounds = array<i64: 16, 128>}, {transform_indices = @transform_1, window_bounds = array<i64: 128, 128>}, {transform_indices = @transform_2, window_bounds = array<i64: 1, 128>}, {transform_indices = @transform_3, window_bounds = array<i64: 16, 128>}, {transform_indices = @transform_4, window_bounds = array<i64: 16, 128>}]} {
    %c0_i32 = arith.constant 0 : i32
    %0 = arith.cmpi eq, %arg2, %c0_i32 : i32
    %1 = arith.extui %0 : i1 to i32
    %c0_i32_0 = arith.constant 0 : i32
    %2 = arith.cmpi ne, %1, %c0_i32_0 : i32
    scf.if %2 {
      %cst_10 = arith.constant 0.000000e+00 : f32
      %12 = vector.broadcast %cst_10 : f32 to vector<16x128xf32>
      %c0_11 = arith.constant 0 : index
      %c0_12 = arith.constant 0 : index
      %13 = vector.load %arg8[%c0_11, %c0_12] : memref<16x128xf32, #tpu.memory_space<vmem>>, vector<16x128xf32>
      tpu.vector_store %arg8[%c0_11, %c0_12], %12 {strides = array<i32>} : memref<16x128xf32, #tpu.memory_space<vmem>>, vector<16x128xf32>,
    } else {
    }
    %c0 = arith.constant 0 : index
    %c0_1 = arith.constant 0 : index
    %3 = vector.load %arg8[%c0, %c0_1] : memref<16x128xf32, #tpu.memory_space<vmem>>, vector<16x128xf32>
    %c0_2 = arith.constant 0 : index
    %c0_3 = arith.constant 0 : index
    %4 = vector.load %arg3[%c0_2, %c0_3] : memref<16x128xbf16, #tpu.memory_space<vmem>>, vector<16x128xbf16>
    %c0_4 = arith.constant 0 : index
    %c0_5 = arith.constant 0 : index
    %5 = vector.load %arg4[%c0_4, %c0_5] : memref<128x128xbf16, #tpu.memory_space<vmem>>, vector<128x128xbf16>
    %cst = arith.constant dense<0.000000e+00> : vector<16x128xf32>
    %6 = tpu.matmul %4, %5, %cst {dimension_numbers = #tpu.dot_dimension_numbers<[1], [0], [0], [1], [0, 0, 1, 1], [], []>} : vector<16x128xbf16>, vector<128x128xbf16>, vector<16x128xf32> -> vector<16x128xf32>
    %7 = arith.addf %3, %6 : vector<16x128xf32>
    %c0_6 = arith.constant 0 : index
    %c0_7 = arith.constant 0 : index
    %8 = vector.load %arg8[%c0_6, %c0_7] : memref<16x128xf32, #tpu.memory_space<vmem>>, vector<16x128xf32>
    tpu.vector_store %arg8[%c0_6, %c0_7], %7 {strides = array<i32>} : memref<16x128xf32, #tpu.memory_space<vmem>>, vector<16x128xf32>,
    %c0_i32_8 = arith.constant 0 : i32
    %9 = arith.cmpi eq, %arg2, %c0_i32_8 : i32
    %10 = arith.extui %9 : i1 to i32
    %c0_i32_9 = arith.constant 0 : i32
    %11 = arith.cmpi ne, %10, %c0_i32_9 : i32
    scf.if %11 {
      %c0_10 = arith.constant 0 : index
      %c0_11 = arith.constant 0 : index
      %12 = vector.load %arg8[%c0_10, %c0_11] : memref<16x128xf32, #tpu.memory_space<vmem>>, vector<16x128xf32>
      %c0_12 = arith.constant 0 : index
      %c0_13 = arith.constant 0 : index
      %13 = vector.load %arg5[%c0_12, %c0_13] : memref<1x128xf32, #tpu.memory_space<vmem>>, vector<1x128xf32>
      %14 = vector.broadcast %13 : vector<1x128xf32> to vector<16x128xf32>
      %15 = arith.addf %12, %14 : vector<16x128xf32>
      %c0_14 = arith.constant 0 : index
      %c0_15 = arith.constant 0 : index
      %16 = vector.load %arg6[%c0_14, %c0_15] : memref<16x128xf32, #tpu.memory_space<vmem>>, vector<16x128xf32>
      %17 = arith.addf %15, %16 : vector<16x128xf32>
      %c0_16 = arith.constant 0 : index
      %c0_17 = arith.constant 0 : index
      %18 = vector.load %arg7[%c0_16, %c0_17] : memref<16x128xf32, #tpu.memory_space<vmem>>, vector<16x128xf32>
      tpu.vector_store %arg7[%c0_16, %c0_17], %17 {strides = array<i32>} : memref<16x128xf32, #tpu.memory_space<vmem>>, vector<16x128xf32>,
    } else {
    }
    return
  }
  func.func @transform_0(%arg0: i32, %arg1: i32, %arg2: i32) -> (i32, i32) {
    %c0_i32 = arith.constant 0 : i32
    return %arg0, %arg2 : i32, i32
  }
  func.func @transform_1(%arg0: i32, %arg1: i32, %arg2: i32) -> (i32, i32) {
    %c0_i32 = arith.constant 0 : i32
    return %arg2, %arg1 : i32, i32
  }
  func.func @transform_2(%arg0: i32, %arg1: i32, %arg2: i32) -> (i32, i32) {
    %c0_i32 = arith.constant 0 : i32
    %c0_i32_0 = arith.constant 0 : i32
    return %c0_i32, %arg1 : i32, i32
  }
  func.func @transform_3(%arg0: i32, %arg1: i32, %arg2: i32) -> (i32, i32) {
    %c0_i32 = arith.constant 0 : i32
    return %arg0, %arg1 : i32, i32
  }
  func.func @transform_4(%arg0: i32, %arg1: i32, %arg2: i32) -> (i32, i32) {
    %c0_i32 = arith.constant 0 : i32
    return %arg0, %arg1 : i32, i32
  }
}

module attributes {stable_mosaic.version = 11 : i64} {
  func.func @_linear_kernel(%arg0: i32, %arg1: i32, %arg2: i32, %arg3: memref<16x128xf32, #tpu.memory_space<vmem>>, %arg4: memref<128x128xbf16, #tpu.memory_space<vmem>>, %arg5: memref<1x128xf32, #tpu.memory_space<vmem>>, %arg6: memref<16x128xbf16, #tpu.memory_space<vmem>>, %arg7: memref<16x128xf32, #tpu.memory_space<vmem>>) attributes {dimension_semantics = [#tpu.dimension_semantics<parallel>, #tpu.dimension_semantics<parallel>, #tpu.dimension_semantics<arbitrary>], iteration_bounds = array<i64: 1, 1, 1>, scalar_prefetch = 0 : i64, scratch_operands = 1 : i64, tpu.core_type = #tpu.core_type<tc>, window_params = [{transform_indices = @transform_0, window_bounds = array<i64: 16, 128>}, {transform_indices = @transform_1, window_bounds = array<i64: 128, 128>}, {transform_indices = @transform_2, window_bounds = array<i64: 1, 128>}, {transform_indices = @transform_3, window_bounds = array<i64: 16, 128>}]} {
    %c0_i32 = arith.constant 0 : i32
    %0 = arith.cmpi eq, %arg2, %c0_i32 : i32
    %1 = arith.extui %0 : i1 to i32
    %c0_i32_0 = arith.constant 0 : i32
    %2 = arith.cmpi ne, %1, %c0_i32_0 : i32
    scf.if %2 {
      %cst_10 = arith.constant 0.000000e+00 : f32
      %13 = vector.broadcast %cst_10 : f32 to vector<16x128xf32>
      %c0_11 = arith.constant 0 : index
      %c0_12 = arith.constant 0 : index
      %14 = vector.load %arg7[%c0_11, %c0_12] : memref<16x128xf32, #tpu.memory_space<vmem>>, vector<16x128xf32>
      tpu.vector_store %arg7[%c0_11, %c0_12], %13 {strides = array<i32>} : memref<16x128xf32, #tpu.memory_space<vmem>>, vector<16x128xf32>,
    } else {
    }
    %c0 = arith.constant 0 : index
    %c0_1 = arith.constant 0 : index
    %3 = vector.load %arg7[%c0, %c0_1] : memref<16x128xf32, #tpu.memory_space<vmem>>, vector<16x128xf32>
    %c0_2 = arith.constant 0 : index
    %c0_3 = arith.constant 0 : index
    %4 = vector.load %arg3[%c0_2, %c0_3] : memref<16x128xf32, #tpu.memory_space<vmem>>, vector<16x128xf32>
    %5 = arith.truncf %4 : vector<16x128xf32> to vector<16x128xbf16>
    %c0_4 = arith.constant 0 : index
    %c0_5 = arith.constant 0 : index
    %6 = vector.load %arg4[%c0_4, %c0_5] : memref<128x128xbf16, #tpu.memory_space<vmem>>, vector<128x128xbf16>
    %cst = arith.constant dense<0.000000e+00> : vector<16x128xf32>
    %7 = tpu.matmul %5, %6, %cst {dimension_numbers = #tpu.dot_dimension_numbers<[1], [0], [0], [1], [0, 0, 1, 1], [], []>} : vector<16x128xbf16>, vector<128x128xbf16>, vector<16x128xf32> -> vector<16x128xf32>
    %8 = arith.addf %3, %7 : vector<16x128xf32>
    %c0_6 = arith.constant 0 : index
    %c0_7 = arith.constant 0 : index
    %9 = vector.load %arg7[%c0_6, %c0_7] : memref<16x128xf32, #tpu.memory_space<vmem>>, vector<16x128xf32>
    tpu.vector_store %arg7[%c0_6, %c0_7], %8 {strides = array<i32>} : memref<16x128xf32, #tpu.memory_space<vmem>>, vector<16x128xf32>,
    %c0_i32_8 = arith.constant 0 : i32
    %10 = arith.cmpi eq, %arg2, %c0_i32_8 : i32
    %11 = arith.extui %10 : i1 to i32
    %c0_i32_9 = arith.constant 0 : i32
    %12 = arith.cmpi ne, %11, %c0_i32_9 : i32
    scf.if %12 {
      %c0_10 = arith.constant 0 : index
      %c0_11 = arith.constant 0 : index
      %13 = vector.load %arg7[%c0_10, %c0_11] : memref<16x128xf32, #tpu.memory_space<vmem>>, vector<16x128xf32>
      %c0_12 = arith.constant 0 : index
      %c0_13 = arith.constant 0 : index
      %14 = vector.load %arg5[%c0_12, %c0_13] : memref<1x128xf32, #tpu.memory_space<vmem>>, vector<1x128xf32>
      %15 = vector.broadcast %14 : vector<1x128xf32> to vector<16x128xf32>
      %16 = arith.addf %13, %15 : vector<16x128xf32>
      %cst_14 = arith.constant 0.000000e+00 : f32
      %17 = vector.broadcast %cst_14 : f32 to vector<16x128xf32>
      %18 = arith.maximumf %16, %17 : vector<16x128xf32>
      %19 = arith.truncf %18 : vector<16x128xf32> to vector<16x128xbf16>
      %c0_15 = arith.constant 0 : index
      %c0_16 = arith.constant 0 : index
      %20 = vector.load %arg6[%c0_15, %c0_16] : memref<16x128xbf16, #tpu.memory_space<vmem>>, vector<16x128xbf16>
      tpu.vector_store %arg6[%c0_15, %c0_16], %19 {strides = array<i32>} : memref<16x128xbf16, #tpu.memory_space<vmem>>, vector<16x128xbf16>,
    } else {
    }
    return
  }
  func.func @transform_0(%arg0: i32, %arg1: i32, %arg2: i32) -> (i32, i32) {
    %c0_i32 = arith.constant 0 : i32
    return %arg0, %arg2 : i32, i32
  }
  func.func @transform_1(%arg0: i32, %arg1: i32, %arg2: i32) -> (i32, i32) {
    %c0_i32 = arith.constant 0 : i32
    return %arg2, %arg1 : i32, i32
  }
  func.func @transform_2(%arg0: i32, %arg1: i32, %arg2: i32) -> (i32, i32) {
    %c0_i32 = arith.constant 0 : i32
    %c0_i32_0 = arith.constant 0 : i32
    return %c0_i32, %arg1 : i32, i32
  }
  func.func @transform_3(%arg0: i32, %arg1: i32, %arg2: i32) -> (i32, i32) {
    %c0_i32 = arith.constant 0 : i32
    return %arg0, %arg1 : i32, i32
  }
}

module attributes {stable_mosaic.version = 11 : i64} {
  func.func @_head_proj_kernel(%arg0: i32, %arg1: i32, %arg2: i32, %arg3: i32, %arg4: memref<1x8x128xf32, #tpu.memory_space<vmem>>, %arg5: memref<1x128x8xbf16, #tpu.memory_space<vmem>>, %arg6: memref<1x1x8xf32, #tpu.memory_space<vmem>>, %arg7: memref<1x1x8x8xbf16, #tpu.memory_space<vmem>>, %arg8: memref<8x8xf32, #tpu.memory_space<vmem>>) attributes {dimension_semantics = [#tpu.dimension_semantics<parallel>, #tpu.dimension_semantics<parallel>, #tpu.dimension_semantics<parallel>, #tpu.dimension_semantics<arbitrary>], iteration_bounds = array<i64: 2, 8, 1, 1>, scalar_prefetch = 0 : i64, scratch_operands = 1 : i64, tpu.core_type = #tpu.core_type<tc>, window_params = [{transform_indices = @transform_0, window_bounds = array<i64: 1, 8, 128>}, {transform_indices = @transform_1, window_bounds = array<i64: 1, 128, 8>}, {transform_indices = @transform_2, window_bounds = array<i64: 1, 1, 8>}, {transform_indices = @transform_3, window_bounds = array<i64: 1, 1, 8, 8>}]} {
    %c0_i32 = arith.constant 0 : i32
    %0 = arith.cmpi eq, %arg3, %c0_i32 : i32
    %1 = arith.extui %0 : i1 to i32
    %c0_i32_0 = arith.constant 0 : i32
    %2 = arith.cmpi ne, %1, %c0_i32_0 : i32
    scf.if %2 {
      %cst_12 = arith.constant 0.000000e+00 : f32
      %15 = vector.broadcast %cst_12 : f32 to vector<8x8xf32>
      %c0_13 = arith.constant 0 : index
      %c0_14 = arith.constant 0 : index
      %16 = vector.load %arg8[%c0_13, %c0_14] : memref<8x8xf32, #tpu.memory_space<vmem>>, vector<8x8xf32>
      tpu.vector_store %arg8[%c0_13, %c0_14], %15 {strides = array<i32>} : memref<8x8xf32, #tpu.memory_space<vmem>>, vector<8x8xf32>,
    } else {
    }
    %c0 = arith.constant 0 : index
    %c0_1 = arith.constant 0 : index
    %3 = vector.load %arg8[%c0, %c0_1] : memref<8x8xf32, #tpu.memory_space<vmem>>, vector<8x8xf32>
    %c0_2 = arith.constant 0 : index
    %c0_3 = arith.constant 0 : index
    %c0_4 = arith.constant 0 : index
    %4 = vector.load %arg4[%c0_2, %c0_3, %c0_4] : memref<1x8x128xf32, #tpu.memory_space<vmem>>, vector<1x8x128xf32>
    %5 = vector.shape_cast %4 : vector<1x8x128xf32> to vector<8x128xf32>
    %6 = arith.truncf %5 : vector<8x128xf32> to vector<8x128xbf16>
    %c0_5 = arith.constant 0 : index
    %c0_6 = arith.constant 0 : index
    %c0_7 = arith.constant 0 : index
    %7 = vector.load %arg5[%c0_5, %c0_6, %c0_7] : memref<1x128x8xbf16, #tpu.memory_space<vmem>>, vector<1x128x8xbf16>
    %8 = vector.shape_cast %7 : vector<1x128x8xbf16> to vector<128x8xbf16>
    %cst = arith.constant dense<0.000000e+00> : vector<8x8xf32>
    %9 = tpu.matmul %6, %8, %cst {dimension_numbers = #tpu.dot_dimension_numbers<[1], [0], [0], [1], [0, 0, 1, 1], [], []>} : vector<8x128xbf16>, vector<128x8xbf16>, vector<8x8xf32> -> vector<8x8xf32>
    %10 = arith.addf %3, %9 : vector<8x8xf32>
    %c0_8 = arith.constant 0 : index
    %c0_9 = arith.constant 0 : index
    %11 = vector.load %arg8[%c0_8, %c0_9] : memref<8x8xf32, #tpu.memory_space<vmem>>, vector<8x8xf32>
    tpu.vector_store %arg8[%c0_8, %c0_9], %10 {strides = array<i32>} : memref<8x8xf32, #tpu.memory_space<vmem>>, vector<8x8xf32>,
    %c0_i32_10 = arith.constant 0 : i32
    %12 = arith.cmpi eq, %arg3, %c0_i32_10 : i32
    %13 = arith.extui %12 : i1 to i32
    %c0_i32_11 = arith.constant 0 : i32
    %14 = arith.cmpi ne, %13, %c0_i32_11 : i32
    scf.if %14 {
      %c0_12 = arith.constant 0 : index
      %c0_13 = arith.constant 0 : index
      %15 = vector.load %arg8[%c0_12, %c0_13] : memref<8x8xf32, #tpu.memory_space<vmem>>, vector<8x8xf32>
      %c0_14 = arith.constant 0 : index
      %c0_15 = arith.constant 0 : index
      %c0_16 = arith.constant 0 : index
      %16 = vector.load %arg6[%c0_14, %c0_15, %c0_16] : memref<1x1x8xf32, #tpu.memory_space<vmem>>, vector<1x1x8xf32>
      %17 = vector.shape_cast %16 : vector<1x1x8xf32> to vector<1x8xf32>
      %18 = vector.broadcast %17 : vector<1x8xf32> to vector<8x8xf32>
      %19 = arith.addf %15, %18 : vector<8x8xf32>
      %20 = arith.truncf %19 : vector<8x8xf32> to vector<8x8xbf16>
      %c0_17 = arith.constant 0 : index
      %c0_18 = arith.constant 0 : index
      %c0_19 = arith.constant 0 : index
      %c0_20 = arith.constant 0 : index
      %21 = vector.load %arg7[%c0_17, %c0_18, %c0_19, %c0_20] : memref<1x1x8x8xbf16, #tpu.memory_space<vmem>>, vector<1x1x8x8xbf16>
      %22 = vector.shape_cast %21 : vector<1x1x8x8xbf16> to vector<8x8xbf16>
      %23 = vector.shape_cast %20 : vector<8x8xbf16> to vector<1x1x8x8xbf16>
      tpu.vector_store %arg7[%c0_17, %c0_18, %c0_19, %c0_20], %23 {strides = array<i32>} : memref<1x1x8x8xbf16, #tpu.memory_space<vmem>>, vector<1x1x8x8xbf16>,
    } else {
    }
    return
  }
  func.func @transform_0(%arg0: i32, %arg1: i32, %arg2: i32, %arg3: i32) -> (i32, i32, i32) {
    %c0_i32 = arith.constant 0 : i32
    return %arg0, %arg2, %arg3 : i32, i32, i32
  }
  func.func @transform_1(%arg0: i32, %arg1: i32, %arg2: i32, %arg3: i32) -> (i32, i32, i32) {
    %c0_i32 = arith.constant 0 : i32
    %c0_i32_0 = arith.constant 0 : i32
    return %arg1, %arg3, %c0_i32 : i32, i32, i32
  }
  func.func @transform_2(%arg0: i32, %arg1: i32, %arg2: i32, %arg3: i32) -> (i32, i32, i32) {
    %c0_i32 = arith.constant 0 : i32
    %c0_i32_0 = arith.constant 0 : i32
    %c0_i32_1 = arith.constant 0 : i32
    return %arg1, %c0_i32, %c0_i32_0 : i32, i32, i32
  }
  func.func @transform_3(%arg0: i32, %arg1: i32, %arg2: i32, %arg3: i32) -> (i32, i32, i32, i32) {
    %c0_i32 = arith.constant 0 : i32
    %c0_i32_0 = arith.constant 0 : i32
    return %arg0, %arg1, %arg2, %c0_i32 : i32, i32, i32, i32
  }
}

module attributes {stable_mosaic.version = 11 : i64} {
  func.func @_flash_kernel(%arg0: i32, %arg1: i32, %arg2: i32, %arg3: i32, %arg4: memref<1x1x10x8xbf16, #tpu.memory_space<vmem>>, %arg5: memref<1x1x8x8xbf16, #tpu.memory_space<vmem>>, %arg6: memref<1x1x8x8xbf16, #tpu.memory_space<vmem>>, %arg7: memref<1x1x8xf32, #tpu.memory_space<vmem>>, %arg8: memref<1x1x10x8xbf16, #tpu.memory_space<vmem>>, %arg9: memref<10x1xf32, #tpu.memory_space<vmem>>, %arg10: memref<10x1xf32, #tpu.memory_space<vmem>>, %arg11: memref<10x8xf32, #tpu.memory_space<vmem>>) attributes {dimension_semantics = [#tpu.dimension_semantics<parallel>, #tpu.dimension_semantics<parallel>, #tpu.dimension_semantics<parallel>, #tpu.dimension_semantics<arbitrary>], iteration_bounds = array<i64: 2, 4, 1, 1>, scalar_prefetch = 0 : i64, scratch_operands = 3 : i64, tpu.core_type = #tpu.core_type<tc>, window_params = [{transform_indices = @transform_0, window_bounds = array<i64: 1, 1, 10, 8>}, {transform_indices = @transform_1, window_bounds = array<i64: 1, 1, 8, 8>}, {transform_indices = @transform_2, window_bounds = array<i64: 1, 1, 8, 8>}, {transform_indices = @transform_3, window_bounds = array<i64: 1, 1, 8>}, {transform_indices = @transform_4, window_bounds = array<i64: 1, 1, 10, 8>}]} {
    %c0_i32 = arith.constant 0 : i32
    %0 = arith.cmpi eq, %arg3, %c0_i32 : i32
    %1 = arith.extui %0 : i1 to i32
    %c0_i32_0 = arith.constant 0 : i32
    %2 = arith.cmpi ne, %1, %c0_i32_0 : i32
    scf.if %2 {
      %cst_33 = arith.constant -1.000000e+30 : f32
      %42 = vector.broadcast %cst_33 : f32 to vector<10x1xf32>
      %c0_34 = arith.constant 0 : index
      %c0_35 = arith.constant 0 : index
      %43 = vector.load %arg9[%c0_34, %c0_35] : memref<10x1xf32, #tpu.memory_space<vmem>>, vector<10x1xf32>
      tpu.vector_store %arg9[%c0_34, %c0_35], %42 {strides = array<i32>} : memref<10x1xf32, #tpu.memory_space<vmem>>, vector<10x1xf32>,
      %cst_36 = arith.constant 0.000000e+00 : f32
      %44 = vector.broadcast %cst_36 : f32 to vector<10x1xf32>
      %c0_37 = arith.constant 0 : index
      %c0_38 = arith.constant 0 : index
      %45 = vector.load %arg10[%c0_37, %c0_38] : memref<10x1xf32, #tpu.memory_space<vmem>>, vector<10x1xf32>
      tpu.vector_store %arg10[%c0_37, %c0_38], %44 {strides = array<i32>} : memref<10x1xf32, #tpu.memory_space<vmem>>, vector<10x1xf32>,
      %cst_39 = arith.constant 0.000000e+00 : f32
      %46 = vector.broadcast %cst_39 : f32 to vector<10x8xf32>
      %c0_40 = arith.constant 0 : index
      %c0_41 = arith.constant 0 : index
      %47 = vector.load %arg11[%c0_40, %c0_41] : memref<10x8xf32, #tpu.memory_space<vmem>>, vector<10x8xf32>
      tpu.vector_store %arg11[%c0_40, %c0_41], %46 {strides = array<i32>} : memref<10x8xf32, #tpu.memory_space<vmem>>, vector<10x8xf32>,
    } else {
    }
    %c0 = arith.constant 0 : index
    %c0_1 = arith.constant 0 : index
    %c0_2 = arith.constant 0 : index
    %c0_3 = arith.constant 0 : index
    %3 = vector.load %arg4[%c0, %c0_1, %c0_2, %c0_3] : memref<1x1x10x8xbf16, #tpu.memory_space<vmem>>, vector<1x1x10x8xbf16>
    %4 = vector.shape_cast %3 : vector<1x1x10x8xbf16> to vector<10x8xbf16>
    %c0_4 = arith.constant 0 : index
    %c0_5 = arith.constant 0 : index
    %c0_6 = arith.constant 0 : index
    %c0_7 = arith.constant 0 : index
    %5 = vector.load %arg5[%c0_4, %c0_5, %c0_6, %c0_7] : memref<1x1x8x8xbf16, #tpu.memory_space<vmem>>, vector<1x1x8x8xbf16>
    %6 = vector.shape_cast %5 : vector<1x1x8x8xbf16> to vector<8x8xbf16>
    %c0_8 = arith.constant 0 : index
    %c0_9 = arith.constant 0 : index
    %c0_10 = arith.constant 0 : index
    %c0_11 = arith.constant 0 : index
    %7 = vector.load %arg6[%c0_8, %c0_9, %c0_10, %c0_11] : memref<1x1x8x8xbf16, #tpu.memory_space<vmem>>, vector<1x1x8x8xbf16>
    %8 = vector.shape_cast %7 : vector<1x1x8x8xbf16> to vector<8x8xbf16>
    "tpu.trace_start"() <{level = 10 : i32, message = "qd,kd->qk"}> : () -> ()
    %cst = arith.constant dense<0.000000e+00> : vector<10x8xf32>
    %9 = tpu.matmul %4, %6, %cst {dimension_numbers = #tpu.dot_dimension_numbers<[1], [1], [0], [0], [0, 0, 1, 0], [], []>} : vector<10x8xbf16>, vector<8x8xbf16>, vector<10x8xf32> -> vector<10x8xf32>
    "tpu.trace_stop"() : () -> ()
    %cst_12 = arith.constant 0.353553385 : f32
    %10 = vector.broadcast %cst_12 : f32 to vector<10x8xf32>
    %11 = arith.mulf %9, %10 : vector<10x8xf32>
    %c0_13 = arith.constant 0 : index
    %c0_14 = arith.constant 0 : index
    %c0_15 = arith.constant 0 : index
    %12 = vector.load %arg7[%c0_13, %c0_14, %c0_15] : memref<1x1x8xf32, #tpu.memory_space<vmem>>, vector<1x1x8xf32>
    %13 = vector.shape_cast %12 : vector<1x1x8xf32> to vector<1x8xf32>
    %14 = vector.broadcast %13 : vector<1x8xf32> to vector<10x8xf32>
    %15 = arith.addf %11, %14 : vector<10x8xf32>
    %c0_16 = arith.constant 0 : index
    %c0_17 = arith.constant 0 : index
    %16 = vector.load %arg9[%c0_16, %c0_17] : memref<10x1xf32, #tpu.memory_space<vmem>>, vector<10x1xf32>
    %cst_18 = arith.constant dense<0xFF800000> : vector<10xf32>
    %17 = vector.multi_reduction <maximumf>, %15, %cst_18 [1] : vector<10x8xf32> to vector<10xf32>
    %18 = vector.shape_cast %17 : vector<10xf32> to vector<10x1xf32>
    %19 = arith.maximumf %16, %18 : vector<10x1xf32>
    %20 = arith.subf %16, %19 : vector<10x1xf32>
    %21 = math.exp %20 : vector<10x1xf32>
    %22 = vector.broadcast %19 : vector<10x1xf32> to vector<10x8xf32>
    %23 = arith.subf %15, %22 : vector<10x8xf32>
    %24 = math.exp %23 : vector<10x8xf32>
    %c0_19 = arith.constant 0 : index
    %c0_20 = arith.constant 0 : index
    %25 = vector.load %arg10[%c0_19, %c0_20] : memref<10x1xf32, #tpu.memory_space<vmem>>, vector<10x1xf32>
    %26 = arith.mulf %21, %25 : vector<10x1xf32>
    %cst_21 = arith.constant dense<0.000000e+00> : vector<10xf32>
    %27 = vector.multi_reduction <add>, %24, %cst_21 [1] : vector<10x8xf32> to vector<10xf32>
    %28 = vector.shape_cast %27 : vector<10xf32> to vector<10x1xf32>
    %29 = arith.addf %26, %28 : vector<10x1xf32>
    %c0_22 = arith.constant 0 : index
    %c0_23 = arith.constant 0 : index
    %30 = vector.load %arg10[%c0_22, %c0_23] : memref<10x1xf32, #tpu.memory_space<vmem>>, vector<10x1xf32>
    tpu.vector_store %arg10[%c0_22, %c0_23], %29 {strides = array<i32>} : memref<10x1xf32, #tpu.memory_space<vmem>>, vector<10x1xf32>,
    %c0_24 = arith.constant 0 : index
    %c0_25 = arith.constant 0 : index
    %31 = vector.load %arg11[%c0_24, %c0_25] : memref<10x8xf32, #tpu.memory_space<vmem>>, vector<10x8xf32>
    %32 = vector.broadcast %21 : vector<10x1xf32> to vector<10x8xf32>
    %33 = arith.mulf %32, %31 : vector<10x8xf32>
    %34 = arith.truncf %24 : vector<10x8xf32> to vector<10x8xbf16>
    %cst_26 = arith.constant dense<0.000000e+00> : vector<10x8xf32>
    %35 = tpu.matmul %34, %8, %cst_26 {dimension_numbers = #tpu.dot_dimension_numbers<[1], [0], [0], [1], [0, 0, 1, 1], [], []>} : vector<10x8xbf16>, vector<8x8xbf16>, vector<10x8xf32> -> vector<10x8xf32>
    %36 = arith.addf %33, %35 : vector<10x8xf32>
    %c0_27 = arith.constant 0 : index
    %c0_28 = arith.constant 0 : index
    %37 = vector.load %arg11[%c0_27, %c0_28] : memref<10x8xf32, #tpu.memory_space<vmem>>, vector<10x8xf32>
    tpu.vector_store %arg11[%c0_27, %c0_28], %36 {strides = array<i32>} : memref<10x8xf32, #tpu.memory_space<vmem>>, vector<10x8xf32>,
    %c0_29 = arith.constant 0 : index
    %c0_30 = arith.constant 0 : index
    %38 = vector.load %arg9[%c0_29, %c0_30] : memref<10x1xf32, #tpu.memory_space<vmem>>, vector<10x1xf32>
    tpu.vector_store %arg9[%c0_29, %c0_30], %19 {strides = array<i32>} : memref<10x1xf32, #tpu.memory_space<vmem>>, vector<10x1xf32>,
    %c0_i32_31 = arith.constant 0 : i32
    %39 = arith.cmpi eq, %arg3, %c0_i32_31 : i32
    %40 = arith.extui %39 : i1 to i32
    %c0_i32_32 = arith.constant 0 : i32
    %41 = arith.cmpi ne, %40, %c0_i32_32 : i32
    scf.if %41 {
      %c0_33 = arith.constant 0 : index
      %c0_34 = arith.constant 0 : index
      %42 = vector.load %arg11[%c0_33, %c0_34] : memref<10x8xf32, #tpu.memory_space<vmem>>, vector<10x8xf32>
      %c0_35 = arith.constant 0 : index
      %c0_36 = arith.constant 0 : index
      %43 = vector.load %arg10[%c0_35, %c0_36] : memref<10x1xf32, #tpu.memory_space<vmem>>, vector<10x1xf32>
      %44 = tpu.reciprocal %43 {approx = true} : vector<10x1xf32> -> vector<10x1xf32>
      %45 = vector.broadcast %44 : vector<10x1xf32> to vector<10x8xf32>
      %46 = arith.mulf %42, %45 : vector<10x8xf32>
      %47 = arith.truncf %46 : vector<10x8xf32> to vector<10x8xbf16>
      %c0_37 = arith.constant 0 : index
      %c0_38 = arith.constant 0 : index
      %c0_39 = arith.constant 0 : index
      %c0_40 = arith.constant 0 : index
      %48 = vector.load %arg8[%c0_37, %c0_38, %c0_39, %c0_40] : memref<1x1x10x8xbf16, #tpu.memory_space<vmem>>, vector<1x1x10x8xbf16>
      %49 = vector.shape_cast %48 : vector<1x1x10x8xbf16> to vector<10x8xbf16>
      %50 = vector.shape_cast %47 : vector<10x8xbf16> to vector<1x1x10x8xbf16>
      tpu.vector_store %arg8[%c0_37, %c0_38, %c0_39, %c0_40], %50 {strides = array<i32>} : memref<1x1x10x8xbf16, #tpu.memory_space<vmem>>, vector<1x1x10x8xbf16>,
    } else {
    }
    return
  }
  func.func @transform_0(%arg0: i32, %arg1: i32, %arg2: i32, %arg3: i32) -> (i32, i32, i32, i32) {
    %c0_i32 = arith.constant 0 : i32
    %0 = arith.addi %arg1, %c0_i32 : i32
    %c0_i32_0 = arith.constant 0 : i32
    %c0_i32_1 = arith.constant 0 : i32
    return %arg0, %0, %arg2, %c0_i32_0 : i32, i32, i32, i32
  }
  func.func @transform_1(%arg0: i32, %arg1: i32, %arg2: i32, %arg3: i32) -> (i32, i32, i32, i32) {
    %c0_i32 = arith.constant 0 : i32
    %0 = arith.addi %arg1, %c0_i32 : i32
    %c0_i32_0 = arith.constant 0 : i32
    %c0_i32_1 = arith.constant 0 : i32
    return %arg0, %0, %arg3, %c0_i32_0 : i32, i32, i32, i32
  }
  func.func @transform_2(%arg0: i32, %arg1: i32, %arg2: i32, %arg3: i32) -> (i32, i32, i32, i32) {
    %c4_i32 = arith.constant 4 : i32
    %0 = arith.addi %arg1, %c4_i32 : i32
    %c0_i32 = arith.constant 0 : i32
    %c0_i32_0 = arith.constant 0 : i32
    return %arg0, %0, %arg3, %c0_i32 : i32, i32, i32, i32
  }
  func.func @transform_3(%arg0: i32, %arg1: i32, %arg2: i32, %arg3: i32) -> (i32, i32, i32) {
    %c0_i32 = arith.constant 0 : i32
    %c0_i32_0 = arith.constant 0 : i32
    return %arg0, %c0_i32, %arg3 : i32, i32, i32
  }
  func.func @transform_4(%arg0: i32, %arg1: i32, %arg2: i32, %arg3: i32) -> (i32, i32, i32, i32) {
    %c0_i32 = arith.constant 0 : i32
    %c0_i32_0 = arith.constant 0 : i32
    return %arg0, %arg1, %arg2, %c0_i32 : i32, i32, i32, i32
  }
}

module attributes {stable_mosaic.version = 11 : i64} {
  func.func @_linear_kernel(%arg0: i32, %arg1: i32, %arg2: i32, %arg3: memref<20x128xf32, #tpu.memory_space<vmem>>, %arg4: memref<128x128xbf16, #tpu.memory_space<vmem>>, %arg5: memref<1x128xf32, #tpu.memory_space<vmem>>, %arg6: memref<20x128xbf16, #tpu.memory_space<vmem>>, %arg7: memref<20x128xf32, #tpu.memory_space<vmem>>) attributes {dimension_semantics = [#tpu.dimension_semantics<parallel>, #tpu.dimension_semantics<parallel>, #tpu.dimension_semantics<arbitrary>], iteration_bounds = array<i64: 1, 1, 1>, scalar_prefetch = 0 : i64, scratch_operands = 1 : i64, tpu.core_type = #tpu.core_type<tc>, window_params = [{transform_indices = @transform_0, window_bounds = array<i64: 20, 128>}, {transform_indices = @transform_1, window_bounds = array<i64: 128, 128>}, {transform_indices = @transform_2, window_bounds = array<i64: 1, 128>}, {transform_indices = @transform_3, window_bounds = array<i64: 20, 128>}]} {
    %c0_i32 = arith.constant 0 : i32
    %0 = arith.cmpi eq, %arg2, %c0_i32 : i32
    %1 = arith.extui %0 : i1 to i32
    %c0_i32_0 = arith.constant 0 : i32
    %2 = arith.cmpi ne, %1, %c0_i32_0 : i32
    scf.if %2 {
      %cst_10 = arith.constant 0.000000e+00 : f32
      %13 = vector.broadcast %cst_10 : f32 to vector<20x128xf32>
      %c0_11 = arith.constant 0 : index
      %c0_12 = arith.constant 0 : index
      %14 = vector.load %arg7[%c0_11, %c0_12] : memref<20x128xf32, #tpu.memory_space<vmem>>, vector<20x128xf32>
      tpu.vector_store %arg7[%c0_11, %c0_12], %13 {strides = array<i32>} : memref<20x128xf32, #tpu.memory_space<vmem>>, vector<20x128xf32>,
    } else {
    }
    %c0 = arith.constant 0 : index
    %c0_1 = arith.constant 0 : index
    %3 = vector.load %arg7[%c0, %c0_1] : memref<20x128xf32, #tpu.memory_space<vmem>>, vector<20x128xf32>
    %c0_2 = arith.constant 0 : index
    %c0_3 = arith.constant 0 : index
    %4 = vector.load %arg3[%c0_2, %c0_3] : memref<20x128xf32, #tpu.memory_space<vmem>>, vector<20x128xf32>
    %5 = arith.truncf %4 : vector<20x128xf32> to vector<20x128xbf16>
    %c0_4 = arith.constant 0 : index
    %c0_5 = arith.constant 0 : index
    %6 = vector.load %arg4[%c0_4, %c0_5] : memref<128x128xbf16, #tpu.memory_space<vmem>>, vector<128x128xbf16>
    %cst = arith.constant dense<0.000000e+00> : vector<20x128xf32>
    %7 = tpu.matmul %5, %6, %cst {dimension_numbers = #tpu.dot_dimension_numbers<[1], [0], [0], [1], [0, 0, 1, 1], [], []>} : vector<20x128xbf16>, vector<128x128xbf16>, vector<20x128xf32> -> vector<20x128xf32>
    %8 = arith.addf %3, %7 : vector<20x128xf32>
    %c0_6 = arith.constant 0 : index
    %c0_7 = arith.constant 0 : index
    %9 = vector.load %arg7[%c0_6, %c0_7] : memref<20x128xf32, #tpu.memory_space<vmem>>, vector<20x128xf32>
    tpu.vector_store %arg7[%c0_6, %c0_7], %8 {strides = array<i32>} : memref<20x128xf32, #tpu.memory_space<vmem>>, vector<20x128xf32>,
    %c0_i32_8 = arith.constant 0 : i32
    %10 = arith.cmpi eq, %arg2, %c0_i32_8 : i32
    %11 = arith.extui %10 : i1 to i32
    %c0_i32_9 = arith.constant 0 : i32
    %12 = arith.cmpi ne, %11, %c0_i32_9 : i32
    scf.if %12 {
      %c0_10 = arith.constant 0 : index
      %c0_11 = arith.constant 0 : index
      %13 = vector.load %arg7[%c0_10, %c0_11] : memref<20x128xf32, #tpu.memory_space<vmem>>, vector<20x128xf32>
      %c0_12 = arith.constant 0 : index
      %c0_13 = arith.constant 0 : index
      %14 = vector.load %arg5[%c0_12, %c0_13] : memref<1x128xf32, #tpu.memory_space<vmem>>, vector<1x128xf32>
      %15 = vector.broadcast %14 : vector<1x128xf32> to vector<20x128xf32>
      %16 = arith.addf %13, %15 : vector<20x128xf32>
      %cst_14 = arith.constant 0.000000e+00 : f32
      %17 = vector.broadcast %cst_14 : f32 to vector<20x128xf32>
      %18 = arith.maximumf %16, %17 : vector<20x128xf32>
      %19 = arith.truncf %18 : vector<20x128xf32> to vector<20x128xbf16>
      %c0_15 = arith.constant 0 : index
      %c0_16 = arith.constant 0 : index
      %20 = vector.load %arg6[%c0_15, %c0_16] : memref<20x128xbf16, #tpu.memory_space<vmem>>, vector<20x128xbf16>
      tpu.vector_store %arg6[%c0_15, %c0_16], %19 {strides = array<i32>} : memref<20x128xbf16, #tpu.memory_space<vmem>>, vector<20x128xbf16>,
    } else {
    }
    return
  }
  func.func @transform_0(%arg0: i32, %arg1: i32, %arg2: i32) -> (i32, i32) {
    %c0_i32 = arith.constant 0 : i32
    return %arg0, %arg2 : i32, i32
  }
  func.func @transform_1(%arg0: i32, %arg1: i32, %arg2: i32) -> (i32, i32) {
    %c0_i32 = arith.constant 0 : i32
    return %arg2, %arg1 : i32, i32
  }
  func.func @transform_2(%arg0: i32, %arg1: i32, %arg2: i32) -> (i32, i32) {
    %c0_i32 = arith.constant 0 : i32
    %c0_i32_0 = arith.constant 0 : i32
    return %c0_i32, %arg1 : i32, i32
  }
  func.func @transform_3(%arg0: i32, %arg1: i32, %arg2: i32) -> (i32, i32) {
    %c0_i32 = arith.constant 0 : i32
    return %arg0, %arg1 : i32, i32
  }
}

module attributes {stable_mosaic.version = 11 : i64} {
  func.func @_linear_kernel(%arg0: i32, %arg1: i32, %arg2: i32, %arg3: memref<20x128xbf16, #tpu.memory_space<vmem>>, %arg4: memref<128x128xbf16, #tpu.memory_space<vmem>>, %arg5: memref<1x128xf32, #tpu.memory_space<vmem>>, %arg6: memref<20x128xf32, #tpu.memory_space<vmem>>, %arg7: memref<20x128xf32, #tpu.memory_space<vmem>>, %arg8: memref<20x128xf32, #tpu.memory_space<vmem>>) attributes {dimension_semantics = [#tpu.dimension_semantics<parallel>, #tpu.dimension_semantics<parallel>, #tpu.dimension_semantics<arbitrary>], iteration_bounds = array<i64: 1, 1, 1>, scalar_prefetch = 0 : i64, scratch_operands = 1 : i64, tpu.core_type = #tpu.core_type<tc>, window_params = [{transform_indices = @transform_0, window_bounds = array<i64: 20, 128>}, {transform_indices = @transform_1, window_bounds = array<i64: 128, 128>}, {transform_indices = @transform_2, window_bounds = array<i64: 1, 128>}, {transform_indices = @transform_3, window_bounds = array<i64: 20, 128>}, {transform_indices = @transform_4, window_bounds = array<i64: 20, 128>}]} {
    %c0_i32 = arith.constant 0 : i32
    %0 = arith.cmpi eq, %arg2, %c0_i32 : i32
    %1 = arith.extui %0 : i1 to i32
    %c0_i32_0 = arith.constant 0 : i32
    %2 = arith.cmpi ne, %1, %c0_i32_0 : i32
    scf.if %2 {
      %cst_10 = arith.constant 0.000000e+00 : f32
      %12 = vector.broadcast %cst_10 : f32 to vector<20x128xf32>
      %c0_11 = arith.constant 0 : index
      %c0_12 = arith.constant 0 : index
      %13 = vector.load %arg8[%c0_11, %c0_12] : memref<20x128xf32, #tpu.memory_space<vmem>>, vector<20x128xf32>
      tpu.vector_store %arg8[%c0_11, %c0_12], %12 {strides = array<i32>} : memref<20x128xf32, #tpu.memory_space<vmem>>, vector<20x128xf32>,
    } else {
    }
    %c0 = arith.constant 0 : index
    %c0_1 = arith.constant 0 : index
    %3 = vector.load %arg8[%c0, %c0_1] : memref<20x128xf32, #tpu.memory_space<vmem>>, vector<20x128xf32>
    %c0_2 = arith.constant 0 : index
    %c0_3 = arith.constant 0 : index
    %4 = vector.load %arg3[%c0_2, %c0_3] : memref<20x128xbf16, #tpu.memory_space<vmem>>, vector<20x128xbf16>
    %c0_4 = arith.constant 0 : index
    %c0_5 = arith.constant 0 : index
    %5 = vector.load %arg4[%c0_4, %c0_5] : memref<128x128xbf16, #tpu.memory_space<vmem>>, vector<128x128xbf16>
    %cst = arith.constant dense<0.000000e+00> : vector<20x128xf32>
    %6 = tpu.matmul %4, %5, %cst {dimension_numbers = #tpu.dot_dimension_numbers<[1], [0], [0], [1], [0, 0, 1, 1], [], []>} : vector<20x128xbf16>, vector<128x128xbf16>, vector<20x128xf32> -> vector<20x128xf32>
    %7 = arith.addf %3, %6 : vector<20x128xf32>
    %c0_6 = arith.constant 0 : index
    %c0_7 = arith.constant 0 : index
    %8 = vector.load %arg8[%c0_6, %c0_7] : memref<20x128xf32, #tpu.memory_space<vmem>>, vector<20x128xf32>
    tpu.vector_store %arg8[%c0_6, %c0_7], %7 {strides = array<i32>} : memref<20x128xf32, #tpu.memory_space<vmem>>, vector<20x128xf32>,
    %c0_i32_8 = arith.constant 0 : i32
    %9 = arith.cmpi eq, %arg2, %c0_i32_8 : i32
    %10 = arith.extui %9 : i1 to i32
    %c0_i32_9 = arith.constant 0 : i32
    %11 = arith.cmpi ne, %10, %c0_i32_9 : i32
    scf.if %11 {
      %c0_10 = arith.constant 0 : index
      %c0_11 = arith.constant 0 : index
      %12 = vector.load %arg8[%c0_10, %c0_11] : memref<20x128xf32, #tpu.memory_space<vmem>>, vector<20x128xf32>
      %c0_12 = arith.constant 0 : index
      %c0_13 = arith.constant 0 : index
      %13 = vector.load %arg5[%c0_12, %c0_13] : memref<1x128xf32, #tpu.memory_space<vmem>>, vector<1x128xf32>
      %14 = vector.broadcast %13 : vector<1x128xf32> to vector<20x128xf32>
      %15 = arith.addf %12, %14 : vector<20x128xf32>
      %c0_14 = arith.constant 0 : index
      %c0_15 = arith.constant 0 : index
      %16 = vector.load %arg6[%c0_14, %c0_15] : memref<20x128xf32, #tpu.memory_space<vmem>>, vector<20x128xf32>
      %17 = arith.addf %15, %16 : vector<20x128xf32>
      %c0_16 = arith.constant 0 : index
      %c0_17 = arith.constant 0 : index
      %18 = vector.load %arg7[%c0_16, %c0_17] : memref<20x128xf32, #tpu.memory_space<vmem>>, vector<20x128xf32>
      tpu.vector_store %arg7[%c0_16, %c0_17], %17 {strides = array<i32>} : memref<20x128xf32, #tpu.memory_space<vmem>>, vector<20x128xf32>,
    } else {
    }
    return
  }
  func.func @transform_0(%arg0: i32, %arg1: i32, %arg2: i32) -> (i32, i32) {
    %c0_i32 = arith.constant 0 : i32
    return %arg0, %arg2 : i32, i32
  }
  func.func @transform_1(%arg0: i32, %arg1: i32, %arg2: i32) -> (i32, i32) {
    %c0_i32 = arith.constant 0 : i32
    return %arg2, %arg1 : i32, i32
  }
  func.func @transform_2(%arg0: i32, %arg1: i32, %arg2: i32) -> (i32, i32) {
    %c0_i32 = arith.constant 0 : i32
    %c0_i32_0 = arith.constant 0 : i32
    return %c0_i32, %arg1 : i32, i32
  }
  func.func @transform_3(%arg0: i32, %arg1: i32, %arg2: i32) -> (i32, i32) {
    %c0_i32 = arith.constant 0 : i32
    return %arg0, %arg1 : i32, i32
  }
  func.func @transform_4(%arg0: i32, %arg1: i32, %arg2: i32) -> (i32, i32) {
    %c0_i32 = arith.constant 0 : i32
    return %arg0, %arg1 : i32, i32
  }
}

module attributes {stable_mosaic.version = 11 : i64} {
  func.func @_linear_kernel(%arg0: i32, %arg1: i32, %arg2: i32, %arg3: memref<20x128xf32, #tpu.memory_space<vmem>>, %arg4: memref<128x128xbf16, #tpu.memory_space<vmem>>, %arg5: memref<1x128xf32, #tpu.memory_space<vmem>>, %arg6: memref<20x128xf32, #tpu.memory_space<vmem>>, %arg7: memref<20x128xf32, #tpu.memory_space<vmem>>) attributes {dimension_semantics = [#tpu.dimension_semantics<parallel>, #tpu.dimension_semantics<parallel>, #tpu.dimension_semantics<arbitrary>], iteration_bounds = array<i64: 1, 1, 1>, scalar_prefetch = 0 : i64, scratch_operands = 1 : i64, tpu.core_type = #tpu.core_type<tc>, window_params = [{transform_indices = @transform_0, window_bounds = array<i64: 20, 128>}, {transform_indices = @transform_1, window_bounds = array<i64: 128, 128>}, {transform_indices = @transform_2, window_bounds = array<i64: 1, 128>}, {transform_indices = @transform_3, window_bounds = array<i64: 20, 128>}]} {
    %c0_i32 = arith.constant 0 : i32
    %0 = arith.cmpi eq, %arg2, %c0_i32 : i32
    %1 = arith.extui %0 : i1 to i32
    %c0_i32_0 = arith.constant 0 : i32
    %2 = arith.cmpi ne, %1, %c0_i32_0 : i32
    scf.if %2 {
      %cst_10 = arith.constant 0.000000e+00 : f32
      %13 = vector.broadcast %cst_10 : f32 to vector<20x128xf32>
      %c0_11 = arith.constant 0 : index
      %c0_12 = arith.constant 0 : index
      %14 = vector.load %arg7[%c0_11, %c0_12] : memref<20x128xf32, #tpu.memory_space<vmem>>, vector<20x128xf32>
      tpu.vector_store %arg7[%c0_11, %c0_12], %13 {strides = array<i32>} : memref<20x128xf32, #tpu.memory_space<vmem>>, vector<20x128xf32>,
    } else {
    }
    %c0 = arith.constant 0 : index
    %c0_1 = arith.constant 0 : index
    %3 = vector.load %arg7[%c0, %c0_1] : memref<20x128xf32, #tpu.memory_space<vmem>>, vector<20x128xf32>
    %c0_2 = arith.constant 0 : index
    %c0_3 = arith.constant 0 : index
    %4 = vector.load %arg3[%c0_2, %c0_3] : memref<20x128xf32, #tpu.memory_space<vmem>>, vector<20x128xf32>
    %5 = arith.truncf %4 : vector<20x128xf32> to vector<20x128xbf16>
    %c0_4 = arith.constant 0 : index
    %c0_5 = arith.constant 0 : index
    %6 = vector.load %arg4[%c0_4, %c0_5] : memref<128x128xbf16, #tpu.memory_space<vmem>>, vector<128x128xbf16>
    %cst = arith.constant dense<0.000000e+00> : vector<20x128xf32>
    %7 = tpu.matmul %5, %6, %cst {dimension_numbers = #tpu.dot_dimension_numbers<[1], [0], [0], [1], [0, 0, 1, 1], [], []>} : vector<20x128xbf16>, vector<128x128xbf16>, vector<20x128xf32> -> vector<20x128xf32>
    %8 = arith.addf %3, %7 : vector<20x128xf32>
    %c0_6 = arith.constant 0 : index
    %c0_7 = arith.constant 0 : index
    %9 = vector.load %arg7[%c0_6, %c0_7] : memref<20x128xf32, #tpu.memory_space<vmem>>, vector<20x128xf32>
    tpu.vector_store %arg7[%c0_6, %c0_7], %8 {strides = array<i32>} : memref<20x128xf32, #tpu.memory_space<vmem>>, vector<20x128xf32>,
    %c0_i32_8 = arith.constant 0 : i32
    %10 = arith.cmpi eq, %arg2, %c0_i32_8 : i32
    %11 = arith.extui %10 : i1 to i32
    %c0_i32_9 = arith.constant 0 : i32
    %12 = arith.cmpi ne, %11, %c0_i32_9 : i32
    scf.if %12 {
      %c0_10 = arith.constant 0 : index
      %c0_11 = arith.constant 0 : index
      %13 = vector.load %arg7[%c0_10, %c0_11] : memref<20x128xf32, #tpu.memory_space<vmem>>, vector<20x128xf32>
      %c0_12 = arith.constant 0 : index
      %c0_13 = arith.constant 0 : index
      %14 = vector.load %arg5[%c0_12, %c0_13] : memref<1x128xf32, #tpu.memory_space<vmem>>, vector<1x128xf32>
      %15 = vector.broadcast %14 : vector<1x128xf32> to vector<20x128xf32>
      %16 = arith.addf %13, %15 : vector<20x128xf32>
      %c0_14 = arith.constant 0 : index
      %c0_15 = arith.constant 0 : index
      %17 = vector.load %arg6[%c0_14, %c0_15] : memref<20x128xf32, #tpu.memory_space<vmem>>, vector<20x128xf32>
      tpu.vector_store %arg6[%c0_14, %c0_15], %16 {strides = array<i32>} : memref<20x128xf32, #tpu.memory_space<vmem>>, vector<20x128xf32>,
    } else {
    }
    return
  }
  func.func @transform_0(%arg0: i32, %arg1: i32, %arg2: i32) -> (i32, i32) {
    %c0_i32 = arith.constant 0 : i32
    return %arg0, %arg2 : i32, i32
  }
  func.func @transform_1(%arg0: i32, %arg1: i32, %arg2: i32) -> (i32, i32) {
    %c0_i32 = arith.constant 0 : i32
    return %arg2, %arg1 : i32, i32
  }
  func.func @transform_2(%arg0: i32, %arg1: i32, %arg2: i32) -> (i32, i32) {
    %c0_i32 = arith.constant 0 : i32
    %c0_i32_0 = arith.constant 0 : i32
    return %c0_i32, %arg1 : i32, i32
  }
  func.func @transform_3(%arg0: i32, %arg1: i32, %arg2: i32) -> (i32, i32) {
    %c0_i32 = arith.constant 0 : i32
    return %arg0, %arg1 : i32, i32
  }
}

</mosaic_0001>

<bundles_post_ra>
// kernel: seq2seq_forward.56
= control target key start
LH: loop header
LB: loop body
LE: loop exit
PB: predicated region body
PF: predicated region fallthrough
CT: control target
= control target key end

     0   :  { %s758_s12 = smov 0   ;;  %s760_s13 = smov 0   ;;  %s825_s0 = inlined_call_operand.vmem [shape: f32[2,10,128], index: 0, kind: input, shape index: {}]   ;;  %s826_s1 = inlined_call_operand.vmem [shape: bf16[12,128,8], index: 1, kind: input, shape index: {}]   ;;  %s827_s2 = inlined_call_operand.vmem [shape: f32[12,1,8], index: 2, kind: input, shape index: {}]   ;;  %s828_s3 = inlined_call_operand.vmem [shape: bf16[2,12,10,8], index: 3, kind: output, shape index: {}]  }
   0x1   :  { %s762_s14 = smov 0   ;;  %s764_s15 = smov 0  }
   0x2   :  { %s766_s16 = smov 0  }
   0x3 LB: > { %s35_s17 = sadd.s32 1, %s726_s14  ;;  %s39_s18 = sadd.s32 1, %s730_s15  ;;  %s734_s16 = sphi %s766_s16, %s13_s16   ;;  %s730_s15 = sphi %s764_s15, %s832_s15   ;;  %s726_s14 = sphi %s762_s14, %s831_s14   ;;  %s722_s13 = sphi %s760_s13, %s830_s13   ;;  %s718_s12 = sphi %s758_s12, %s829_s12  }
   0x4   : > { %p37_p0 = scmp.ge.s32.totalorder %s35_s17, 12  ;;  %p592_p1 = scmp.ge.s32.totalorder %s734_s16, 1 }
   0x5   : > { %p204_p2 = scmp.lt.s32.totalorder %s734_s16, 25 }
   0x6   : > { %s834_s17 = smov (%p37_p0, %s35_s17), 0  ;;  %s836_s18 = smov (!%p37_p0, %s39_s18), %s730_s15 }
   0x7   : > { %p205_p3 = pnand %p592_p1, %p204_p2  ;;  %p41_p4 = scmp.ge.s32.totalorder %s836_s18, 2 }
   0x8   : > { %p269_p5 = scmp.lt.s32.totalorder (!%p205_p3), %s718_s12, 11  ;;  %p256_p6 = scmp.lt.s32.totalorder (!%p205_p3), %s722_s13, 1  ;;  %vm300_vm0 = vcmask (!%p205_p3), 64512   ;;  %v736_v0 = vmov (!%p205_p3), 0.0   ;;  %vm737_vm1 = vmmov (!%p205_p3), 0   ;;  %vm302_vm2 = vcmask (!%p205_p3), 58368  }
   0x9   : > { %s838_s18 = smov (%p41_p4, %s836_s18), 0  ;;  %208 = sbr.rel (%p205_p3) target bundleno = 280 (0x118), region = 32 }
   0xa   : > { %625 = vmatprep.subr.bf16.mxu0 (!%p205_p3), %v736_v0  ;;  %641 = vmatprep.mubr.msk.bf16.mxu0 (!%p205_p3), %vm737_vm1, %v736_v0  ;;  %301 = vst.msk [vmem:[#allocation2] sm:$0xff] (!%p205_p3), %vm300_vm0, %v736_v0  ;;  %vm442_vm3 = vcmask (!%p205_p3), 60416   ;;  %vm444_vm4 = vcmask (!%p205_p3), 57344  }
   0xb   : > { %303 = vst.msk [vmem:[#allocation2 + $0x8] sm:$0x3] (!%p205_p3), %vm302_vm2, %v736_v0 }
  0x10   : > { %s840_s12 = smov (!%p269_p5, %s718_s12), 11  ;;  %s842_s13 = smov (!%p256_p6, %s722_s13), 1 }
  0x11   : > { %s613_s19 = sshll.u32 %s840_s12, 6  ;;  %s597_s23 = sshll.u32 %s840_s12, 1  ;;  %v304_v12 = vld [vmem:[#allocation2] sm:$0xff] }
  0x12   : > { %s276_s22 = scalar_lea.vmem %s826_s1, %s613_s19  ;;  %s645_s24 = smul.u32 24, %s842_s13  ;;  %v305_v14 = vld [vmem:[#allocation2 + $0x8] sm:$0x3] }
  0x13   : > { %v688_v1 = vld [vmem:[%s276_s22] sm:$0xff]   ;;  %v689_v2 = vld [vmem:[%s276_s22 + $0x8] sm:$0xff]   ;;  %v690_v3 = vld [vmem:[%s276_s22 + $0x10] sm:$0xff]   ;;  %s612_s26 = sshll.u32 %s842_s13, 4  ;;  %s280_s5 = scalar_lea.vmem %s827_s2, %s840_s12 }
  0x14   : > { %626 = vmatpush3.bf16.msra.mxu0 %v688_v1  ;;  %s796_s25 = sadd.s32 %s645_s24, %s597_s23  ;;  %v691_v4 = vld [vmem:[%s276_s22 + $0x18] sm:$0xff]   ;;  %v692_v5 = vld [vmem:[%s276_s22 + $0x20] sm:$0xff]   ;;  %v693_v6 = vld [vmem:[%s276_s22 + $0x28] sm:$0xff]   ;;  %s266_s29 = scalar_lea.vmem %s825_s0, %s612_s26 }
  0x15   : > { %627 = vmatprep.subr.bf16.mxu0 %v736_v0  ;;  %v694_v7 = vld [vmem:[%s276_s22 + $0x30] sm:$0xff]   ;;  %v695_v8 = vld [vmem:[%s276_s22 + $0x38] sm:$0xff]   ;;  %v306_v9 = vld [vmem:[%s266_s29] sm:$0xff]  ;;  %s598_s6 = sshll.u32 %s796_s25, 2 }
  0x16   : > { %v307_v10 = vld [vmem:[%s266_s29 + $0x8] sm:$0x3]  ;;  %v607_v20 = vld [vmem:[%s280_s5] ss:$0 sm:$0xff]  ;;  %s293_s9 = scalar_lea.vmem %s828_s3, %s598_s6 }
  0x17   : > { %v308_v11 = vpack.c.bf16 %v307_v10, %v306_v9 }
  0x18   : > { %628 = vmatpush3.bf16.msra.mxu0 %v689_v2 }
  0x19   : > { %629 = vmatprep.subr.bf16.mxu0 %v736_v0 }
  0x1c   : > { %630 = vmatpush3.bf16.msra.mxu0 %v690_v3 }
  0x1d   : > { %631 = vmatprep.subr.bf16.mxu0 %v736_v0 }
  0x20   : > { %632 = vmatpush3.bf16.msra.mxu0 %v691_v4 }
  0x21   : > { %633 = vmatprep.subr.bf16.mxu0 %v736_v0 }
  0x24   : > { %634 = vmatpush3.bf16.msra.mxu0 %v692_v5 }
  0x25   : > { %635 = vmatprep.subr.bf16.mxu0 %v736_v0 }
  0x28   : > { %636 = vmatpush3.bf16.msra.mxu0 %v693_v6 }
  0x29   : > { %637 = vmatprep.subr.bf16.mxu0 %v736_v0 }
  0x2c   : > { %638 = vmatpush3.bf16.msra.mxu0 %v694_v7 }
  0x2d   : > { %639 = vmatprep.subr.bf16.mxu0 %v736_v0 }
  0x30   : > { %640 = vmatpush3.bf16.msra.mxu0 %v695_v8 }
  0x33   : > { %642 = vmatmul.mubr.bf16.vlgmr.msra.gmra.mrb[0].mxu0 %v308_v11 }
 0x106   : > { %v407_v13 = vpop.f32.mrb[0].mxu0 }
 0x107   : > { %v414_v15 = vadd.f32 %v407_v13, %v304_v12  ;;  %v643_v16 = vpop.f32.mrb[1].mxu0 }
 0x108   : > { %v410_v17 = vpop.f32.mrb[2].mxu0 }
 0x109   : > { %417 = vst.msk [vmem:[#allocation2] sm:$0xff] %vm300_vm0, %v414_v15  ;;  %v415_v18 = vadd.f32 %v410_v17, %v305_v14  ;;  %v644_v19 = vpop.f32.mrb[3].mxu0 }
 0x10b   : > { %419 = vst.msk [vmem:[#allocation2 + $0x8] sm:$0x3] %vm302_vm2, %v415_v18 }
 0x110   : > { %v423_v21 = vld [vmem:[#allocation2] sm:$0xff] }
 0x111   : > { %v432_v22 = vadd.f32 %v607_v20, %v423_v21 }
 0x112   : > { %v424_v23 = vld [vmem:[#allocation2 + $0x8] sm:$0x3] }
 0x113   : > { %v614_v24 = vpack.c.bf16 %v432_v22, %v432_v22  ;;  %v433_v25 = vadd.f32 %v607_v20, %v424_v23 }
 0x115   : > { %443 = vst.msk [vmem:[%s293_s9] sm:$0xf] %vm442_vm3, %v614_v24  ;;  %v615_v26 = vpack.c.bf16 %v433_v25, %v433_v25 }
 0x117   : > { %445 = vst.msk [vmem:[%s293_s9 + $0x4] sm:$0x1] %vm444_vm4, %v615_v26 }
 0x118 PF: > { %s13_s16 = sadd.s32 1, %s734_s16   ;;  %s829_s12 = smov %s726_s14 }
 0x119   : > { %p10_p7 = scmp.ge.s32.totalorder %s13_s16, 26   ;;  %s830_s13 = smov %s730_s15 }
 0x11a   : > { %s831_s14 = smov %s834_s17  ;;  %s832_s15 = smov %s838_s18 }
 0x11b   :  { %12 = sbr.rel (!%p10_p7) target bundleno = 3 (0x3), region = 76 }

// kernel: seq2seq_forward.58
= control target key start
LH: loop header
LB: loop body
LE: loop exit
PB: predicated region body
PF: predicated region fallthrough
CT: control target
= control target key end

     0   :  { %s756_s15 = smov 0   ;;  %s758_s16 = smov 0   ;;  %s830_s0 = inlined_call_operand.vmem [shape: bf16[2,4,10,8], index: 0, kind: input, shape index: {}]   ;;  %s831_s1 = inlined_call_operand.vmem [shape: bf16[4,8,128], index: 1, kind: input, shape index: {}]   ;;  %s832_s2 = inlined_call_operand.vmem [shape: f32[1,128], index: 2, kind: input, shape index: {}]   ;;  %s833_s3 = inlined_call_operand.vmem [shape: f32[2,10,128], index: 3, kind: input, shape index: {}]   ;;  %s834_s4 = inlined_call_operand.vmem [shape: f32[2,10,128], index: 4, kind: output, shape index: {}]  }
   0x1   :  { %s760_s17 = smov 0   ;;  %s762_s18 = smov 0  }
   0x2   :  { %s764_s19 = smov 0  }
   0x3 LB: > { %s29_s20 = sadd.s32 1, %s718_s17  ;;  %s40_s21 = sadd.s32 1, %s722_s18  ;;  %s726_s19 = sphi %s764_s19, %s14_s19   ;;  %s722_s18 = sphi %s762_s18, %s838_s18   ;;  %s718_s17 = sphi %s760_s17, %s837_s17   ;;  %s714_s16 = sphi %s758_s16, %s836_s16   ;;  %s710_s15 = sphi %s756_s15, %s835_s15  }
   0x4   : > { %p30_p0 = scmp.ge.s32.totalorder %s29_s20, 4  ;;  %p618_p1 = scmp.ge.s32.totalorder %s726_s19, 1 }
   0x5   : > { %p249_p2 = scmp.lt.s32.totalorder %s726_s19, 9 }
   0x6   : > { %s840_s20 = smov (%p30_p0, %s29_s20), 0  ;;  %s842_s21 = smov (!%p30_p0, %s40_s21), %s722_s18 }
   0x7   : > { %p250_p3 = pnand %p618_p1, %p249_p2  ;;  %p42_p4 = scmp.ge.s32.totalorder %s842_s21, 2 }
   0x8   : > { %p313_p5 = scmp.lt.s32.totalorder (!%p250_p3), %s714_s16, 1  ;;  %p315_p6 = scmp.lt.s32.totalorder (!%p250_p3), %s710_s15, 3 }
   0x9   : > { %s844_s21 = smov (%p42_p4, %s842_s21), 0  ;;  %253 = sbr.rel (%p250_p3) target bundleno = 257 (0x101), region = 36 }
   0xa   : > { %p627_p7 = scmp.ne.s32.totalorder (!%p250_p3), %s710_s15, 0 }
  0x10   : > { %s846_s16 = smov (!%p313_p5, %s714_s16), 1  ;;  %366 = sbr.rel (%p627_p7) target bundleno = 23 (0x17), region = 40 }
  0x11   : > { %s316_s22 = scalar_select %p315_p6, %s710_s15, 3 }
  0x12   : > { %s620_s23 = sshll.u32 %s846_s16, 3  ;;  %s634_s24 = sshll.u32 %s846_s16, 4  ;;  %v728_v0 = vmov (!%p627_p7), 0.0  }
  0x13   : > { %s619_s25 = sshll.u32 %s316_s22, 1  ;;  %s622_s26 = sshll.u32 %s316_s22, 2  ;;  %367 = vst [vmem:[#allocation2] sm:$0xff] (!%p627_p7), %v728_v0  ;;  %368 = vst [vmem:[#allocation2 + $0x8] sm:$0x3] (!%p627_p7), %v728_v0 }
  0x14   : > { %s322_s27 = sadd.s32 %s620_s23, %s619_s25  ;;  %s332_s30 = scalar_lea.vmem %s831_s1, %s622_s26 }
  0x15   : > { %s621_s5 = sshll.u32 %s322_s27, 2  ;;  %s796_s8 = scalar_lea.vmem %s833_s3, %s634_s24 }
  0x16   : > { %s324_s11 = scalar_lea.vmem %s830_s0, %s621_s5  ;;  %s804_s14 = scalar_lea.vmem %s834_s4, %s634_s24 }
  0x17 PF: > { %v373_v1 = vld [vmem:[%s332_s30] sm:$0xf]  ;;  %vm383_vm0 = vcmask 1043456   ;;  %v729_v2 = vmov 0.0   ;;  %vm730_vm1 = vmmov 0   ;;  %vm379_vm2 = vcmask 64512  }
  0x18   : > { %638 = vmatprep.subr.bf16.mxu0 %v729_v2  ;;  %v385_v3 = vsel %vm383_vm0, %v373_v1, 0  ;;  %640 = vmatprep.mubr.msk.bf16.mxu0 %vm730_vm1, %v729_v2  ;;  %v687_v4 = vld [vmem:[%s324_s11] sm:$0x1f]   ;;  %p630_p8 = scmp.ne.s32.totalorder %s710_s15, 3 }
  0x19   : > { %639 = vmatpush3.bf16.msra.mxu0 %v385_v3  ;;  %v631_v14 = vld [vmem:[%s832_s2] ss:$0 sm:$0xff] (!%p630_p8)  ;;  %v448_v18 = vld [vmem:[%s796_s8 + $0x8] sm:$0x3] (!%p630_p8) }
  0x1a   : > { %v369_v5 = vld [vmem:[#allocation2] sm:$0xff]  ;;  %v370_v7 = vld [vmem:[#allocation2 + $0x8] sm:$0x3] }
  0x1b   : > { %v447_v15 = vld [vmem:[%s796_s8] sm:$0xff] (!%p630_p8) }
  0x1c   : > { %641 = vmatmul.mubr.msk.bf16.vlgmr.msra.gmra.mrb[0].mxu0 %vm379_vm2, %v687_v4 }
  0xee   : > { %435 = sbr.rel (%p630_p8) target bundleno = 257 (0x101), region = 44 }
  0xef   : > { %v421_v6 = vpop.f32.mrb[0].mxu0 }
  0xf0   : > { %v428_v8 = vadd.f32 %v421_v6, %v369_v5  ;;  %v642_v9 = vpop.f32.mrb[1].mxu0 }
  0xf1   : > { %v424_v10 = vpop.f32.mrb[2].mxu0 }
  0xf2   : > { %430 = vst [vmem:[#allocation2] sm:$0xff] %v428_v8  ;;  %v429_v11 = vadd.f32 %v424_v10, %v370_v7  ;;  %v643_v12 = vpop.f32.mrb[3].mxu0 }
  0xf4   : > { %431 = vst [vmem:[#allocation2 + $0x8] sm:$0x3] %v429_v11 }
  0xf9   : > { %v436_v13 = vld [vmem:[#allocation2] sm:$0xff] }
  0xfa   : > { %v445_v16 = vadd.f32 %v631_v14, %v436_v13 }
  0xfb   : > { %v437_v17 = vld [vmem:[#allocation2 + $0x8] sm:$0x3] }
  0xfc   : > { %v446_v19 = vadd.f32 %v631_v14, %v437_v17  ;;  %v449_v20 = vadd.f32 %v447_v15, %v445_v16 }
  0xfe   : > { %v450_v21 = vadd.f32 %v448_v18, %v446_v19  ;;  %451 = vst [vmem:[%s804_s14] sm:$0xff] %v449_v20 }
 0x100   : > { %452 = vst [vmem:[%s804_s14 + $0x8] sm:$0x3] %v450_v21 }
 0x101 PF: > { %s14_s19 = sadd.s32 1, %s726_s19   ;;  %s835_s15 = smov %s718_s17 }
 0x102   : > { %p11_p9 = scmp.ge.s32.totalorder %s14_s19, 10   ;;  %s836_s16 = smov %s722_s18 }
 0x103   : > { %s837_s17 = smov %s840_s20  ;;  %s838_s18 = smov %s844_s21 }
 0x104   :  { %13 = sbr.rel (!%p11_p9) target bundleno = 3 (0x3), region = 83 }

// kernel: seq2seq_forward.57
= control target key start
LH: loop header
LB: loop body
LE: loop exit
PB: predicated region body
PF: predicated region fallthrough
CT: control target
= control target key end

     0   :  { %s1101_s18 = smov 0   ;;  %s1103_s19 = smov 0   ;;  %s1204_s0 = inlined_call_operand.vmem [shape: bf16[2,12,10,8], index: 0, kind: input, shape index: {}, may-alias: {0,1,2}]   ;;  %s1205_s1 = inlined_call_operand.vmem [shape: bf16[2,12,10,8], index: 1, kind: input, shape index: {}, may-alias: {0,1,2}]   ;;  %s1206_s2 = inlined_call_operand.vmem [shape: bf16[2,12,10,8], index: 2, kind: input, shape index: {}, may-alias: {0,1,2}]   ;;  %s1207_s3 = inlined_call_operand.vmem [shape: f32[10,10], index: 3, kind: input, shape index: {}]   ;;  %s1208_s4 = inlined_call_operand.vmem [shape: f32[2,1,10], index: 4, kind: input, shape index: {}]   ;;  %s1209_s5 = inlined_call_operand.vmem [shape: bf16[2,4,10,8], index: 5, kind: output, shape index: {}]  }
   0x1   :  { %s1105_s20 = smov 0   ;;  %s1107_s21 = smov 0  }
   0x2   :  { %s1109_s22 = smov 0  }
   0x3 LB: > { %s37_s23 = sadd.s32 1, %s1057_s20  ;;  %s41_s24 = sadd.s32 1, %s1061_s21  ;;  %s1065_s22 = sphi %s1109_s22, %s15_s22   ;;  %s1061_s21 = sphi %s1107_s21, %s1213_s21   ;;  %s1057_s20 = sphi %s1105_s20, %s1212_s20   ;;  %s1053_s19 = sphi %s1103_s19, %s1211_s19   ;;  %s1049_s18 = sphi %s1101_s18, %s1210_s18  }
   0x4   : > { %p39_p0 = scmp.ge.s32.totalorder %s37_s23, 4  ;;  %p927_p1 = scmp.ge.s32.totalorder %s1065_s22, 1 }
   0x5   : > { %p313_p2 = scmp.lt.s32.totalorder %s1065_s22, 9 }
   0x6   : > { %s1215_s23 = smov (%p39_p0, %s37_s23), 0  ;;  %s1217_s24 = smov (!%p39_p0, %s41_s24), %s1061_s21 }
   0x7   : > { %p314_p3 = pnand %p927_p1, %p313_p2  ;;  %p43_p4 = scmp.ge.s32.totalorder %s1217_s24, 2 }
   0x8   : > { %vm487_vm0 = vcmask (!%p314_p3), 58368   ;;  %p400_p5 = scmp.lt.s32.totalorder (!%p314_p3), %s1053_s19, 1  ;;  %s413_s25 = sadd.s32 (!%p314_p3), 4, %s1049_s18  ;;  %vm485_vm1 = vcmask (!%p314_p3), 64512   ;;  %v1067_v0 = vmov (!%p314_p3), 0.0   ;;  %vm1068_vm2 = vmmov (!%p314_p3), 0  }
   0x9   : > { %s1219_s24 = smov (%p43_p4, %s1217_s24), 0  ;;  %317 = sbr.rel (%p314_p3) target bundleno = 838 (0x346), region = 40 }
   0xa   : > { %488 = vst.msk [vmem:[#allocation4 + $0x8] sm:$0x3] (!%p314_p3), %vm487_vm0, %v1067_v0  ;;  %953 = vmatprep.subr.bf16.mxu0 (!%p314_p3), %v1067_v0  ;;  %p417_p6 = scmp.lt.s32.totalorder (!%p314_p3), %s413_s25, 11  ;;  %955 = vmatprep.mubr.msk.bf16.mxu0 (!%p314_p3), %vm1068_vm2, %v1067_v0  ;;  %p402_p7 = scmp.lt.s32.totalorder (!%p314_p3), %s1049_s18, 11  ;;  %vm479_vm3 = vcmask (!%p314_p3), 7168   ;;  %v555_v6 = vld [vmem:[%s1207_s3] sm:$0xff] (!%p314_p3) }
   0xb   : > { %486 = vst.msk [vmem:[#allocation4] sm:$0xff] (!%p314_p3), %vm485_vm1, %v1067_v0  ;;  %959 = vmatprep.subr.bf16.mxu1 (!%p314_p3), %v1067_v0  ;;  %961 = vmatprep.mubr.msk.bf16.mxu1 (!%p314_p3), %vm1068_vm2, %v1067_v0  ;;  %v1069_v4 = vmov (!%p314_p3), -1e+30   ;;  %v556_v10 = vld [vmem:[%s1207_s3 + $0x8] sm:$0x3] (!%p314_p3)  ;;  %vm570_vm4 = vcmask (!%p314_p3), 80896  }
   0xc   : > { %480 = vst.msk [vmem:[#allocation2] sm:$0xff] (!%p314_p3), %vm479_vm3, %v1069_v4  ;;  %483 = vst.msk [vmem:[#allocation3] sm:$0xff] (!%p314_p3), %vm479_vm3, %v1067_v0  ;;  %vm574_vm5 = vcmask (!%p314_p3), 74752   ;;  %vm481_vm6 = vcmask (!%p314_p3), 1024   ;;  %v1070_v20 = vmov (!%p314_p3), 0   ;;  %s429_s30 = sadd.s32 (!%p314_p3), 8, %s1049_s18 }
   0xd   : > { %482 = vst.msk [vmem:[#allocation2 + $0x8] sm:$0x3] (!%p314_p3), %vm481_vm6, %v1069_v4  ;;  %484 = vst.msk [vmem:[#allocation3 + $0x8] sm:$0x3] (!%p314_p3), %vm481_vm6, %v1067_v0  ;;  %1010 = vset.pattern.permute.xlu1 (!%p314_p3), %v1070_v20  ;;  %1011 = vset.pattern.permute.xlu0 (!%p314_p3), %v1070_v20  ;;  %p433_p8 = scmp.lt.s32.totalorder (!%p314_p3), %s429_s30, 11  ;;  %vm641_vm7 = vcmask (!%p314_p3), 1044480  }
   0xe   : > { %p463_p9 = scmp.lt.s32.totalorder (!%p314_p3), %s1049_s18, 3  ;;  %vm722_vm8 = vcmask (!%p314_p3), 60416   ;;  %vm724_vm9 = vcmask (!%p314_p3), 57344  }
  0x10   : > { %s1221_s19 = smov (!%p400_p5, %s1053_s19), 1  ;;  %s1223_s25 = smov (!%p417_p6, %s413_s25), 11 }
  0x11   : > { %s1139_s26 = smul.u32 24, %s1221_s19  ;;  %s930_s27 = sshll.u32 %s1223_s25, 1  ;;  %v619_v60 = vld [vmem:[#allocation4 + $0x8] sm:$0x3] }
  0x12   : > { %s403_s8 = scalar_select %p402_p7, %s1049_s18, 11  ;;  %v618_v58 = vld [vmem:[#allocation4] sm:$0xff] }
  0x13   : > { %s424_s28 = sadd.s32 %s1139_s26, %s930_s27  ;;  %s459_s17 = scalar_lea.vmem %s1208_s4, %s1221_s19  ;;  %v568_v21 = vld [vmem:[#allocation2] sm:$0xff]  ;;  %v602_v46 = vld [vmem:[#allocation3] sm:$0xff] }
  0x14   : > { %s931_s29 = sshll.u32 %s424_s28, 2  ;;  %s928_s9 = sshll.u32 %s403_s8, 1  ;;  %v940_v11 = vld [vmem:[%s459_s17] ss:$0 sm:$0xff]  ;;  %v569_v24 = vld [vmem:[#allocation2 + $0x8] sm:$0x3] }
  0x15   : > { %s426_s7 = scalar_lea.vmem %s1205_s1, %s931_s29  ;;  %s409_s10 = sadd.s32 %s1139_s26, %s928_s9  ;;  %v603_v49 = vld [vmem:[#allocation3 + $0x8] sm:$0x3] }
  0x16   : > { %v1012_v1 = vld [vmem:[%s426_s7] sm:$0x1f]   ;;  %s929_s11 = sshll.u32 %s409_s10, 2  ;;  %s1225_s30 = smov (!%p433_p8, %s429_s30), 11 }
  0x17   : > { %v510_v2 = vsel %vm485_vm1, %v1012_v1, 0  ;;  %s411_s14 = scalar_lea.vmem %s1204_s0, %s929_s11  ;;  %s932_s6 = sshll.u32 %s1225_s30, 1 }
  0x18   : > { %954 = vmatpush3.bf16.xpose.msra.mxu0 %v510_v2  ;;  %v1013_v3 = vld [vmem:[%s411_s14] sm:$0x1f]   ;;  %s440_s7 = sadd.s32 %s1139_s26, %s932_s6  ;;  %s1227_s18 = smov (!%p463_p9, %s1049_s18), 3 }
  0x19   : > { %s933_s8 = sshll.u32 %s440_s7, 2  ;;  %s934_s26 = sshll.u32 %s1227_s18, 1 }
  0x1a   : > { %s442_s11 = scalar_lea.vmem %s1206_s2, %s933_s8  ;;  %s935_s12 = sshll.u32 %s1221_s19, 3 }
  0x1b   : > { %v1014_v29 = vld [vmem:[%s442_s11] sm:$0x1f]   ;;  %s470_s13 = sadd.s32 %s935_s12, %s934_s26 }
  0x1c   : > { %v643_v30 = vsel %vm641_vm7, %v1014_v29, 0  ;;  %s936_s14 = sshll.u32 %s470_s13, 2 }
  0x1d   : > { %960 = vmatpush3.bf16.msra.mxu1 %v643_v30  ;;  %s472_s17 = scalar_lea.vmem %s1209_s5, %s936_s14 }
  0x1f   : > { %956 = vmatmul.mubr.msk.bf16.vlgmr.msra.gmra.mrb[0].mxu0 %vm485_vm1, %v1013_v3 }
  0xf2   : > { %v546_v5 = vpop.f32.mrb[0].mxu0 }
  0xf3   : > { %v553_v7 = vmul.f32 0.35355338, %v546_v5  ;;  %v957_v8 = vpop.f32.mrb[1].mxu0 }
  0xf4   : > { %v549_v9 = vpop.f32.mrb[2].mxu0 }
  0xf5   : > { %v557_v12 = vadd.f32 %v555_v6, %v553_v7  ;;  %v554_v13 = vmul.f32 0.35355338, %v549_v9  ;;  %v958_v14 = vpop.f32.mrb[3].mxu0 }
  0xf7   : > { %v558_v15 = vadd.f32 %v556_v10, %v554_v13  ;;  %v566_v16 = vadd.f32 %v940_v11, %v557_v12 }
  0xf9   : > { %v571_v17 = vsel %vm570_vm4, %v566_v16, -inf  ;;  %v567_v18 = vadd.f32 %v940_v11, %v558_v15 }
  0xfa   : > { %572 = vmax.xlane.f32.xlu0 %v571_v17 }
  0xfb   : > { %v575_v19 = vsel %vm574_vm5, %v567_v18, -inf }
  0xfe   : > { %576 = vmax.xlane.f32.xlu0 %v575_v19 }
 0x187   : > { %v573_v22 = vpop.xlane.xlu0 %572 }
 0x188   : > { %v578_v23 = vmax.f32 %v568_v21, %v573_v22 }
 0x18a   : > { %v580_v25 = vsub.f32 %v568_v21, %v578_v23  ;;  %691 = vst.msk [vmem:[#allocation2] sm:$0xff] %vm479_vm3, %v578_v23  ;;  %588 = vperm.xlu1 %1010, %v578_v23  }
 0x18b   : > { %v577_v26 = vpop.xlane.xlu0 %576 }
 0x18c   : > { %v579_v27 = vmax.f32 %v569_v24, %v577_v26  ;;  %v582_v43 = vmul.f32 1.442695, %v580_v25 }
 0x18e   : > { %v581_v28 = vsub.f32 %v569_v24, %v579_v27  ;;  %692 = vst.msk [vmem:[#allocation2 + $0x8] sm:$0x3] %vm481_vm6, %v579_v27  ;;  %593 = vperm.xlu1 %1010, %v579_v27  }
 0x190   : > { %v584_v42 = vmul.f32 1.442695, %v581_v28 }
 0x209   : > { %v589_v31 = vpop.permute.xlu1 %588 }
 0x20a   : > { %v596_v32 = vsub.f32 %v566_v16, %v589_v31 }
 0x20c   : > { %v598_v33 = vmul.f32 1.442695, %v596_v32 }
 0x20d   : > { %v594_v34 = vpop.permute.xlu1 %593 }
 0x20e   : > { %1015 = vpow2.f32 %v598_v33  ;;  %v597_v35 = vsub.f32 %v567_v18, %v594_v34 }
 0x210   : > { %v600_v36 = vmul.f32 1.442695, %v597_v35 }
 0x212   : > { %1017 = vpow2.f32 %v600_v36 }
 0x213   : > { %1019 = vpow2.f32 %v584_v42 }
 0x214   : > { %1021 = vpow2.f32 %v582_v43 }
 0x218   : > { %v1016_v37 = vpop.eup %1015 }
 0x219   : > { %v606_v38 = vsel %vm570_vm4, %v1016_v37, 0.0 }
 0x21a   : > { %607 = vadd.xlane.f32.xlu0 %v606_v38 }
 0x21c   : > { %v1018_v39 = vpop.eup %1017 }
 0x21d   : > { %v609_v40 = vsel %vm574_vm5, %v1018_v39, 0.0  ;;  %v632_v41 = vpack.c.bf16 %v1018_v39, %v1016_v37  ;;  %v1020_v44 = vpop.eup %1019 }
 0x21e   : > { %610 = vadd.xlane.f32.xlu1 %v609_v40  ;;  %v1022_v45 = vpop.eup %1021  ;;  %v605_v51 = vmul.f32 %v1020_v44, %v603_v49 }
 0x21f   : > { %962 = vmatmul.mubr.msk.bf16.vlgmr.msra.gmra.mrb[0].mxu1 %vm570_vm4, %v632_v41  ;;  %v604_v47 = vmul.f32 %v1022_v45, %v602_v46 }
 0x22f   : > { %627 = vperm.xlu1 %1010, %v1020_v44  }
 0x230   : > { %622 = vperm.xlu0 %1011, %v1022_v45  }
 0x2a7   : > { %v608_v48 = vpop.xlane.xlu0 %607 }
 0x2a8   : > { %v612_v50 = vadd.f32 %v608_v48, %v604_v47 }
 0x2aa   : > { %615 = vst.msk [vmem:[#allocation3] sm:$0xff] %vm479_vm3, %v612_v50 }
 0x2ab   : > { %v611_v52 = vpop.xlane.xlu1 %610 }
 0x2ac   : > { %v613_v53 = vadd.f32 %v611_v52, %v605_v51 }
 0x2ae   : > { %617 = vst.msk [vmem:[#allocation3 + $0x8] sm:$0x3] %vm481_vm6, %v613_v53 }
 0x2af   : > { %v623_v59 = vpop.permute.xlu0 %622  ;;  %v628_v61 = vpop.permute.xlu1 %627 }
 0x2b0   : > { %v630_v62 = vmul.f32 %v623_v59, %v618_v58  ;;  %v631_v0 = vmul.f32 %v628_v61, %v619_v60 }
 0x2b1   : > { %v698_v54 = vld [vmem:[#allocation3] sm:$0xff] }
 0x2b2   : > { %1023 = vrcp.f32 %v698_v54 }
 0x2b5   : > { %v699_v55 = vld [vmem:[#allocation3 + $0x8] sm:$0x3] }
 0x2b6   : > { %1025 = vrcp.f32 %v699_v55 }
 0x2bc   : > { %v1024_v56 = vpop.eup %1023 }
 0x2bd   : > { %704 = vperm.xlu0 %1011, %v1024_v56  }
 0x2c0   : > { %v1026_v57 = vpop.eup %1025 }
 0x2c1   : > { %709 = vperm.xlu0 %1011, %v1026_v57  }
 0x2f2   : > { %v679_v63 = vpop.f32.mrb[0].mxu1 }
 0x2f3   : > { %v686_v1 = vadd.f32 %v679_v63, %v630_v62  ;;  %v963_v2 = vpop.f32.mrb[1].mxu1 }
 0x2f4   : > { %v682_v3 = vpop.f32.mrb[2].mxu1 }
 0x2f5   : > { %688 = vst.msk [vmem:[#allocation4] sm:$0xff] %vm485_vm1, %v686_v1  ;;  %v687_v4 = vadd.f32 %v682_v3, %v631_v0  ;;  %v964_v5 = vpop.f32.mrb[3].mxu1 }
 0x2f7   : > { %690 = vst.msk [vmem:[#allocation4 + $0x8] sm:$0x3] %vm487_vm0, %v687_v4 }
 0x2fc   : > { %v696_v6 = vld [vmem:[#allocation4] sm:$0xff] }
 0x2fe   : > { %v697_v10 = vld [vmem:[#allocation4 + $0x8] sm:$0x3] }
 0x33c   : > { %v705_v7 = vpop.permute.xlu0 %704 }
 0x33d   : > { %v712_v8 = vmul.f32 %v705_v7, %v696_v6 }
 0x33f   : > { %v947_v9 = vpack.c.bf16 %v712_v8, %v712_v8 }
 0x340   : > { %v710_v11 = vpop.permute.xlu0 %709 }
 0x341   : > { %723 = vst.msk [vmem:[%s472_s17] sm:$0xf] %vm722_vm8, %v947_v9  ;;  %v713_v12 = vmul.f32 %v710_v11, %v697_v10 }
 0x343   : > { %v948_v13 = vpack.c.bf16 %v713_v12, %v713_v12 }
 0x345   : > { %725 = vst.msk [vmem:[%s472_s17 + $0x4] sm:$0x1] %vm724_vm9, %v948_v13 }
 0x346 PF: > { %s15_s22 = sadd.s32 1, %s1065_s22   ;;  %s1210_s18 = smov %s1057_s20 }
 0x347   : > { %p12_p10 = scmp.ge.s32.totalorder %s15_s22, 10   ;;  %s1211_s19 = smov %s1061_s21 }
 0x348   : > { %s1212_s20 = smov %s1215_s23  ;;  %s1213_s21 = smov %s1219_s24 }
 0x349   :  { %14 = sbr.rel (!%p12_p10) target bundleno = 3 (0x3), region = 90 }

// kernel: seq2seq_forward.59
= control target key start
LH: loop header
LB: loop body
LE: loop exit
PB: predicated region body
PF: predicated region fallthrough
CT: control target
= control target key end

     0   :  { %vm21_vm0 = vcmask 1043456   ;;  %s138_s0 = inlined_call_operand.vmem [shape: f32[20,128], index: 0, kind: input, shape index: {}]   ;;  %s139_s1 = inlined_call_operand.vmem [shape: f32[1,128], index: 1, kind: input, shape index: {}]   ;;  %s140_s2 = inlined_call_operand.vmem [shape: f32[1,128], index: 2, kind: input, shape index: {}]   ;;  %s141_s3 = inlined_call_operand.vmem [shape: f32[20,128], index: 3, kind: output, shape index: {}]  }
   0x1   :  { %v14_v0 = vld [vmem:[%s138_s0] sm:$0xff]  ;;  %v16_v1 = vld [vmem:[%s138_s0 + $0x10] sm:$0xf]  ;;  %v15_v3 = vld [vmem:[%s138_s0 + $0x8] sm:$0xff] }
   0x2   :  { %17 = vadd.xlane.f32.xlu0 %v14_v0  ;;  %v22_v2 = vsel %vm21_vm0, %v16_v1, 0.0  ;;  %v28_v4 = vmul.f32 %v14_v0, %v14_v0  ;;  %v30_v5 = vmul.f32 %v16_v1, %v16_v1  ;;  %v29_v6 = vmul.f32 %v15_v3, %v15_v3  ;;  %v86_v31 = vld [vmem:[%s139_s1] ss:$0 sm:$0xff] }
   0x3   :  { %23 = vadd.xlane.f32.xlu1 %v22_v2  ;;  %v87_v34 = vld [vmem:[%s140_s2] ss:$0 sm:$0xff] }
   0x4   :  { %v35_v7 = vsel %vm21_vm0, %v30_v5, 0.0 }
   0x6   :  { %19 = vadd.xlane.f32.xlu0 %v15_v3 }
   0x7   :  { %31 = vadd.xlane.f32.xlu1 %v28_v4 }
   0xa   :  { %33 = vadd.xlane.f32.xlu0 %v29_v6 }
   0xb   :  { %36 = vadd.xlane.f32.xlu1 %v35_v7 }
  0x8f   :  { %v18_v8 = vpop.xlane.xlu0 %17 }
  0x90   :  { %v24_v9 = vpop.xlane.xlu1 %23  ;;  %v25_v10 = vmul.f32 0.03125, %v18_v8 }
  0x91   :  { %v27_v15 = vmul.f32 0.03125, %v24_v9 }
  0x92   :  { %v41_v14 = vmul.f32 %v25_v10, %v25_v10  ;;  %v53_v29 = vsub.f32 %v14_v0, %v25_v10 }
  0x93   :  { %v20_v11 = vpop.xlane.xlu0 %19  ;;  %v43_v22 = vmul.f32 %v27_v15, %v27_v15  ;;  %v55_v36 = vsub.f32 %v16_v1, %v27_v15 }
  0x94   :  { %v26_v12 = vmul.f32 0.03125, %v20_v11  ;;  %v32_v13 = vpop.xlane.xlu1 %31 }
  0x95   :  { %v38_v16 = vmul.f32 0.03125, %v32_v13 }
  0x96   :  { %v42_v17 = vmul.f32 %v26_v12, %v26_v12  ;;  %v54_v33 = vsub.f32 %v15_v3, %v26_v12 }
  0x97   :  { %v44_v18 = vsub.f32 %v38_v16, %v41_v14  ;;  %v34_v19 = vpop.xlane.xlu0 %33 }
  0x98   :  { %v39_v20 = vmul.f32 0.03125, %v34_v19  ;;  %v37_v21 = vpop.xlane.xlu1 %36 }
  0x99   :  { %v47_v23 = vadd.f32 1e-05, %v44_v18  ;;  %v40_v24 = vmul.f32 0.03125, %v37_v21 }
  0x9a   :  { %v45_v25 = vsub.f32 %v39_v20, %v42_v17 }
  0x9b   :  { %88 = vrsqrt.f32 %v47_v23  ;;  %v46_v26 = vsub.f32 %v40_v24, %v43_v22 }
  0x9c   :  { %v48_v27 = vadd.f32 1e-05, %v45_v25 }
  0x9d   :  { %v49_v28 = vadd.f32 1e-05, %v46_v26 }
  0x9e   :  { %90 = vrsqrt.f32 %v48_v27 }
  0x9f   :  { %92 = vrsqrt.f32 %v49_v28 }
  0xa5   :  { %v89_v30 = vpop.eup %88 }
  0xa6   :  { %v56_v32 = vmul.f32 %v89_v30, %v53_v29 }
  0xa8   :  { %v91_v35 = vpop.eup %90  ;;  %v66_v37 = vmul.f32 %v86_v31, %v56_v32 }
  0xa9   :  { %v93_v38 = vpop.eup %92  ;;  %v57_v39 = vmul.f32 %v91_v35, %v54_v33 }
  0xaa   :  { %v76_v40 = vadd.f32 %v87_v34, %v66_v37  ;;  %v58_v41 = vmul.f32 %v93_v38, %v55_v36 }
  0xab   :  { %v67_v42 = vmul.f32 %v86_v31, %v57_v39 }
  0xac   :  { %79 = vst [vmem:[%s141_s3] sm:$0xff] %v76_v40  ;;  %v68_v43 = vmul.f32 %v86_v31, %v58_v41 }
  0xad   :  { %v77_v44 = vadd.f32 %v87_v34, %v67_v42 }
  0xae   :  { %v78_v45 = vadd.f32 %v87_v34, %v68_v43 }
  0xaf   :  { %80 = vst [vmem:[%s141_s3 + $0x8] sm:$0xff] %v77_v44 }
  0xb0   :  { %81 = vst [vmem:[%s141_s3 + $0x10] sm:$0xf] %v78_v45 }

// kernel: seq2seq_forward.60
= control target key start
LH: loop header
LB: loop body
LE: loop exit
PB: predicated region body
PF: predicated region fallthrough
CT: control target
= control target key end

     0   :  { %s758_s12 = smov 0   ;;  %s760_s13 = smov 0   ;;  %s825_s0 = inlined_call_operand.vmem [shape: f32[2,10,128], index: 0, kind: input, shape index: {}]   ;;  %s826_s1 = inlined_call_operand.vmem [shape: bf16[4,128,8], index: 1, kind: input, shape index: {}]   ;;  %s827_s2 = inlined_call_operand.vmem [shape: f32[4,1,8], index: 2, kind: input, shape index: {}]   ;;  %s828_s3 = inlined_call_operand.vmem [shape: bf16[2,4,10,8], index: 3, kind: output, shape index: {}]  }
   0x1   :  { %s762_s14 = smov 0   ;;  %s764_s15 = smov 0  }
   0x2   :  { %s766_s16 = smov 0  }
   0x3 LB: > { %s35_s17 = sadd.s32 1, %s726_s14  ;;  %s39_s18 = sadd.s32 1, %s730_s15  ;;  %s734_s16 = sphi %s766_s16, %s13_s16   ;;  %s730_s15 = sphi %s764_s15, %s832_s15   ;;  %s726_s14 = sphi %s762_s14, %s831_s14   ;;  %s722_s13 = sphi %s760_s13, %s830_s13   ;;  %s718_s12 = sphi %s758_s12, %s829_s12  }
   0x4   : > { %p37_p0 = scmp.ge.s32.totalorder %s35_s17, 4  ;;  %p592_p1 = scmp.ge.s32.totalorder %s734_s16, 1 }
   0x5   : > { %p204_p2 = scmp.lt.s32.totalorder %s734_s16, 9 }
   0x6   : > { %s834_s17 = smov (%p37_p0, %s35_s17), 0  ;;  %s836_s18 = smov (!%p37_p0, %s39_s18), %s730_s15 }
   0x7   : > { %p205_p3 = pnand %p592_p1, %p204_p2  ;;  %p41_p4 = scmp.ge.s32.totalorder %s836_s18, 2 }
   0x8   : > { %p269_p5 = scmp.lt.s32.totalorder (!%p205_p3), %s718_s12, 3  ;;  %p256_p6 = scmp.lt.s32.totalorder (!%p205_p3), %s722_s13, 1  ;;  %vm300_vm0 = vcmask (!%p205_p3), 64512   ;;  %v736_v0 = vmov (!%p205_p3), 0.0   ;;  %vm737_vm1 = vmmov (!%p205_p3), 0   ;;  %vm302_vm2 = vcmask (!%p205_p3), 58368  }
   0x9   : > { %s838_s18 = smov (%p41_p4, %s836_s18), 0  ;;  %208 = sbr.rel (%p205_p3) target bundleno = 280 (0x118), region = 32 }
   0xa   : > { %626 = vmatprep.subr.bf16.mxu0 (!%p205_p3), %v736_v0  ;;  %642 = vmatprep.mubr.msk.bf16.mxu0 (!%p205_p3), %vm737_vm1, %v736_v0  ;;  %301 = vst.msk [vmem:[#allocation2] sm:$0xff] (!%p205_p3), %vm300_vm0, %v736_v0  ;;  %vm442_vm3 = vcmask (!%p205_p3), 60416   ;;  %vm444_vm4 = vcmask (!%p205_p3), 57344  }
   0xb   : > { %303 = vst.msk [vmem:[#allocation2 + $0x8] sm:$0x3] (!%p205_p3), %vm302_vm2, %v736_v0 }
  0x10   : > { %s840_s12 = smov (!%p269_p5, %s718_s12), 3  ;;  %s842_s13 = smov (!%p256_p6, %s722_s13), 1 }
  0x11   : > { %s614_s19 = sshll.u32 %s840_s12, 6  ;;  %s597_s20 = sshll.u32 %s840_s12, 1  ;;  %v304_v12 = vld [vmem:[#allocation2] sm:$0xff] }
  0x12   : > { %s276_s23 = scalar_lea.vmem %s826_s1, %s614_s19  ;;  %s598_s24 = sshll.u32 %s842_s13, 3  ;;  %v305_v14 = vld [vmem:[#allocation2 + $0x8] sm:$0x3] }
  0x13   : > { %v688_v1 = vld [vmem:[%s276_s23] sm:$0xff]   ;;  %s796_s25 = sadd.s32 %s598_s24, %s597_s20  ;;  %v689_v2 = vld [vmem:[%s276_s23 + $0x8] sm:$0xff]   ;;  %v690_v3 = vld [vmem:[%s276_s23 + $0x10] sm:$0xff]   ;;  %s613_s26 = sshll.u32 %s842_s13, 4 }
  0x14   : > { %627 = vmatpush3.bf16.msra.mxu0 %v688_v1  ;;  %v691_v4 = vld [vmem:[%s276_s23 + $0x18] sm:$0xff]   ;;  %v692_v5 = vld [vmem:[%s276_s23 + $0x20] sm:$0xff]   ;;  %v693_v6 = vld [vmem:[%s276_s23 + $0x28] sm:$0xff]   ;;  %s266_s29 = scalar_lea.vmem %s825_s0, %s613_s26  ;;  %s280_s5 = scalar_lea.vmem %s827_s2, %s840_s12 }
  0x15   : > { %628 = vmatprep.subr.bf16.mxu0 %v736_v0  ;;  %v694_v7 = vld [vmem:[%s276_s23 + $0x30] sm:$0xff]   ;;  %v695_v8 = vld [vmem:[%s276_s23 + $0x38] sm:$0xff]   ;;  %v306_v9 = vld [vmem:[%s266_s29] sm:$0xff]  ;;  %s599_s6 = sshll.u32 %s796_s25, 2 }
  0x16   : > { %v307_v10 = vld [vmem:[%s266_s29 + $0x8] sm:$0x3]  ;;  %v608_v20 = vld [vmem:[%s280_s5] ss:$0 sm:$0xff]  ;;  %s293_s9 = scalar_lea.vmem %s828_s3, %s599_s6 }
  0x17   : > { %v308_v11 = vpack.c.bf16 %v307_v10, %v306_v9 }
  0x18   : > { %629 = vmatpush3.bf16.msra.mxu0 %v689_v2 }
  0x19   : > { %630 = vmatprep.subr.bf16.mxu0 %v736_v0 }
  0x1c   : > { %631 = vmatpush3.bf16.msra.mxu0 %v690_v3 }
  0x1d   : > { %632 = vmatprep.subr.bf16.mxu0 %v736_v0 }
  0x20   : > { %633 = vmatpush3.bf16.msra.mxu0 %v691_v4 }
  0x21   : > { %634 = vmatprep.subr.bf16.mxu0 %v736_v0 }
  0x24   : > { %635 = vmatpush3.bf16.msra.mxu0 %v692_v5 }
  0x25   : > { %636 = vmatprep.subr.bf16.mxu0 %v736_v0 }
  0x28   : > { %637 = vmatpush3.bf16.msra.mxu0 %v693_v6 }
  0x29   : > { %638 = vmatprep.subr.bf16.mxu0 %v736_v0 }
  0x2c   : > { %639 = vmatpush3.bf16.msra.mxu0 %v694_v7 }
  0x2d   : > { %640 = vmatprep.subr.bf16.mxu0 %v736_v0 }
  0x30   : > { %641 = vmatpush3.bf16.msra.mxu0 %v695_v8 }
  0x33   : > { %643 = vmatmul.mubr.bf16.vlgmr.msra.gmra.mrb[0].mxu0 %v308_v11 }
 0x106   : > { %v407_v13 = vpop.f32.mrb[0].mxu0 }
 0x107   : > { %v414_v15 = vadd.f32 %v407_v13, %v304_v12  ;;  %v644_v16 = vpop.f32.mrb[1].mxu0 }
 0x108   : > { %v410_v17 = vpop.f32.mrb[2].mxu0 }
 0x109   : > { %417 = vst.msk [vmem:[#allocation2] sm:$0xff] %vm300_vm0, %v414_v15  ;;  %v415_v18 = vadd.f32 %v410_v17, %v305_v14  ;;  %v645_v19 = vpop.f32.mrb[3].mxu0 }
 0x10b   : > { %419 = vst.msk [vmem:[#allocation2 + $0x8] sm:$0x3] %vm302_vm2, %v415_v18 }
 0x110   : > { %v423_v21 = vld [vmem:[#allocation2] sm:$0xff] }
 0x111   : > { %v432_v22 = vadd.f32 %v608_v20, %v423_v21 }
 0x112   : > { %v424_v23 = vld [vmem:[#allocation2 + $0x8] sm:$0x3] }
 0x113   : > { %v615_v24 = vpack.c.bf16 %v432_v22, %v432_v22  ;;  %v433_v25 = vadd.f32 %v608_v20, %v424_v23 }
 0x115   : > { %443 = vst.msk [vmem:[%s293_s9] sm:$0xf] %vm442_vm3, %v615_v24  ;;  %v616_v26 = vpack.c.bf16 %v433_v25, %v433_v25 }
 0x117   : > { %445 = vst.msk [vmem:[%s293_s9 + $0x4] sm:$0x1] %vm444_vm4, %v616_v26 }
 0x118 PF: > { %s13_s16 = sadd.s32 1, %s734_s16   ;;  %s829_s12 = smov %s726_s14 }
 0x119   : > { %p10_p7 = scmp.ge.s32.totalorder %s13_s16, 10   ;;  %s830_s13 = smov %s730_s15 }
 0x11a   : > { %s831_s14 = smov %s834_s17  ;;  %s832_s15 = smov %s838_s18 }
 0x11b   :  { %12 = sbr.rel (!%p10_p7) target bundleno = 3 (0x3), region = 76 }

// kernel: seq2seq_forward.41
= control target key start
LH: loop header
LB: loop body
LE: loop exit
PB: predicated region body
PF: predicated region fallthrough
CT: control target
= control target key end

     0   :  { %s706_s12 = smov 0   ;;  %s708_s13 = smov 0   ;;  %s773_s0 = inlined_call_operand.vmem [shape: f32[2,8,128], index: 0, kind: input, shape index: {}]   ;;  %s774_s1 = inlined_call_operand.vmem [shape: bf16[12,128,8], index: 1, kind: input, shape index: {}]   ;;  %s775_s2 = inlined_call_operand.vmem [shape: f32[12,1,8], index: 2, kind: input, shape index: {}]   ;;  %s776_s3 = inlined_call_operand.vmem [shape: bf16[2,12,8,8], index: 3, kind: output, shape index: {}]  }
   0x1   :  { %s710_s14 = smov 0   ;;  %s712_s15 = smov 0  }
   0x2   :  { %s714_s16 = smov 0  }
   0x3 LB: > { %s35_s17 = sadd.s32 1, %s674_s14  ;;  %s39_s18 = sadd.s32 1, %s678_s15  ;;  %s682_s16 = sphi %s714_s16, %s13_s16   ;;  %s678_s15 = sphi %s712_s15, %s780_s15   ;;  %s674_s14 = sphi %s710_s14, %s779_s14   ;;  %s670_s13 = sphi %s708_s13, %s778_s13   ;;  %s666_s12 = sphi %s706_s12, %s777_s12  }
   0x4   : > { %p37_p0 = scmp.ge.s32.totalorder %s35_s17, 12  ;;  %p547_p1 = scmp.ge.s32.totalorder %s682_s16, 1 }
   0x5   : > { %p201_p2 = scmp.lt.s32.totalorder %s682_s16, 25 }
   0x6   : > { %s782_s17 = smov (%p37_p0, %s35_s17), 0  ;;  %s784_s18 = smov (!%p37_p0, %s39_s18), %s678_s15 }
   0x7   : > { %p202_p3 = pnand %p547_p1, %p201_p2  ;;  %p41_p4 = scmp.ge.s32.totalorder %s784_s18, 2 }
   0x8   : > { %p259_p5 = scmp.lt.s32.totalorder (!%p202_p3), %s666_s12, 11  ;;  %p248_p6 = scmp.lt.s32.totalorder (!%p202_p3), %s670_s13, 1  ;;  %vm287_vm0 = vcmask (!%p202_p3), 64512   ;;  %v684_v0 = vmov (!%p202_p3), 0.0   ;;  %vm685_vm1 = vmmov (!%p202_p3), 0   ;;  %vm412_vm2 = vcmask (!%p202_p3), 60416  }
   0x9   : > { %s786_s18 = smov (%p41_p4, %s784_s18), 0  ;;  %205 = sbr.rel (%p202_p3) target bundleno = 278 (0x116), region = 32 }
   0xa   : > { %573 = vmatprep.subr.bf16.mxu0 (!%p202_p3), %v684_v0  ;;  %589 = vmatprep.mubr.msk.bf16.mxu0 (!%p202_p3), %vm685_vm1, %v684_v0  ;;  %288 = vst.msk [vmem:[#allocation2] sm:$0xff] (!%p202_p3), %vm287_vm0, %v684_v0 }
  0x10   : > { %s788_s12 = smov (!%p259_p5, %s666_s12), 11  ;;  %s790_s13 = smov (!%p248_p6, %s670_s13), 1 }
  0x11   : > { %s563_s19 = sshll.u32 %s788_s12, 6  ;;  %s593_s23 = smul.u32 12, %s790_s13  ;;  %v289_v11 = vld [vmem:[#allocation2] sm:$0xff] }
  0x12   : > { %s266_s22 = scalar_lea.vmem %s774_s1, %s563_s19  ;;  %s548_s25 = sshll.u32 %s790_s13, 3 }
  0x13   : > { %v636_v1 = vld [vmem:[%s266_s22] sm:$0xff]   ;;  %v637_v2 = vld [vmem:[%s266_s22 + $0x8] sm:$0xff]   ;;  %s744_s24 = sadd.s32 %s593_s23, %s788_s12  ;;  %v638_v3 = vld [vmem:[%s266_s22 + $0x10] sm:$0xff]   ;;  %s257_s28 = scalar_lea.vmem %s773_s0, %s548_s25 }
  0x14   : > { %574 = vmatpush3.bf16.msra.mxu0 %v636_v1  ;;  %v639_v4 = vld [vmem:[%s266_s22 + $0x18] sm:$0xff]   ;;  %v640_v5 = vld [vmem:[%s266_s22 + $0x20] sm:$0xff]   ;;  %v641_v6 = vld [vmem:[%s266_s22 + $0x28] sm:$0xff]   ;;  %s270_s4 = scalar_lea.vmem %s775_s2, %s788_s12  ;;  %s551_s5 = sshll.u32 %s744_s24, 2 }
  0x15   : > { %575 = vmatprep.subr.bf16.mxu0 %v684_v0  ;;  %v642_v7 = vld [vmem:[%s266_s22 + $0x30] sm:$0xff]   ;;  %v643_v8 = vld [vmem:[%s266_s22 + $0x38] sm:$0xff]   ;;  %v290_v9 = vld [vmem:[%s257_s28] sm:$0xff]  ;;  %s281_s8 = scalar_lea.vmem %s776_s3, %s551_s5 }
  0x16   : > { %v291_v10 = vpack.c.bf16 %v290_v9, %v290_v9  ;;  %v560_v17 = vld [vmem:[%s270_s4] ss:$0 sm:$0xff] }
  0x18   : > { %576 = vmatpush3.bf16.msra.mxu0 %v637_v2 }
  0x19   : > { %577 = vmatprep.subr.bf16.mxu0 %v684_v0 }
  0x1c   : > { %578 = vmatpush3.bf16.msra.mxu0 %v638_v3 }
  0x1d   : > { %579 = vmatprep.subr.bf16.mxu0 %v684_v0 }
  0x20   : > { %580 = vmatpush3.bf16.msra.mxu0 %v639_v4 }
  0x21   : > { %581 = vmatprep.subr.bf16.mxu0 %v684_v0 }
  0x24   : > { %582 = vmatpush3.bf16.msra.mxu0 %v640_v5 }
  0x25   : > { %583 = vmatprep.subr.bf16.mxu0 %v684_v0 }
  0x28   : > { %584 = vmatpush3.bf16.msra.mxu0 %v641_v6 }
  0x29   : > { %585 = vmatprep.subr.bf16.mxu0 %v684_v0 }
  0x2c   : > { %586 = vmatpush3.bf16.msra.mxu0 %v642_v7 }
  0x2d   : > { %587 = vmatprep.subr.bf16.mxu0 %v684_v0 }
  0x30   : > { %588 = vmatpush3.bf16.msra.mxu0 %v643_v8 }
  0x33   : > { %590 = vmatmul.mubr.bf16.vlgmr.msra.gmra.mrb[0].mxu0 %v291_v10 }
 0x106   : > { %v390_v12 = vpop.f32.mrb[0].mxu0 }
 0x107   : > { %v396_v13 = vadd.f32 %v390_v12, %v289_v11  ;;  %v591_v14 = vpop.f32.mrb[1].mxu0 }
 0x108   : > { %v393_v15 = vpop.f32.mrb[2].mxu0 }
 0x109   : > { %398 = vst.msk [vmem:[#allocation2] sm:$0xff] %vm287_vm0, %v396_v13  ;;  %v592_v16 = vpop.f32.mrb[3].mxu0 }
 0x110   : > { %v402_v18 = vld [vmem:[#allocation2] sm:$0xff] }
 0x111   : > { %v410_v19 = vadd.f32 %v560_v17, %v402_v18 }
 0x113   : > { %v411_v20 = vpack.c.bf16 %v410_v19, %v410_v19 }
 0x115   : > { %413 = vst.msk [vmem:[%s281_s8] sm:$0xf] %vm412_vm2, %v411_v20 }
 0x116 PF: > { %s13_s16 = sadd.s32 1, %s682_s16   ;;  %s777_s12 = smov %s674_s14 }
 0x117   : > { %p10_p7 = scmp.ge.s32.totalorder %s13_s16, 26   ;;  %s778_s13 = smov %s678_s15 }
 0x118   : > { %s779_s14 = smov %s782_s17  ;;  %s780_s15 = smov %s786_s18 }
 0x119   :  { %12 = sbr.rel (!%p10_p7) target bundleno = 3 (0x3), region = 76 }

// kernel: seq2seq_forward.43
= control target key start
LH: loop header
LB: loop body
LE: loop exit
PB: predicated region body
PF: predicated region fallthrough
CT: control target
= control target key end

     0   :  { %s697_s15 = smov 0   ;;  %s699_s16 = smov 0   ;;  %s766_s0 = inlined_call_operand.vmem [shape: bf16[2,4,8,8], index: 0, kind: input, shape index: {}]   ;;  %s767_s1 = inlined_call_operand.vmem [shape: bf16[4,8,128], index: 1, kind: input, shape index: {}]   ;;  %s768_s2 = inlined_call_operand.vmem [shape: f32[1,128], index: 2, kind: input, shape index: {}]   ;;  %s769_s3 = inlined_call_operand.vmem [shape: f32[2,8,128], index: 3, kind: input, shape index: {}]   ;;  %s770_s4 = inlined_call_operand.vmem [shape: f32[2,8,128], index: 4, kind: output, shape index: {}]  }
   0x1   :  { %s701_s17 = smov 0   ;;  %s703_s18 = smov 0  }
   0x2   :  { %s705_s19 = smov 0  }
   0x3 LB: > { %s29_s20 = sadd.s32 1, %s659_s17  ;;  %s40_s21 = sadd.s32 1, %s663_s18  ;;  %s667_s19 = sphi %s705_s19, %s14_s19   ;;  %s663_s18 = sphi %s703_s18, %s774_s18   ;;  %s659_s17 = sphi %s701_s17, %s773_s17   ;;  %s655_s16 = sphi %s699_s16, %s772_s16   ;;  %s651_s15 = sphi %s697_s15, %s771_s15  }
   0x4   : > { %p30_p0 = scmp.ge.s32.totalorder %s29_s20, 4  ;;  %p566_p1 = scmp.ge.s32.totalorder %s667_s19, 1 }
   0x5   : > { %p243_p2 = scmp.lt.s32.totalorder %s667_s19, 9 }
   0x6   : > { %s776_s20 = smov (%p30_p0, %s29_s20), 0  ;;  %s778_s21 = smov (!%p30_p0, %s40_s21), %s663_s18 }
   0x7   : > { %p244_p3 = pnand %p566_p1, %p243_p2  ;;  %p42_p4 = scmp.ge.s32.totalorder %s778_s21, 2 }
   0x8   : > { %p300_p5 = scmp.lt.s32.totalorder (!%p244_p3), %s655_s16, 1  ;;  %p302_p6 = scmp.lt.s32.totalorder (!%p244_p3), %s651_s15, 3 }
   0x9   : > { %s780_s21 = smov (%p42_p4, %s778_s21), 0  ;;  %247 = sbr.rel (%p244_p3) target bundleno = 255 (0xff), region = 36 }
   0xa   : > { %p572_p7 = scmp.ne.s32.totalorder (!%p244_p3), %s651_s15, 0 }
  0x10   : > { %s782_s16 = smov (!%p300_p5, %s655_s16), 1  ;;  %345 = sbr.rel (%p572_p7) target bundleno = 23 (0x17), region = 40 }
  0x11   : > { %s303_s22 = scalar_select %p302_p6, %s651_s15, 3 }
  0x12   : > { %s567_s23 = sshll.u32 %s782_s16, 2  ;;  %s570_s24 = sshll.u32 %s782_s16, 3  ;;  %v669_v0 = vmov (!%p572_p7), 0.0  }
  0x13   : > { %s308_s25 = sadd.s32 %s567_s23, %s303_s22  ;;  %s569_s26 = sshll.u32 %s303_s22, 2  ;;  %346 = vst [vmem:[#allocation2] sm:$0xff] (!%p572_p7), %v669_v0 }
  0x14   : > { %s568_s27 = sshll.u32 %s308_s25, 2  ;;  %s317_s30 = scalar_lea.vmem %s767_s1, %s569_s26 }
  0x15   : > { %s310_s7 = scalar_lea.vmem %s766_s0, %s568_s27  ;;  %s330_s10 = scalar_lea.vmem %s769_s3, %s570_s24 }
  0x16   : > { %s743_s13 = scalar_lea.vmem %s770_s4, %s570_s24 }
  0x17 PF: > { %v349_v1 = vld [vmem:[%s317_s30] sm:$0xf]  ;;  %vm354_vm0 = vcmask 1043456   ;;  %v670_v2 = vmov 0.0   ;;  %vm671_vm1 = vmmov 0   ;;  %vm350_vm2 = vcmask 64512  }
  0x18   : > { %580 = vmatprep.subr.bf16.mxu0 %v670_v2  ;;  %v356_v3 = vsel %vm354_vm0, %v349_v1, 0  ;;  %582 = vmatprep.mubr.msk.bf16.mxu0 %vm671_vm1, %v670_v2  ;;  %v348_v4 = vld [vmem:[%s310_s7] sm:$0xf]  ;;  %p574_p8 = scmp.ne.s32.totalorder %s651_s15, 3 }
  0x19   : > { %581 = vmatpush3.bf16.msra.mxu0 %v356_v3  ;;  %v575_v12 = vld [vmem:[%s768_s2] ss:$0 sm:$0xff] (!%p574_p8) }
  0x1a   : > { %v347_v5 = vld [vmem:[#allocation2] sm:$0xff] }
  0x1b   : > { %v413_v13 = vld [vmem:[%s330_s10] sm:$0xff] (!%p574_p8) }
  0x1c   : > { %583 = vmatmul.mubr.msk.bf16.vlgmr.msra.gmra.mrb[0].mxu0 %vm350_vm2, %v348_v4 }
  0xec   : > { %403 = sbr.rel (%p574_p8) target bundleno = 255 (0xff), region = 44 }
  0xef   : > { %v392_v6 = vpop.f32.mrb[0].mxu0 }
  0xf0   : > { %v398_v7 = vadd.f32 %v392_v6, %v347_v5  ;;  %v584_v8 = vpop.f32.mrb[1].mxu0 }
  0xf1   : > { %v395_v9 = vpop.f32.mrb[2].mxu0 }
  0xf2   : > { %399 = vst [vmem:[#allocation2] sm:$0xff] %v398_v7  ;;  %v585_v10 = vpop.f32.mrb[3].mxu0 }
  0xf9   : > { %v404_v11 = vld [vmem:[#allocation2] sm:$0xff] }
  0xfa   : > { %v412_v14 = vadd.f32 %v575_v12, %v404_v11 }
  0xfc   : > { %v414_v15 = vadd.f32 %v413_v13, %v412_v14 }
  0xfe   : > { %415 = vst [vmem:[%s743_s13] sm:$0xff] %v414_v15 }
  0xff PF: > { %s14_s19 = sadd.s32 1, %s667_s19   ;;  %s771_s15 = smov %s659_s17 }
 0x100   : > { %p11_p9 = scmp.ge.s32.totalorder %s14_s19, 10   ;;  %s772_s16 = smov %s663_s18 }
 0x101   : > { %s773_s17 = smov %s776_s20  ;;  %s774_s18 = smov %s780_s21 }
 0x102   :  { %13 = sbr.rel (!%p11_p9) target bundleno = 3 (0x3), region = 83 }

// kernel: seq2seq_forward.42
= control target key start
LH: loop header
LB: loop body
LE: loop exit
PB: predicated region body
PF: predicated region fallthrough
CT: control target
= control target key end

     0   :  { %s945_s18 = smov 0   ;;  %s947_s19 = smov 0   ;;  %s1037_s0 = inlined_call_operand.vmem [shape: bf16[2,12,8,8], index: 0, kind: input, shape index: {}, may-alias: {0,1,2}]   ;;  %s1038_s1 = inlined_call_operand.vmem [shape: bf16[2,12,8,8], index: 1, kind: input, shape index: {}, may-alias: {0,1,2}]   ;;  %s1039_s2 = inlined_call_operand.vmem [shape: bf16[2,12,8,8], index: 2, kind: input, shape index: {}, may-alias: {0,1,2}]   ;;  %s1040_s3 = inlined_call_operand.vmem [shape: f32[8,8], index: 3, kind: input, shape index: {}]   ;;  %s1041_s4 = inlined_call_operand.vmem [shape: f32[2,1,8], index: 4, kind: input, shape index: {}]   ;;  %s1042_s5 = inlined_call_operand.vmem [shape: bf16[2,4,8,8], index: 5, kind: output, shape index: {}]  }
   0x1   :  { %s949_s20 = smov 0   ;;  %s951_s21 = smov 0  }
   0x2   :  { %s953_s22 = smov 0  }
   0x3 LB: > { %s37_s23 = sadd.s32 1, %s901_s20  ;;  %s41_s24 = sadd.s32 1, %s905_s21  ;;  %s909_s22 = sphi %s953_s22, %s15_s22   ;;  %s905_s21 = sphi %s951_s21, %s1046_s21   ;;  %s901_s20 = sphi %s949_s20, %s1045_s20   ;;  %s897_s19 = sphi %s947_s19, %s1044_s19   ;;  %s893_s18 = sphi %s945_s18, %s1043_s18  }
   0x4   : > { %p39_p0 = scmp.ge.s32.totalorder %s37_s23, 4  ;;  %p791_p1 = scmp.ge.s32.totalorder %s909_s22, 1 }
   0x5   : > { %p302_p2 = scmp.lt.s32.totalorder %s909_s22, 9 }
   0x6   : > { %s1048_s23 = smov (%p39_p0, %s37_s23), 0  ;;  %s1050_s24 = smov (!%p39_p0, %s41_s24), %s905_s21 }
   0x7   : > { %p303_p3 = pnand %p791_p1, %p302_p2  ;;  %p43_p4 = scmp.ge.s32.totalorder %s1050_s24, 2 }
   0x8   : > { %p379_p5 = scmp.lt.s32.totalorder (!%p303_p3), %s897_s19, 1  ;;  %s390_s25 = sadd.s32 (!%p303_p3), 4, %s893_s18  ;;  %vm448_vm0 = vcmask (!%p303_p3), 64512   ;;  %v911_v0 = vmov (!%p303_p3), 0.0   ;;  %vm912_vm1 = vmmov (!%p303_p3), 0   ;;  %vm445_vm2 = vcmask (!%p303_p3), 7168  }
   0x9   : > { %s1052_s24 = smov (%p43_p4, %s1050_s24), 0  ;;  %306 = sbr.rel (%p303_p3) target bundleno = 834 (0x342), region = 40 }
   0xa   : > { %806 = vmatprep.subr.bf16.mxu0 (!%p303_p3), %v911_v0  ;;  %p393_p6 = scmp.lt.s32.totalorder (!%p303_p3), %s390_s25, 11  ;;  %449 = vst.msk [vmem:[#allocation4] sm:$0xff] (!%p303_p3), %vm448_vm0, %v911_v0  ;;  %808 = vmatprep.mubr.msk.bf16.mxu0 (!%p303_p3), %vm912_vm1, %v911_v0  ;;  %p381_p7 = scmp.lt.s32.totalorder (!%p303_p3), %s893_s18, 11  ;;  %v913_v4 = vmov (!%p303_p3), -1e+30   ;;  %v501_v6 = vld [vmem:[%s1040_s3] sm:$0xff] (!%p303_p3) }
   0xb   : > { %812 = vmatprep.subr.bf16.mxu1 (!%p303_p3), %v911_v0  ;;  %814 = vmatprep.mubr.msk.bf16.mxu1 (!%p303_p3), %vm912_vm1, %v911_v0  ;;  %446 = vst.msk [vmem:[#allocation2] sm:$0xff] (!%p303_p3), %vm445_vm2, %v913_v4  ;;  %447 = vst.msk [vmem:[#allocation3] sm:$0xff] (!%p303_p3), %vm445_vm2, %v911_v0  ;;  %v914_v15 = vmov (!%p303_p3), 0   ;;  %vm546_vm3 = vcmask (!%p303_p3), 1043456   ;;  %p431_p9 = scmp.lt.s32.totalorder (!%p303_p3), %s893_s18, 3  ;;  %vm606_vm4 = vcmask (!%p303_p3), 60416  }
   0xc   : > { %863 = vset.pattern.permute.xlu0 (!%p303_p3), %v914_v15  ;;  %864 = vset.pattern.permute.xlu1 (!%p303_p3), %v914_v15 }
  0x10   : > { %s1054_s19 = smov (!%p379_p5, %s897_s19), 1  ;;  %s1056_s25 = smov (!%p393_p6, %s390_s25), 11 }
  0x11   : > { %s983_s26 = smul.u32 12, %s1054_s19  ;;  %s428_s15 = scalar_lea.vmem %s1041_s4, %s1054_s19  ;;  %v535_v36 = vld [vmem:[#allocation4] sm:$0xff] }
  0x12   : > { %s382_s27 = scalar_select %p381_p7, %s893_s18, 11  ;;  %v798_v10 = vld [vmem:[%s428_s15] ss:$0 sm:$0xff]  ;;  %v527_v30 = vld [vmem:[#allocation3] sm:$0xff] }
  0x13   : > { %s399_s28 = sadd.s32 %s983_s26, %s1056_s25  ;;  %v511_v16 = vld [vmem:[#allocation2] sm:$0xff]  ;;  %s403_s25 = sadd.s32 8, %s893_s18 }
  0x14   : > { %s793_s29 = sshll.u32 %s399_s28, 2  ;;  %s387_s30 = sadd.s32 %s983_s26, %s382_s27 }
  0x15   : > { %s401_s8 = scalar_lea.vmem %s1038_s1, %s793_s29  ;;  %s792_s9 = sshll.u32 %s387_s30, 2 }
  0x16   : > { %v451_v1 = vld [vmem:[%s401_s8] sm:$0xf]  ;;  %s389_s12 = scalar_lea.vmem %s1037_s0, %s792_s9  ;;  %p406_p8 = scmp.lt.s32.totalorder %s403_s25, 11 }
  0x17   : > { %v458_v2 = vsel %vm448_vm0, %v451_v1, 0  ;;  %v450_v3 = vld [vmem:[%s389_s12] sm:$0xf]  ;;  %s1060_s18 = smov (!%p431_p9, %s893_s18), 3 }
  0x18   : > { %807 = vmatpush3.bf16.xpose.msra.mxu0 %v458_v2  ;;  %s1058_s25 = smov (!%p406_p8, %s403_s25), 11 }
  0x19   : > { %s412_s27 = sadd.s32 %s983_s26, %s1058_s25  ;;  %s795_s26 = sshll.u32 %s1054_s19, 2 }
  0x1a   : > { %s794_s28 = sshll.u32 %s412_s27, 2  ;;  %s437_s7 = sadd.s32 %s795_s26, %s1060_s18 }
  0x1b   : > { %s414_s6 = scalar_lea.vmem %s1039_s2, %s794_s28  ;;  %s796_s8 = sshll.u32 %s437_s7, 2 }
  0x1c   : > { %v452_v20 = vld [vmem:[%s414_s6] sm:$0xf]  ;;  %s439_s11 = scalar_lea.vmem %s1042_s5, %s796_s8 }
  0x1d   : > { %v548_v21 = vsel %vm546_vm3, %v452_v20, 0 }
  0x1e   : > { %813 = vmatpush3.bf16.msra.mxu1 %v548_v21 }
  0x1f   : > { %809 = vmatmul.mubr.msk.bf16.vlgmr.msra.gmra.mrb[0].mxu0 %vm448_vm0, %v450_v3 }
  0xf2   : > { %v494_v5 = vpop.f32.mrb[0].mxu0 }
  0xf3   : > { %v500_v7 = vmul.f32 0.35355338, %v494_v5  ;;  %v810_v8 = vpop.f32.mrb[1].mxu0 }
  0xf4   : > { %v497_v9 = vpop.f32.mrb[2].mxu0 }
  0xf5   : > { %v502_v11 = vadd.f32 %v501_v6, %v500_v7  ;;  %v811_v12 = vpop.f32.mrb[3].mxu0 }
  0xf7   : > { %v510_v13 = vadd.f32 %v798_v10, %v502_v11 }
  0xf9   : > { %v512_v14 = vsel %vm448_vm0, %v510_v13, -inf }
  0xfa   : > { %513 = vmax.xlane.f32.xlu0 %v512_v14 }
 0x187   : > { %v514_v17 = vpop.xlane.xlu0 %513 }
 0x188   : > { %v515_v18 = vmax.f32 %v511_v16, %v514_v17 }
 0x18a   : > { %v516_v19 = vsub.f32 %v511_v16, %v515_v18  ;;  %592 = vst.msk [vmem:[#allocation2] sm:$0xff] %vm445_vm2, %v515_v18  ;;  %521 = vperm.xlu0 %863, %v515_v18  }
 0x18c   : > { %v517_v28 = vmul.f32 1.442695, %v516_v19 }
 0x209   : > { %v522_v22 = vpop.permute.xlu0 %521 }
 0x20a   : > { %v524_v23 = vsub.f32 %v510_v13, %v522_v22 }
 0x20c   : > { %v525_v24 = vmul.f32 1.442695, %v524_v23 }
 0x20e   : > { %865 = vpow2.f32 %v525_v24 }
 0x20f   : > { %867 = vpow2.f32 %v517_v28 }
 0x218   : > { %v866_v25 = vpop.eup %865 }
 0x219   : > { %v529_v26 = vsel %vm448_vm0, %v866_v25, 0.0  ;;  %v542_v27 = vpack.c.bf16 %v866_v25, %v866_v25  ;;  %v868_v29 = vpop.eup %867 }
 0x21a   : > { %530 = vadd.xlane.f32.xlu1 %v529_v26  ;;  %v528_v31 = vmul.f32 %v868_v29, %v527_v30 }
 0x21b   : > { %815 = vmatmul.mubr.msk.bf16.vlgmr.msra.gmra.mrb[0].mxu1 %vm448_vm0, %v542_v27 }
 0x22b   : > { %538 = vperm.xlu1 %864, %v868_v29  }
 0x2a7   : > { %v531_v32 = vpop.xlane.xlu1 %530 }
 0x2a8   : > { %v532_v33 = vadd.f32 %v531_v32, %v528_v31 }
 0x2aa   : > { %534 = vst.msk [vmem:[#allocation3] sm:$0xff] %vm445_vm2, %v532_v33 }
 0x2ab   : > { %v539_v37 = vpop.permute.xlu1 %538 }
 0x2ac   : > { %v541_v38 = vmul.f32 %v539_v37, %v535_v36 }
 0x2b1   : > { %v597_v34 = vld [vmem:[#allocation3] sm:$0xff] }
 0x2b2   : > { %869 = vrcp.f32 %v597_v34 }
 0x2bc   : > { %v870_v35 = vpop.eup %869 }
 0x2bd   : > { %601 = vperm.xlu1 %864, %v870_v35  }
 0x2ee   : > { %v584_v39 = vpop.f32.mrb[0].mxu1 }
 0x2ef   : > { %v590_v40 = vadd.f32 %v584_v39, %v541_v38  ;;  %v816_v41 = vpop.f32.mrb[1].mxu1 }
 0x2f0   : > { %v587_v42 = vpop.f32.mrb[2].mxu1 }
 0x2f1   : > { %591 = vst.msk [vmem:[#allocation4] sm:$0xff] %vm448_vm0, %v590_v40  ;;  %v817_v43 = vpop.f32.mrb[3].mxu1 }
 0x2f8   : > { %v596_v44 = vld [vmem:[#allocation4] sm:$0xff] }
 0x33c   : > { %v602_v45 = vpop.permute.xlu1 %601 }
 0x33d   : > { %v604_v46 = vmul.f32 %v602_v45, %v596_v44 }
 0x33f   : > { %v605_v47 = vpack.c.bf16 %v604_v46, %v604_v46 }
 0x341   : > { %607 = vst.msk [vmem:[%s439_s11] sm:$0xf] %vm606_vm4, %v605_v47 }
 0x342 PF: > { %s15_s22 = sadd.s32 1, %s909_s22   ;;  %s1043_s18 = smov %s901_s20 }
 0x343   : > { %p12_p10 = scmp.ge.s32.totalorder %s15_s22, 10   ;;  %s1044_s19 = smov %s905_s21 }
 0x344   : > { %s1045_s20 = smov %s1048_s23  ;;  %s1046_s21 = smov %s1052_s24 }
 0x345   :  { %14 = sbr.rel (!%p12_p10) target bundleno = 3 (0x3), region = 90 }

// kernel: seq2seq_forward.44
= control target key start
LH: loop header
LB: loop body
LE: loop exit
PB: predicated region body
PF: predicated region fallthrough
CT: control target
= control target key end

     0   :  { %s110_s0 = inlined_call_operand.vmem [shape: f32[16,128], index: 0, kind: input, shape index: {}]   ;;  %s111_s1 = inlined_call_operand.vmem [shape: f32[1,128], index: 1, kind: input, shape index: {}]   ;;  %s112_s2 = inlined_call_operand.vmem [shape: f32[1,128], index: 2, kind: input, shape index: {}]   ;;  %s113_s3 = inlined_call_operand.vmem [shape: f32[16,128], index: 3, kind: output, shape index: {}]  }
   0x1   :  { %v14_v0 = vld [vmem:[%s110_s0] sm:$0xff]  ;;  %v15_v1 = vld [vmem:[%s110_s0 + $0x8] sm:$0xff] }
   0x2   :  { %16 = vadd.xlane.f32.xlu0 %v14_v0  ;;  %v22_v2 = vmul.f32 %v14_v0, %v14_v0  ;;  %v23_v3 = vmul.f32 %v15_v1, %v15_v1  ;;  %v66_v20 = vld [vmem:[%s111_s1] ss:$0 sm:$0xff] }
   0x3   :  { %v67_v22 = vld [vmem:[%s112_s2] ss:$0 sm:$0xff] }
   0x4   :  { %24 = vadd.xlane.f32.xlu1 %v22_v2 }
   0x6   :  { %18 = vadd.xlane.f32.xlu0 %v15_v1 }
   0x8   :  { %26 = vadd.xlane.f32.xlu1 %v23_v3 }
  0x8f   :  { %v17_v4 = vpop.xlane.xlu0 %16 }
  0x90   :  { %v20_v5 = vmul.f32 0.03125, %v17_v4 }
  0x91   :  { %v25_v6 = vpop.xlane.xlu1 %24 }
  0x92   :  { %v30_v7 = vmul.f32 %v20_v5, %v20_v5  ;;  %v28_v8 = vmul.f32 0.03125, %v25_v6  ;;  %v38_v18 = vsub.f32 %v14_v0, %v20_v5 }
  0x93   :  { %v19_v9 = vpop.xlane.xlu0 %18 }
  0x94   :  { %v32_v10 = vsub.f32 %v28_v8, %v30_v7  ;;  %v21_v11 = vmul.f32 0.03125, %v19_v9 }
  0x95   :  { %v27_v12 = vpop.xlane.xlu1 %26 }
  0x96   :  { %v34_v13 = vadd.f32 1e-05, %v32_v10  ;;  %v31_v14 = vmul.f32 %v21_v11, %v21_v11  ;;  %v29_v15 = vmul.f32 0.03125, %v27_v12  ;;  %v39_v24 = vsub.f32 %v15_v1, %v21_v11 }
  0x98   :  { %68 = vrsqrt.f32 %v34_v13  ;;  %v33_v16 = vsub.f32 %v29_v15, %v31_v14 }
  0x9a   :  { %v35_v17 = vadd.f32 1e-05, %v33_v16 }
  0x9c   :  { %70 = vrsqrt.f32 %v35_v17 }
  0xa2   :  { %v69_v19 = vpop.eup %68 }
  0xa3   :  { %v40_v21 = vmul.f32 %v69_v19, %v38_v18 }
  0xa5   :  { %v49_v23 = vmul.f32 %v66_v20, %v40_v21 }
  0xa6   :  { %v71_v25 = vpop.eup %70 }
  0xa7   :  { %v58_v26 = vadd.f32 %v67_v22, %v49_v23  ;;  %v41_v27 = vmul.f32 %v71_v25, %v39_v24 }
  0xa9   :  { %60 = vst [vmem:[%s113_s3] sm:$0xff] %v58_v26  ;;  %v50_v28 = vmul.f32 %v66_v20, %v41_v27 }
  0xab   :  { %v59_v29 = vadd.f32 %v67_v22, %v50_v28 }
  0xad   :  { %61 = vst [vmem:[%s113_s3 + $0x8] sm:$0xff] %v59_v29 }

// kernel: seq2seq_forward.46
= control target key start
LH: loop header
LB: loop body
LE: loop exit
PB: predicated region body
PF: predicated region fallthrough
CT: control target
= control target key end

     0   :  { %v217_v0 = vmov 0.0   ;;  %vm218_vm0 = vmmov 0   ;;  %s286_s1 = inlined_call_operand.vmem [shape: bf16[128,128], index: 1, kind: input, shape index: {}]   ;;  %s287_s0 = inlined_call_operand.vmem [shape: bf16[16,128], index: 0, kind: input, shape index: {}]   ;;  %s288_s2 = inlined_call_operand.vmem [shape: f32[1,128], index: 2, kind: input, shape index: {}]   ;;  %s289_s3 = inlined_call_operand.vmem [shape: f32[16,128], index: 3, kind: input, shape index: {}]   ;;  %s290_s4 = inlined_call_operand.vmem [shape: f32[16,128], index: 4, kind: output, shape index: {}]  }
   0x1   :  { %186 = vmatprep.subr.bf16.mxu0 %v217_v0  ;;  %v208_v1 = vld [vmem:[%s286_s1] sm:$0xff]   ;;  %202 = vmatprep.mubr.msk.bf16.mxu0 %vm218_vm0, %v217_v0  ;;  %v209_v2 = vld [vmem:[%s286_s1 + $0x8] sm:$0xff]   ;;  %v210_v3 = vld [vmem:[%s286_s1 + $0x10] sm:$0xff]  }
   0x2   :  { %187 = vmatpush3.bf16.msra.mxu0 %v208_v1  ;;  %v211_v4 = vld [vmem:[%s286_s1 + $0x18] sm:$0xff]   ;;  %v212_v5 = vld [vmem:[%s286_s1 + $0x20] sm:$0xff]   ;;  %v213_v6 = vld [vmem:[%s286_s1 + $0x28] sm:$0xff]  }
   0x3   :  { %188 = vmatprep.subr.bf16.mxu0 %v217_v0  ;;  %v214_v7 = vld [vmem:[%s286_s1 + $0x30] sm:$0xff]   ;;  %v215_v8 = vld [vmem:[%s286_s1 + $0x38] sm:$0xff]   ;;  %v216_v9 = vld [vmem:[%s287_s0] sm:$0xff]  }
   0x4   :  { %v176_v10 = vld [vmem:[%s288_s2] ss:$0 sm:$0xff]  ;;  %v158_v16 = vld [vmem:[%s289_s3 + $0x8] sm:$0xff] }
   0x5   :  { %v157_v12 = vld [vmem:[%s289_s3] sm:$0xff] }
   0x6   :  { %189 = vmatpush3.bf16.msra.mxu0 %v209_v2 }
   0x7   :  { %190 = vmatprep.subr.bf16.mxu0 %v217_v0 }
   0xa   :  { %191 = vmatpush3.bf16.msra.mxu0 %v210_v3 }
   0xb   :  { %192 = vmatprep.subr.bf16.mxu0 %v217_v0 }
   0xe   :  { %193 = vmatpush3.bf16.msra.mxu0 %v211_v4 }
   0xf   :  { %194 = vmatprep.subr.bf16.mxu0 %v217_v0 }
  0x12   :  { %195 = vmatpush3.bf16.msra.mxu0 %v212_v5 }
  0x13   :  { %196 = vmatprep.subr.bf16.mxu0 %v217_v0 }
  0x16   :  { %197 = vmatpush3.bf16.msra.mxu0 %v213_v6 }
  0x17   :  { %198 = vmatprep.subr.bf16.mxu0 %v217_v0 }
  0x1a   :  { %199 = vmatpush3.bf16.msra.mxu0 %v214_v7 }
  0x1b   :  { %200 = vmatprep.subr.bf16.mxu0 %v217_v0 }
  0x1e   :  { %201 = vmatpush3.bf16.msra.mxu0 %v215_v8 }
  0x21   :  { %203 = vmatmul.mubr.bf16.vlgmr.msra.gmra.mrb[0].mxu0 %v216_v9 }
  0xf4   :  { %v132_v11 = vpop.f32.mrb[0].mxu0 }
  0xf5   :  { %v155_v13 = vadd.f32 %v176_v10, %v132_v11  ;;  %v204_v14 = vpop.f32.mrb[1].mxu0 }
  0xf6   :  { %v135_v15 = vpop.f32.mrb[2].mxu0 }
  0xf7   :  { %v159_v17 = vadd.f32 %v157_v12, %v155_v13  ;;  %v156_v18 = vadd.f32 %v176_v10, %v135_v15  ;;  %v205_v19 = vpop.f32.mrb[3].mxu0 }
  0xf9   :  { %161 = vst [vmem:[%s290_s4] sm:$0xff] %v159_v17  ;;  %v160_v20 = vadd.f32 %v158_v16, %v156_v18 }
  0xfb   :  { %162 = vst [vmem:[%s290_s4 + $0x8] sm:$0xff] %v160_v20 }

// kernel: seq2seq_forward.61
= control target key start
LH: loop header
LB: loop body
LE: loop exit
PB: predicated region body
PF: predicated region fallthrough
CT: control target
= control target key end

     0   :  { %s706_s12 = smov 0   ;;  %s708_s13 = smov 0   ;;  %s773_s0 = inlined_call_operand.vmem [shape: f32[2,8,128], index: 0, kind: input, shape index: {}]   ;;  %s774_s1 = inlined_call_operand.vmem [shape: bf16[8,128,8], index: 1, kind: input, shape index: {}]   ;;  %s775_s2 = inlined_call_operand.vmem [shape: f32[8,1,8], index: 2, kind: input, shape index: {}]   ;;  %s776_s3 = inlined_call_operand.vmem [shape: bf16[2,8,8,8], index: 3, kind: output, shape index: {}]  }
   0x1   :  { %s710_s14 = smov 0   ;;  %s712_s15 = smov 0  }
   0x2   :  { %s714_s16 = smov 0  }
   0x3 LB: > { %s35_s17 = sadd.s32 1, %s674_s14  ;;  %s39_s18 = sadd.s32 1, %s678_s15  ;;  %s682_s16 = sphi %s714_s16, %s13_s16   ;;  %s678_s15 = sphi %s712_s15, %s780_s15   ;;  %s674_s14 = sphi %s710_s14, %s779_s14   ;;  %s670_s13 = sphi %s708_s13, %s778_s13   ;;  %s666_s12 = sphi %s706_s12, %s777_s12  }
   0x4   : > { %p37_p0 = scmp.ge.s32.totalorder %s35_s17, 8  ;;  %p547_p1 = scmp.ge.s32.totalorder %s682_s16, 1 }
   0x5   : > { %p201_p2 = scmp.lt.s32.totalorder %s682_s16, 17 }
   0x6   : > { %s782_s17 = smov (%p37_p0, %s35_s17), 0  ;;  %s784_s18 = smov (!%p37_p0, %s39_s18), %s678_s15 }
   0x7   : > { %p202_p3 = pnand %p547_p1, %p201_p2  ;;  %p41_p4 = scmp.ge.s32.totalorder %s784_s18, 2 }
   0x8   : > { %p259_p5 = scmp.lt.s32.totalorder (!%p202_p3), %s666_s12, 7  ;;  %p248_p6 = scmp.lt.s32.totalorder (!%p202_p3), %s670_s13, 1  ;;  %vm287_vm0 = vcmask (!%p202_p3), 64512   ;;  %v684_v0 = vmov (!%p202_p3), 0.0   ;;  %vm685_vm1 = vmmov (!%p202_p3), 0   ;;  %vm412_vm2 = vcmask (!%p202_p3), 60416  }
   0x9   : > { %s786_s18 = smov (%p41_p4, %s784_s18), 0  ;;  %205 = sbr.rel (%p202_p3) target bundleno = 278 (0x116), region = 32 }
   0xa   : > { %574 = vmatprep.subr.bf16.mxu0 (!%p202_p3), %v684_v0  ;;  %590 = vmatprep.mubr.msk.bf16.mxu0 (!%p202_p3), %vm685_vm1, %v684_v0  ;;  %288 = vst.msk [vmem:[#allocation2] sm:$0xff] (!%p202_p3), %vm287_vm0, %v684_v0 }
  0x10   : > { %s788_s12 = smov (!%p259_p5, %s666_s12), 7  ;;  %s790_s13 = smov (!%p248_p6, %s670_s13), 1 }
  0x11   : > { %s564_s19 = sshll.u32 %s788_s12, 6  ;;  %s548_s23 = sshll.u32 %s790_s13, 3  ;;  %v289_v11 = vld [vmem:[#allocation2] sm:$0xff] }
  0x12   : > { %s266_s22 = scalar_lea.vmem %s774_s1, %s564_s19  ;;  %s744_s24 = sadd.s32 %s548_s23, %s788_s12 }
  0x13   : > { %v636_v1 = vld [vmem:[%s266_s22] sm:$0xff]   ;;  %v637_v2 = vld [vmem:[%s266_s22 + $0x8] sm:$0xff]   ;;  %v638_v3 = vld [vmem:[%s266_s22 + $0x10] sm:$0xff]   ;;  %s257_s27 = scalar_lea.vmem %s773_s0, %s548_s23  ;;  %s270_s30 = scalar_lea.vmem %s775_s2, %s788_s12 }
  0x14   : > { %575 = vmatpush3.bf16.msra.mxu0 %v636_v1  ;;  %v639_v4 = vld [vmem:[%s266_s22 + $0x18] sm:$0xff]   ;;  %v640_v5 = vld [vmem:[%s266_s22 + $0x20] sm:$0xff]   ;;  %v641_v6 = vld [vmem:[%s266_s22 + $0x28] sm:$0xff]   ;;  %s552_s4 = sshll.u32 %s744_s24, 2 }
  0x15   : > { %576 = vmatprep.subr.bf16.mxu0 %v684_v0  ;;  %v642_v7 = vld [vmem:[%s266_s22 + $0x30] sm:$0xff]   ;;  %v643_v8 = vld [vmem:[%s266_s22 + $0x38] sm:$0xff]   ;;  %v290_v9 = vld [vmem:[%s257_s27] sm:$0xff]  ;;  %s281_s7 = scalar_lea.vmem %s776_s3, %s552_s4 }
  0x16   : > { %v291_v10 = vpack.c.bf16 %v290_v9, %v290_v9  ;;  %v561_v17 = vld [vmem:[%s270_s30] ss:$0 sm:$0xff] }
  0x18   : > { %577 = vmatpush3.bf16.msra.mxu0 %v637_v2 }
  0x19   : > { %578 = vmatprep.subr.bf16.mxu0 %v684_v0 }
  0x1c   : > { %579 = vmatpush3.bf16.msra.mxu0 %v638_v3 }
  0x1d   : > { %580 = vmatprep.subr.bf16.mxu0 %v684_v0 }
  0x20   : > { %581 = vmatpush3.bf16.msra.mxu0 %v639_v4 }
  0x21   : > { %582 = vmatprep.subr.bf16.mxu0 %v684_v0 }
  0x24   : > { %583 = vmatpush3.bf16.msra.mxu0 %v640_v5 }
  0x25   : > { %584 = vmatprep.subr.bf16.mxu0 %v684_v0 }
  0x28   : > { %585 = vmatpush3.bf16.msra.mxu0 %v641_v6 }
  0x29   : > { %586 = vmatprep.subr.bf16.mxu0 %v684_v0 }
  0x2c   : > { %587 = vmatpush3.bf16.msra.mxu0 %v642_v7 }
  0x2d   : > { %588 = vmatprep.subr.bf16.mxu0 %v684_v0 }
  0x30   : > { %589 = vmatpush3.bf16.msra.mxu0 %v643_v8 }
  0x33   : > { %591 = vmatmul.mubr.bf16.vlgmr.msra.gmra.mrb[0].mxu0 %v291_v10 }
 0x106   : > { %v390_v12 = vpop.f32.mrb[0].mxu0 }
 0x107   : > { %v396_v13 = vadd.f32 %v390_v12, %v289_v11  ;;  %v592_v14 = vpop.f32.mrb[1].mxu0 }
 0x108   : > { %v393_v15 = vpop.f32.mrb[2].mxu0 }
 0x109   : > { %398 = vst.msk [vmem:[#allocation2] sm:$0xff] %vm287_vm0, %v396_v13  ;;  %v593_v16 = vpop.f32.mrb[3].mxu0 }
 0x110   : > { %v402_v18 = vld [vmem:[#allocation2] sm:$0xff] }
 0x111   : > { %v410_v19 = vadd.f32 %v561_v17, %v402_v18 }
 0x113   : > { %v411_v20 = vpack.c.bf16 %v410_v19, %v410_v19 }
 0x115   : > { %413 = vst.msk [vmem:[%s281_s7] sm:$0xf] %vm412_vm2, %v411_v20 }
 0x116 PF: > { %s13_s16 = sadd.s32 1, %s682_s16   ;;  %s777_s12 = smov %s674_s14 }
 0x117   : > { %p10_p7 = scmp.ge.s32.totalorder %s13_s16, 18   ;;  %s778_s13 = smov %s678_s15 }
 0x118   : > { %s779_s14 = smov %s782_s17  ;;  %s780_s15 = smov %s786_s18 }
 0x119   :  { %12 = sbr.rel (!%p10_p7) target bundleno = 3 (0x3), region = 76 }

// kernel: seq2seq_forward.45
= control target key start
LH: loop header
LB: loop body
LE: loop exit
PB: predicated region body
PF: predicated region fallthrough
CT: control target
= control target key end

     0   :  { %v222_v0 = vmov 0.0   ;;  %vm223_vm0 = vmmov 0   ;;  %s280_s1 = inlined_call_operand.vmem [shape: bf16[128,128], index: 1, kind: input, shape index: {}]   ;;  %s281_s0 = inlined_call_operand.vmem [shape: f32[16,128], index: 0, kind: input, shape index: {}]   ;;  %s282_s2 = inlined_call_operand.vmem [shape: f32[1,128], index: 2, kind: input, shape index: {}]   ;;  %s283_s3 = inlined_call_operand.vmem [shape: bf16[16,128], index: 3, kind: output, shape index: {}]  }
   0x1   :  { %192 = vmatprep.subr.bf16.mxu0 %v222_v0  ;;  %v214_v1 = vld [vmem:[%s280_s1] sm:$0xff]   ;;  %208 = vmatprep.mubr.msk.bf16.mxu0 %vm223_vm0, %v222_v0  ;;  %v215_v2 = vld [vmem:[%s280_s1 + $0x8] sm:$0xff]   ;;  %v216_v3 = vld [vmem:[%s280_s1 + $0x10] sm:$0xff]  }
   0x2   :  { %193 = vmatpush3.bf16.msra.mxu0 %v214_v1  ;;  %v217_v4 = vld [vmem:[%s280_s1 + $0x18] sm:$0xff]   ;;  %v218_v5 = vld [vmem:[%s280_s1 + $0x20] sm:$0xff]   ;;  %v219_v6 = vld [vmem:[%s280_s1 + $0x28] sm:$0xff]  }
   0x3   :  { %194 = vmatprep.subr.bf16.mxu0 %v222_v0  ;;  %v220_v7 = vld [vmem:[%s280_s1 + $0x30] sm:$0xff]   ;;  %v221_v8 = vld [vmem:[%s280_s1 + $0x38] sm:$0xff]   ;;  %v23_v9 = vld [vmem:[%s281_s0] sm:$0xff] }
   0x4   :  { %v24_v10 = vld [vmem:[%s281_s0 + $0x8] sm:$0xff]  ;;  %v173_v12 = vld [vmem:[%s282_s2] ss:$0 sm:$0xff] }
   0x5   :  { %v25_v11 = vpack.c.bf16 %v24_v10, %v23_v9 }
   0x6   :  { %195 = vmatpush3.bf16.msra.mxu0 %v215_v2 }
   0x7   :  { %196 = vmatprep.subr.bf16.mxu0 %v222_v0 }
   0xa   :  { %197 = vmatpush3.bf16.msra.mxu0 %v216_v3 }
   0xb   :  { %198 = vmatprep.subr.bf16.mxu0 %v222_v0 }
   0xe   :  { %199 = vmatpush3.bf16.msra.mxu0 %v217_v4 }
   0xf   :  { %200 = vmatprep.subr.bf16.mxu0 %v222_v0 }
  0x12   :  { %201 = vmatpush3.bf16.msra.mxu0 %v218_v5 }
  0x13   :  { %202 = vmatprep.subr.bf16.mxu0 %v222_v0 }
  0x16   :  { %203 = vmatpush3.bf16.msra.mxu0 %v219_v6 }
  0x17   :  { %204 = vmatprep.subr.bf16.mxu0 %v222_v0 }
  0x1a   :  { %205 = vmatpush3.bf16.msra.mxu0 %v220_v7 }
  0x1b   :  { %206 = vmatprep.subr.bf16.mxu0 %v222_v0 }
  0x1e   :  { %207 = vmatpush3.bf16.msra.mxu0 %v221_v8 }
  0x21   :  { %209 = vmatmul.mubr.bf16.vlgmr.msra.gmra.mrb[0].mxu0 %v25_v11 }
  0xf4   :  { %v124_v13 = vpop.f32.mrb[0].mxu0 }
  0xf5   :  { %v147_v14 = vadd.f32 %v173_v12, %v124_v13  ;;  %v210_v15 = vpop.f32.mrb[1].mxu0 }
  0xf6   :  { %v127_v16 = vpop.f32.mrb[2].mxu0 }
  0xf7   :  { %v148_v17 = vadd.f32 %v173_v12, %v127_v16  ;;  %v211_v18 = vpop.f32.mrb[3].mxu0  ;;  %v149_v19 = vmax.f32 %v147_v14, 0.0 }
  0xf9   :  { %v150_v20 = vmax.f32 %v148_v17, 0.0 }
  0xfb   :  { %v181_v21 = vpack.c.bf16 %v150_v20, %v149_v19 }
  0xfd   :  { %182 = vst [vmem:[%s283_s3] sm:$0xff] %v181_v21  }

// kernel: seq2seq_forward.62
= control target key start
LH: loop header
LB: loop body
LE: loop exit
PB: predicated region body
PF: predicated region fallthrough
CT: control target
= control target key end

     0   :  { %s966_s15 = smov 0   ;;  %s968_s16 = smov 0   ;;  %s1064_s0 = inlined_call_operand.vmem [shape: bf16[2,4,10,8], index: 0, kind: input, shape index: {}]   ;;  %s1065_s1 = inlined_call_operand.vmem [shape: bf16[2,8,8,8], index: 1, kind: input, shape index: {}, may-alias: {1,2}]   ;;  %s1066_s2 = inlined_call_operand.vmem [shape: bf16[2,8,8,8], index: 2, kind: input, shape index: {}, may-alias: {1,2}]   ;;  %s1067_s3 = inlined_call_operand.vmem [shape: f32[2,1,8], index: 3, kind: input, shape index: {}]   ;;  %s1068_s4 = inlined_call_operand.vmem [shape: bf16[2,4,10,8], index: 4, kind: output, shape index: {}]  }
   0x1   :  { %s970_s17 = smov 0   ;;  %s972_s18 = smov 0  }
   0x2   :  { %s974_s19 = smov 0  }
   0x3 LB: > { %s36_s20 = sadd.s32 1, %s927_s17  ;;  %s40_s21 = sadd.s32 1, %s931_s18  ;;  %s935_s19 = sphi %s974_s19, %s14_s19   ;;  %s931_s18 = sphi %s972_s18, %s1072_s18   ;;  %s927_s17 = sphi %s970_s17, %s1071_s17   ;;  %s923_s16 = sphi %s968_s16, %s1070_s16   ;;  %s919_s15 = sphi %s966_s15, %s1069_s15  }
   0x4   : > { %p38_p0 = scmp.ge.s32.totalorder %s36_s20, 4  ;;  %p801_p1 = scmp.ge.s32.totalorder %s935_s19, 1 }
   0x5   : > { %p262_p2 = scmp.lt.s32.totalorder %s935_s19, 9 }
   0x6   : > { %s1074_s20 = smov (%p38_p0, %s36_s20), 0  ;;  %s1076_s21 = smov (!%p38_p0, %s40_s21), %s931_s18 }
   0x7   : > { %p263_p3 = pnand %p801_p1, %p262_p2  ;;  %p42_p4 = scmp.ge.s32.totalorder %s1076_s21, 2 }
   0x8   : > { %p334_p5 = scmp.lt.s32.totalorder (!%p263_p3), %s923_s16, 1  ;;  %p336_p6 = scmp.lt.s32.totalorder (!%p263_p3), %s919_s15, 3  ;;  %vm402_vm0 = vcmask (!%p263_p3), 64512   ;;  %v937_v0 = vmov (!%p263_p3), 0.0   ;;  %vm938_vm1 = vmmov (!%p263_p3), 0   ;;  %vm404_vm2 = vcmask (!%p263_p3), 58368  }
   0x9   : > { %s1078_s21 = smov (%p42_p4, %s1076_s21), 0  ;;  %266 = sbr.rel (%p263_p3) target bundleno = 842 (0x34a), region = 36 }
   0xa   : > { %826 = vmatprep.subr.bf16.mxu0 (!%p263_p3), %v937_v0  ;;  %403 = vst.msk [vmem:[#allocation4] sm:$0xff] (!%p263_p3), %vm402_vm0, %v937_v0  ;;  %828 = vmatprep.mubr.msk.bf16.mxu0 (!%p263_p3), %vm938_vm1, %v937_v0  ;;  %p349_p7 = scmp.lt.s32.totalorder (!%p263_p3), %s919_s15, 7  ;;  %vm396_vm3 = vcmask (!%p263_p3), 7168   ;;  %v939_v4 = vmov (!%p263_p3), -1e+30   ;;  %vm398_vm4 = vcmask (!%p263_p3), 1024  }
   0xb   : > { %832 = vmatprep.subr.bf16.mxu1 (!%p263_p3), %v937_v0  ;;  %834 = vmatprep.mubr.msk.bf16.mxu1 (!%p263_p3), %vm938_vm1, %v937_v0  ;;  %405 = vst.msk [vmem:[#allocation4 + $0x8] sm:$0x3] (!%p263_p3), %vm404_vm2, %v937_v0  ;;  %v940_v16 = vmov (!%p263_p3), 0   ;;  %s358_s13 = sadd.s32 (!%p263_p3), 4, %s919_s15  ;;  %vm541_vm5 = vcmask (!%p263_p3), 1043456   ;;  %vm621_vm6 = vcmask (!%p263_p3), 60416  }
   0xc   : > { %397 = vst.msk [vmem:[#allocation2] sm:$0xff] (!%p263_p3), %vm396_vm3, %v939_v4  ;;  %400 = vst.msk [vmem:[#allocation3] sm:$0xff] (!%p263_p3), %vm396_vm3, %v937_v0  ;;  %882 = vset.pattern.permute.xlu1 (!%p263_p3), %v940_v16  ;;  %883 = vset.pattern.permute.xlu0 (!%p263_p3), %v940_v16  ;;  %p361_p8 = scmp.lt.s32.totalorder (!%p263_p3), %s358_s13, 7  ;;  %vm623_vm7 = vcmask (!%p263_p3), 57344  }
   0xd   : > { %399 = vst.msk [vmem:[#allocation2 + $0x8] sm:$0x3] (!%p263_p3), %vm398_vm4, %v939_v4  ;;  %401 = vst.msk [vmem:[#allocation3 + $0x8] sm:$0x3] (!%p263_p3), %vm398_vm4, %v937_v0 }
  0x10   : > { %s1080_s16 = smov (!%p334_p5, %s923_s16), 1  ;;  %s1082_s13 = smov (!%p361_p8, %s358_s13), 7 }
  0x11   : > { %s337_s22 = scalar_select %p336_p6, %s919_s15, 3  ;;  %v523_v54 = vld [vmem:[#allocation4] sm:$0xff] }
  0x12   : > { %s1002_s24 = sshll.u32 %s1080_s16, 3  ;;  %s376_s12 = scalar_lea.vmem %s1067_s3, %s1080_s16  ;;  %v524_v56 = vld [vmem:[#allocation4 + $0x8] sm:$0x3] }
  0x13   : > { %s802_s23 = sshll.u32 %s337_s22, 1  ;;  %v814_v6 = vld [vmem:[%s376_s12] ss:$0 sm:$0xff]  ;;  %s367_s14 = sadd.s32 %s1002_s24, %s1082_s13  ;;  %v507_v42 = vld [vmem:[#allocation3] sm:$0xff] }
  0x14   : > { %s1005_s25 = sadd.s32 %s1002_s24, %s802_s23  ;;  %v474_v17 = vld [vmem:[#allocation2] sm:$0xff]  ;;  %v475_v20 = vld [vmem:[#allocation2 + $0x8] sm:$0x3]  ;;  %s808_s16 = sshll.u32 %s367_s14, 2  ;;  %v508_v45 = vld [vmem:[#allocation3 + $0x8] sm:$0x3] }
  0x15   : > { %s804_s26 = sshll.u32 %s1005_s25, 2  ;;  %s369_s27 = scalar_lea.vmem %s1066_s2, %s808_s16 }
  0x16   : > { %s345_s29 = scalar_lea.vmem %s1064_s0, %s804_s26  ;;  %v409_v25 = vld [vmem:[%s369_s27] sm:$0xf]  ;;  %s389_s28 = scalar_lea.vmem %s1068_s4, %s804_s26 }
  0x17   : > { %s350_s30 = scalar_select %p349_p7, %s919_s15, 7  ;;  %v884_v3 = vld [vmem:[%s345_s29] sm:$0x1f]   ;;  %v543_v26 = vsel %vm541_vm5, %v409_v25, 0 }
  0x18   : > { %833 = vmatpush3.bf16.msra.mxu1 %v543_v26 }
  0x19   : > { %s355_s5 = sadd.s32 %s1002_s24, %s350_s30 }
  0x1a   : > { %s806_s6 = sshll.u32 %s355_s5, 2 }
  0x1b   : > { %s357_s9 = scalar_lea.vmem %s1065_s1, %s806_s6 }
  0x1c   : > { %v408_v1 = vld [vmem:[%s357_s9] sm:$0xf] }
  0x1d   : > { %v420_v2 = vsel %vm402_vm0, %v408_v1, 0 }
  0x1e   : > { %827 = vmatpush3.bf16.xpose.msra.mxu0 %v420_v2 }
  0x25   : > { %829 = vmatmul.mubr.msk.bf16.vlgmr.msra.gmra.mrb[0].mxu0 %vm402_vm0, %v884_v3 }
  0xf8   : > { %v456_v5 = vpop.f32.mrb[0].mxu0 }
  0xf9   : > { %v463_v7 = vmul.f32 0.35355338, %v456_v5  ;;  %v830_v8 = vpop.f32.mrb[1].mxu0 }
  0xfa   : > { %v459_v9 = vpop.f32.mrb[2].mxu0 }
  0xfb   : > { %v464_v10 = vmul.f32 0.35355338, %v459_v9  ;;  %v831_v11 = vpop.f32.mrb[3].mxu0  ;;  %v472_v12 = vadd.f32 %v814_v6, %v463_v7 }
  0xfd   : > { %v476_v13 = vsel %vm402_vm0, %v472_v12, -inf  ;;  %v473_v14 = vadd.f32 %v814_v6, %v464_v10 }
  0xfe   : > { %477 = vmax.xlane.f32.xlu0 %v476_v13 }
  0xff   : > { %v480_v15 = vsel %vm404_vm2, %v473_v14, -inf }
 0x102   : > { %481 = vmax.xlane.f32.xlu0 %v480_v15 }
 0x18b   : > { %v478_v18 = vpop.xlane.xlu0 %477 }
 0x18c   : > { %v483_v19 = vmax.f32 %v474_v17, %v478_v18 }
 0x18e   : > { %v485_v21 = vsub.f32 %v474_v17, %v483_v19  ;;  %590 = vst.msk [vmem:[#allocation2] sm:$0xff] %vm396_vm3, %v483_v19  ;;  %493 = vperm.xlu1 %882, %v483_v19  }
 0x18f   : > { %v482_v22 = vpop.xlane.xlu0 %481 }
 0x190   : > { %v484_v23 = vmax.f32 %v475_v20, %v482_v22  ;;  %v487_v39 = vmul.f32 1.442695, %v485_v21 }
 0x192   : > { %v486_v24 = vsub.f32 %v475_v20, %v484_v23  ;;  %591 = vst.msk [vmem:[#allocation2 + $0x8] sm:$0x3] %vm398_vm4, %v484_v23  ;;  %498 = vperm.xlu1 %882, %v484_v23  }
 0x194   : > { %v489_v38 = vmul.f32 1.442695, %v486_v24 }
 0x20d   : > { %v494_v27 = vpop.permute.xlu1 %493 }
 0x20e   : > { %v501_v28 = vsub.f32 %v472_v12, %v494_v27 }
 0x210   : > { %v503_v29 = vmul.f32 1.442695, %v501_v28 }
 0x211   : > { %v499_v30 = vpop.permute.xlu1 %498 }
 0x212   : > { %885 = vpow2.f32 %v503_v29  ;;  %v502_v31 = vsub.f32 %v473_v14, %v499_v30 }
 0x214   : > { %v505_v32 = vmul.f32 1.442695, %v502_v31 }
 0x216   : > { %887 = vpow2.f32 %v505_v32 }
 0x217   : > { %889 = vpow2.f32 %v489_v38 }
 0x218   : > { %891 = vpow2.f32 %v487_v39 }
 0x21c   : > { %v886_v33 = vpop.eup %885 }
 0x21d   : > { %v511_v34 = vsel %vm402_vm0, %v886_v33, 0.0 }
 0x21e   : > { %512 = vadd.xlane.f32.xlu0 %v511_v34 }
 0x220   : > { %v888_v35 = vpop.eup %887 }
 0x221   : > { %v514_v36 = vsel %vm404_vm2, %v888_v35, 0.0  ;;  %v537_v37 = vpack.c.bf16 %v888_v35, %v886_v33  ;;  %v890_v40 = vpop.eup %889 }
 0x222   : > { %515 = vadd.xlane.f32.xlu1 %v514_v36  ;;  %v892_v41 = vpop.eup %891  ;;  %v510_v47 = vmul.f32 %v890_v40, %v508_v45 }
 0x223   : > { %835 = vmatmul.mubr.msk.bf16.vlgmr.msra.gmra.mrb[0].mxu1 %vm402_vm0, %v537_v37  ;;  %v509_v43 = vmul.f32 %v892_v41, %v507_v42 }
 0x233   : > { %532 = vperm.xlu1 %882, %v890_v40  }
 0x234   : > { %527 = vperm.xlu0 %883, %v892_v41  }
 0x2ab   : > { %v513_v44 = vpop.xlane.xlu0 %512 }
 0x2ac   : > { %v517_v46 = vadd.f32 %v513_v44, %v509_v43 }
 0x2ae   : > { %520 = vst.msk [vmem:[#allocation3] sm:$0xff] %vm396_vm3, %v517_v46 }
 0x2af   : > { %v516_v48 = vpop.xlane.xlu1 %515 }
 0x2b0   : > { %v518_v49 = vadd.f32 %v516_v48, %v510_v47 }
 0x2b2   : > { %522 = vst.msk [vmem:[#allocation3 + $0x8] sm:$0x3] %vm398_vm4, %v518_v49 }
 0x2b3   : > { %v528_v55 = vpop.permute.xlu0 %527  ;;  %v533_v57 = vpop.permute.xlu1 %532 }
 0x2b4   : > { %v535_v58 = vmul.f32 %v528_v55, %v523_v54  ;;  %v536_v60 = vmul.f32 %v533_v57, %v524_v56 }
 0x2b5   : > { %v597_v50 = vld [vmem:[#allocation3] sm:$0xff] }
 0x2b6   : > { %893 = vrcp.f32 %v597_v50 }
 0x2b9   : > { %v598_v51 = vld [vmem:[#allocation3 + $0x8] sm:$0x3] }
 0x2ba   : > { %895 = vrcp.f32 %v598_v51 }
 0x2c0   : > { %v894_v52 = vpop.eup %893 }
 0x2c1   : > { %603 = vperm.xlu0 %883, %v894_v52  }
 0x2c4   : > { %v896_v53 = vpop.eup %895 }
 0x2c5   : > { %608 = vperm.xlu0 %883, %v896_v53  }
 0x2f6   : > { %v579_v59 = vpop.f32.mrb[0].mxu1 }
 0x2f7   : > { %v586_v61 = vadd.f32 %v579_v59, %v535_v58  ;;  %v836_v62 = vpop.f32.mrb[1].mxu1 }
 0x2f8   : > { %v582_v63 = vpop.f32.mrb[2].mxu1 }
 0x2f9   : > { %588 = vst.msk [vmem:[#allocation4] sm:$0xff] %vm402_vm0, %v586_v61  ;;  %v587_v0 = vadd.f32 %v582_v63, %v536_v60  ;;  %v837_v1 = vpop.f32.mrb[3].mxu1 }
 0x2fb   : > { %589 = vst.msk [vmem:[#allocation4 + $0x8] sm:$0x3] %vm404_vm2, %v587_v0 }
 0x300   : > { %v595_v2 = vld [vmem:[#allocation4] sm:$0xff] }
 0x302   : > { %v596_v6 = vld [vmem:[#allocation4 + $0x8] sm:$0x3] }
 0x340   : > { %v604_v3 = vpop.permute.xlu0 %603 }
 0x341   : > { %v611_v4 = vmul.f32 %v604_v3, %v595_v2 }
 0x343   : > { %v820_v5 = vpack.c.bf16 %v611_v4, %v611_v4 }
 0x344   : > { %v609_v7 = vpop.permute.xlu0 %608 }
 0x345   : > { %622 = vst.msk [vmem:[%s389_s28] sm:$0xf] %vm621_vm6, %v820_v5  ;;  %v612_v8 = vmul.f32 %v609_v7, %v596_v6 }
 0x347   : > { %v821_v9 = vpack.c.bf16 %v612_v8, %v612_v8 }
 0x349   : > { %624 = vst.msk [vmem:[%s389_s28 + $0x4] sm:$0x1] %vm623_vm7, %v821_v9 }
 0x34a PF: > { %s14_s19 = sadd.s32 1, %s935_s19   ;;  %s1069_s15 = smov %s927_s17 }
 0x34b   : > { %p11_p9 = scmp.ge.s32.totalorder %s14_s19, 10   ;;  %s1070_s16 = smov %s931_s18 }
 0x34c   : > { %s1071_s17 = smov %s1074_s20  ;;  %s1072_s18 = smov %s1078_s21 }
 0x34d   :  { %13 = sbr.rel (!%p11_p9) target bundleno = 3 (0x3), region = 83 }

// kernel: seq2seq_forward.65
= control target key start
LH: loop header
LB: loop body
LE: loop exit
PB: predicated region body
PF: predicated region fallthrough
CT: control target
= control target key end

     0   :  { %v246_v1 = vmov 0.0   ;;  %s309_s1 = inlined_call_operand.vmem [shape: bf16[128,128], index: 1, kind: input, shape index: {}]   ;;  %s310_s0 = inlined_call_operand.vmem [shape: f32[20,128], index: 0, kind: input, shape index: {}]   ;;  %s311_s2 = inlined_call_operand.vmem [shape: f32[1,128], index: 2, kind: input, shape index: {}]   ;;  %s312_s3 = inlined_call_operand.vmem [shape: bf16[20,128], index: 3, kind: output, shape index: {}]  }
   0x1   :  { %v238_v0 = vld [vmem:[%s309_s1] sm:$0xff]   ;;  %21 = vst [vmem:[#allocation2 + $0x10] sm:$0xf] %v246_v1  ;;  %v239_v2 = vld [vmem:[%s309_s1 + $0x8] sm:$0xff]   ;;  %v240_v3 = vld [vmem:[%s309_s1 + $0x10] sm:$0xff]  }
   0x2   :  { %217 = vmatprep.subr.bf16.mxu0 %v238_v0  ;;  %v241_v4 = vld [vmem:[%s309_s1 + $0x18] sm:$0xff]   ;;  %v25_v5 = vld [vmem:[%s310_s0] sm:$0xff]  ;;  %v26_v6 = vld [vmem:[%s310_s0 + $0x8] sm:$0xff] }
   0x3   :  { %218 = vmatpush3.bf16.msra.mxu0 %v238_v0  ;;  %v28_v7 = vpack.c.bf16 %v26_v6, %v25_v5  ;;  %v242_v8 = vld [vmem:[%s309_s1 + $0x20] sm:$0xff]   ;;  %v243_v9 = vld [vmem:[%s309_s1 + $0x28] sm:$0xff]   ;;  %v244_v10 = vld [vmem:[%s309_s1 + $0x30] sm:$0xff]  }
   0x4   :  { %219 = vmatprep.subr.bf16.mxu0 %v239_v2  ;;  %v245_v11 = vld [vmem:[%s309_s1 + $0x38] sm:$0xff]   ;;  %v27_v12 = vld [vmem:[%s310_s0 + $0x10] sm:$0xf]  ;;  %v195_v17 = vld [vmem:[%s311_s2] ss:$0 sm:$0xff] }
   0x5   :  { %233 = vmatprep.mubr.bf16.mxu0 %v28_v7  ;;  %v29_v13 = vpack.c.bf16 %v27_v12, %v27_v12 }
   0x7   :  { %220 = vmatpush3.bf16.msra.mxu0 %v239_v2 }
   0x8   :  { %221 = vmatprep.subr.bf16.mxu0 %v240_v3  ;;  %v24_v14 = vld [vmem:[#allocation2 + $0x10] sm:$0xf] }
   0xb   :  { %222 = vmatpush3.bf16.msra.mxu0 %v240_v3 }
   0xc   :  { %223 = vmatprep.subr.bf16.mxu0 %v241_v4 }
   0xf   :  { %224 = vmatpush3.bf16.msra.mxu0 %v241_v4 }
  0x10   :  { %225 = vmatprep.subr.bf16.mxu0 %v242_v8 }
  0x13   :  { %226 = vmatpush3.bf16.msra.mxu0 %v242_v8 }
  0x14   :  { %227 = vmatprep.subr.bf16.mxu0 %v243_v9 }
  0x17   :  { %228 = vmatpush3.bf16.msra.mxu0 %v243_v9 }
  0x18   :  { %229 = vmatprep.subr.bf16.mxu0 %v244_v10 }
  0x1b   :  { %230 = vmatpush3.bf16.msra.mxu0 %v244_v10 }
  0x1c   :  { %231 = vmatprep.subr.bf16.mxu0 %v245_v11 }
  0x1f   :  { %232 = vmatpush3.bf16.msra.mxu0 %v245_v11 }
  0x22   :  { %234 = vmatmul.mubr.bf16.vlgmr.msra.gmra.mrb[0].mxu0 %v29_v13 }
  0xf5   :  { %v235_v15 = vpop.f32.mrb[0].mxu0 }
  0xf6   :  { %v144_v16 = vadd.f32 %v235_v15, %v24_v14  ;;  %v128_v18 = vpop.f32.mrb[1].mxu0 }
  0xf7   :  { %v236_v19 = vpop.f32.mrb[2].mxu0  ;;  %v161_v21 = vadd.f32 %v195_v17, %v128_v18 }
  0xf8   :  { %147 = vst [vmem:[#allocation2 + $0x10] sm:$0xf] %v144_v16  ;;  %v131_v20 = vpop.f32.mrb[3].mxu0 }
  0xf9   :  { %v162_v22 = vadd.f32 %v195_v17, %v131_v20  ;;  %v164_v23 = vmax.f32 %v161_v21, 0.0 }
  0xfb   :  { %v165_v24 = vmax.f32 %v162_v22, 0.0 }
  0xfd   :  { %v205_v26 = vpack.c.bf16 %v165_v24, %v164_v23 }
  0xff   :  { %v153_v25 = vld [vmem:[#allocation2 + $0x10] sm:$0xf]  ;;  %206 = vst [vmem:[%s312_s3] sm:$0xff] %v205_v26  }
 0x100   :  { %v163_v27 = vadd.f32 %v195_v17, %v153_v25 }
 0x102   :  { %v166_v28 = vmax.f32 %v163_v27, 0.0 }
 0x104   :  { %v201_v29 = vpack.c.bf16 %v166_v28, %v166_v28 }
 0x106   :  { %182 = vst [vmem:[%s312_s3 + $0x8] sm:$0x3] %v201_v29 }

// kernel: seq2seq_forward.66
= control target key start
LH: loop header
LB: loop body
LE: loop exit
PB: predicated region body
PF: predicated region fallthrough
CT: control target
= control target key end

     0   :  { %v240_v1 = vmov 0.0   ;;  %s317_s1 = inlined_call_operand.vmem [shape: bf16[128,128], index: 1, kind: input, shape index: {}]   ;;  %s318_s0 = inlined_call_operand.vmem [shape: bf16[20,128], index: 0, kind: input, shape index: {}]   ;;  %s319_s2 = inlined_call_operand.vmem [shape: f32[1,128], index: 2, kind: input, shape index: {}]   ;;  %s320_s3 = inlined_call_operand.vmem [shape: f32[20,128], index: 3, kind: input, shape index: {}]   ;;  %s321_s4 = inlined_call_operand.vmem [shape: f32[20,128], index: 4, kind: output, shape index: {}]  }
   0x1   :  { %v230_v0 = vld [vmem:[%s317_s1] sm:$0xff]   ;;  %24 = vst [vmem:[#allocation2 + $0x10] sm:$0xf] %v240_v1  ;;  %v231_v2 = vld [vmem:[%s317_s1 + $0x8] sm:$0xff]   ;;  %v232_v3 = vld [vmem:[%s317_s1 + $0x10] sm:$0xff]  }
   0x2   :  { %209 = vmatprep.subr.bf16.mxu0 %v230_v0  ;;  %v233_v4 = vld [vmem:[%s317_s1 + $0x18] sm:$0xff]   ;;  %v238_v5 = vld [vmem:[%s318_s0] sm:$0xff]   ;;  %v235_v7 = vld [vmem:[%s317_s1 + $0x28] sm:$0xff]  }
   0x3   :  { %210 = vmatpush3.bf16.msra.mxu0 %v230_v0  ;;  %225 = vmatprep.mubr.bf16.mxu0 %v238_v5  ;;  %v234_v6 = vld [vmem:[%s317_s1 + $0x20] sm:$0xff]   ;;  %v236_v8 = vld [vmem:[%s317_s1 + $0x30] sm:$0xff]   ;;  %v237_v9 = vld [vmem:[%s317_s1 + $0x38] sm:$0xff]  }
   0x4   :  { %211 = vmatprep.subr.bf16.mxu0 %v231_v2  ;;  %v239_v10 = vld [vmem:[%s318_s0 + $0x8] ss:$0 sps:$4 sm:$0x33]   ;;  %v198_v14 = vld [vmem:[%s319_s2] ss:$0 sm:$0xff] }
   0x5   :  { %v175_v17 = vld [vmem:[%s320_s3] sm:$0xff]  ;;  %v176_v20 = vld [vmem:[%s320_s3 + $0x8] sm:$0xff]  ;;  %v177_v25 = vld [vmem:[%s320_s3 + $0x10] sm:$0xf] }
   0x7   :  { %212 = vmatpush3.bf16.msra.mxu0 %v231_v2 }
   0x8   :  { %213 = vmatprep.subr.bf16.mxu0 %v232_v3  ;;  %v27_v11 = vld [vmem:[#allocation2 + $0x10] sm:$0xf] }
   0xb   :  { %214 = vmatpush3.bf16.msra.mxu0 %v232_v3 }
   0xc   :  { %215 = vmatprep.subr.bf16.mxu0 %v233_v4 }
   0xf   :  { %216 = vmatpush3.bf16.msra.mxu0 %v233_v4 }
  0x10   :  { %217 = vmatprep.subr.bf16.mxu0 %v234_v6 }
  0x13   :  { %218 = vmatpush3.bf16.msra.mxu0 %v234_v6 }
  0x14   :  { %219 = vmatprep.subr.bf16.mxu0 %v235_v7 }
  0x17   :  { %220 = vmatpush3.bf16.msra.mxu0 %v235_v7 }
  0x18   :  { %221 = vmatprep.subr.bf16.mxu0 %v236_v8 }
  0x1b   :  { %222 = vmatpush3.bf16.msra.mxu0 %v236_v8 }
  0x1c   :  { %223 = vmatprep.subr.bf16.mxu0 %v237_v9 }
  0x1f   :  { %224 = vmatpush3.bf16.msra.mxu0 %v237_v9 }
  0x22   :  { %226 = vmatmul.mubr.bf16.vlgmr.msra.gmra.mrb[0].mxu0 %v239_v10 }
  0xf5   :  { %v227_v12 = vpop.f32.mrb[0].mxu0 }
  0xf6   :  { %v155_v13 = vadd.f32 %v227_v12, %v27_v11  ;;  %v139_v15 = vpop.f32.mrb[1].mxu0 }
  0xf7   :  { %v228_v16 = vpop.f32.mrb[2].mxu0  ;;  %v172_v19 = vadd.f32 %v198_v14, %v139_v15 }
  0xf8   :  { %158 = vst [vmem:[#allocation2 + $0x10] sm:$0xf] %v155_v13  ;;  %v142_v18 = vpop.f32.mrb[3].mxu0 }
  0xf9   :  { %v178_v21 = vadd.f32 %v175_v17, %v172_v19  ;;  %v173_v22 = vadd.f32 %v198_v14, %v142_v18 }
  0xfb   :  { %181 = vst [vmem:[%s321_s4] sm:$0xff] %v178_v21  ;;  %v179_v23 = vadd.f32 %v176_v20, %v173_v22 }
  0xfd   :  { %182 = vst [vmem:[%s321_s4 + $0x8] sm:$0xff] %v179_v23 }
  0xff   :  { %v164_v24 = vld [vmem:[#allocation2 + $0x10] sm:$0xf] }
 0x100   :  { %v174_v26 = vadd.f32 %v198_v14, %v164_v24 }
 0x102   :  { %v180_v27 = vadd.f32 %v177_v25, %v174_v26 }
 0x104   :  { %183 = vst [vmem:[%s321_s4 + $0x10] sm:$0xf] %v180_v27 }

// kernel: seq2seq_forward.81
= control target key start
LH: loop header
LB: loop body
LE: loop exit
PB: predicated region body
PF: predicated region fallthrough
CT: control target
= control target key end

     0   :  { %v219_v1 = vmov 0.0   ;;  %s285_s1 = inlined_call_operand.vmem [shape: bf16[128,128], index: 1, kind: input, shape index: {}]   ;;  %s286_s0 = inlined_call_operand.vmem [shape: f32[20,128], index: 0, kind: input, shape index: {}]   ;;  %s287_s2 = inlined_call_operand.vmem [shape: f32[1,128], index: 2, kind: input, shape index: {}]   ;;  %s288_s3 = inlined_call_operand.vmem [shape: f32[20,128], index: 3, kind: output, shape index: {}]  }
   0x1   :  { %v211_v0 = vld [vmem:[%s285_s1] sm:$0xff]   ;;  %21 = vst [vmem:[#allocation2 + $0x10] sm:$0xf] %v219_v1  ;;  %v212_v2 = vld [vmem:[%s285_s1 + $0x8] sm:$0xff]   ;;  %v213_v3 = vld [vmem:[%s285_s1 + $0x10] sm:$0xff]  }
   0x2   :  { %190 = vmatprep.subr.bf16.mxu0 %v211_v0  ;;  %v214_v4 = vld [vmem:[%s285_s1 + $0x18] sm:$0xff]   ;;  %v25_v5 = vld [vmem:[%s286_s0] sm:$0xff]  ;;  %v26_v6 = vld [vmem:[%s286_s0 + $0x8] sm:$0xff] }
   0x3   :  { %191 = vmatpush3.bf16.msra.mxu0 %v211_v0  ;;  %v28_v7 = vpack.c.bf16 %v26_v6, %v25_v5  ;;  %v215_v8 = vld [vmem:[%s285_s1 + $0x20] sm:$0xff]   ;;  %v216_v9 = vld [vmem:[%s285_s1 + $0x28] sm:$0xff]   ;;  %v217_v10 = vld [vmem:[%s285_s1 + $0x30] sm:$0xff]  }
   0x4   :  { %192 = vmatprep.subr.bf16.mxu0 %v212_v2  ;;  %v218_v11 = vld [vmem:[%s285_s1 + $0x38] sm:$0xff]   ;;  %v27_v12 = vld [vmem:[%s286_s0 + $0x10] sm:$0xf]  ;;  %v179_v17 = vld [vmem:[%s287_s2] ss:$0 sm:$0xff] }
   0x5   :  { %206 = vmatprep.mubr.bf16.mxu0 %v28_v7  ;;  %v29_v13 = vpack.c.bf16 %v27_v12, %v27_v12 }
   0x7   :  { %193 = vmatpush3.bf16.msra.mxu0 %v212_v2 }
   0x8   :  { %194 = vmatprep.subr.bf16.mxu0 %v213_v3  ;;  %v24_v14 = vld [vmem:[#allocation2 + $0x10] sm:$0xf] }
   0xb   :  { %195 = vmatpush3.bf16.msra.mxu0 %v213_v3 }
   0xc   :  { %196 = vmatprep.subr.bf16.mxu0 %v214_v4 }
   0xf   :  { %197 = vmatpush3.bf16.msra.mxu0 %v214_v4 }
  0x10   :  { %198 = vmatprep.subr.bf16.mxu0 %v215_v8 }
  0x13   :  { %199 = vmatpush3.bf16.msra.mxu0 %v215_v8 }
  0x14   :  { %200 = vmatprep.subr.bf16.mxu0 %v216_v9 }
  0x17   :  { %201 = vmatpush3.bf16.msra.mxu0 %v216_v9 }
  0x18   :  { %202 = vmatprep.subr.bf16.mxu0 %v217_v10 }
  0x1b   :  { %203 = vmatpush3.bf16.msra.mxu0 %v217_v10 }
  0x1c   :  { %204 = vmatprep.subr.bf16.mxu0 %v218_v11 }
  0x1f   :  { %205 = vmatpush3.bf16.msra.mxu0 %v218_v11 }
  0x22   :  { %207 = vmatmul.mubr.bf16.vlgmr.msra.gmra.mrb[0].mxu0 %v29_v13 }
  0xf5   :  { %v208_v15 = vpop.f32.mrb[0].mxu0 }
  0xf6   :  { %v144_v16 = vadd.f32 %v208_v15, %v24_v14  ;;  %v128_v18 = vpop.f32.mrb[1].mxu0 }
  0xf7   :  { %v209_v19 = vpop.f32.mrb[2].mxu0  ;;  %v161_v21 = vadd.f32 %v179_v17, %v128_v18 }
  0xf8   :  { %147 = vst [vmem:[#allocation2 + $0x10] sm:$0xf] %v144_v16  ;;  %v131_v20 = vpop.f32.mrb[3].mxu0 }
  0xf9   :  { %164 = vst [vmem:[%s288_s3] sm:$0xff] %v161_v21  ;;  %v162_v22 = vadd.f32 %v179_v17, %v131_v20 }
  0xfb   :  { %165 = vst [vmem:[%s288_s3 + $0x8] sm:$0xff] %v162_v22 }
  0xff   :  { %v153_v23 = vld [vmem:[#allocation2 + $0x10] sm:$0xf] }
 0x100   :  { %v163_v24 = vadd.f32 %v179_v17, %v153_v23 }
 0x102   :  { %166 = vst [vmem:[%s288_s3 + $0x10] sm:$0xf] %v163_v24 }

</bundles_post_ra>
